<compile_context>
chip_gen: v7x
topology: tpu7x:2x2x1
jax: 0.10.0
libtpu: 0.0.40
codegen_flags: <defaults>
</compile_context>

<pallas_src>
import math
import jax
import jax.numpy as jnp
from jax import lax
from jax.experimental import pallas as pl
from jax.experimental.pallas import tpu as pltpu

# ---------------- configuration (small, consistent with the module) ----------
D_MODEL = 32      # d_model
VOCAB = 50        # vocab_size
NUM_CAT = 3       # num_cat_var
NUM_NUM = 5       # num_numerical_var
D_FC = 64         # d_fc
N_CLASSES = 3     # n_classes
B = 2             # batch
SEQ = 8           # text sequence length
F_TAB = NUM_CAT + NUM_NUM
D1 = D_MODEL + 1  # fused dim per modality (ones-augmented)

G = 4 * D_MODEL            # stacked gate width (= 128 lanes)
VOCAB_PAD = 56             # vocab rounded up to a multiple of 8 sublanes

# ---- packed parameter slab layout (all sections start on 8-row boundaries) ----
R_EMB = 0                  # 56 rows : emb @ W_ih (pre-projected embedding table)
R_WHH = 56                 # 128 rows: W_hh zero-padded to (4D,4D); real rows [3D,4D)
R_BG = 184                 # 1 row   : combined LSTM bias (b_ih + b_hh), stacked gates
R_B1 = 185                 # 1 row   : post-fusion b1 in lanes [0,D_FC)
R_B2 = 186                 # 1 row   : post-fusion b2 in lanes [0,N_CLASSES)
R_TB1 = 187                # 1 row   : tabular fc1 bias in lanes [0,D)
R_TB2 = 188                # 1 row   : tabular fc2 bias
R_TB3 = 189                # 1 row   : tabular fc3 bias
R_FCB = 190                # 1 row   : text fc1 bias
R_W2 = 192                 # 64 rows : post-fusion W2 padded to 128 lanes
R_TW1 = 256                # 8 rows  : tabular fc1 weight in lanes [0,D)
R_TW2 = 264                # 32 rows : tabular fc2 weight
R_TW3 = 296                # 32 rows : tabular fc3 weight
R_FCW = 328                # 32 rows : text fc1 weight
R_TOTAL = 360

assert G == 128 and VOCAB <= VOCAB_PAD and VOCAB_PAD % 8 == 0


# ---------------- the single fused Pallas kernel ------------------------------
def tfn_fused_kernel(ids_ref, cat_ref, num_ref, slab_ref, w1p_ref, ee_ref, rr_ref, out_ref):
    f32 = jnp.float32
    D = D_MODEL
    Bn = cat_ref.shape[0]
    seq = ids_ref.shape[0] // Bn

    # ---- tabular subnet: fc1-relu-fc2-relu-fc3 (dropout == identity) ----
    tab_x = jnp.concatenate([cat_ref[...].astype(f32), num_ref[...]], axis=1)
    h1 = jnp.maximum(
        jnp.dot(tab_x, slab_ref[R_TW1:R_TW1 + F_TAB, :D], preferred_element_type=f32)
        + slab_ref[R_TB1:R_TB1 + 1, :D], 0.0)
    h2 = jnp.maximum(
        jnp.dot(h1, slab_ref[R_TW2:R_TW2 + D, :D], preferred_element_type=f32)
        + slab_ref[R_TB2:R_TB2 + 1, :D], 0.0)
    tab_h = (jnp.dot(h2, slab_ref[R_TW3:R_TW3 + D, :D], preferred_element_type=f32)
             + slab_ref[R_TB3:R_TB3 + 1, :D])                               # (B, D)

    # ---- text subnet ----
    # One-hot token matmul replaces the scalar gather: the embedding table is
    # pre-projected through W_ih host-side, so this single MXU matmul is the
    # hoisted input projection for every timestep at once.
    ids = ids_ref[...]                                                       # (seq*B, 1) int32
    one_hot = (lax.broadcasted_iota(jnp.int32, (seq * Bn, VOCAB_PAD), 1) == ids).astype(f32)
    x_proj = (jnp.dot(one_hot, slab_ref[R_EMB:R_EMB + VOCAB_PAD, :], preferred_element_type=f32)
              + slab_ref[R_BG:R_BG + 1, :])                                  # (seq*B, 4D)

    # Fully unrolled LSTM recurrence (gate order i|f|g|o along lanes).
    # State lives in fixed 32-lane chunks of the full 128-lane vreg:
    #   c in lanes [D,2D)  (aligned with the f gate),
    #   h in lanes [3D,4D) (aligned with the o gate),
    # so the nonlinearities run once per step on the full vreg and chunk
    # alignment uses XLU rolls instead of per-gate lane slicing.
    whh_pad = slab_ref[R_WHH:R_WHH + G, :]                                   # (4D, 4D)
    lane = lax.broadcasted_iota(jnp.int32, (Bn, G), 1)
    g_mask = (lane >= 2 * D) & (lane < 3 * D)
    h128 = jnp.zeros((Bn, G), f32)
    c128 = jnp.zeros((Bn, G), f32)
    for t in range(seq):
        gates = x_proj[t * Bn:(t + 1) * Bn, :] + jnp.dot(h128, whh_pad,
                                                         preferred_element_type=f32)
        act = jnp.where(g_mask, jnp.tanh(gates), jax.nn.sigmoid(gates))      # [i|f|g|o]
        ig = act * pltpu.roll(act, 2 * D, axis=1)                            # i*g at [0,D) and [2D,3D)
        c128 = act * c128 + pltpu.roll(ig, D, axis=1)                        # lanes [D,2D): f*c + i*g
        h128 = act * pltpu.roll(jnp.tanh(c128), 2 * D, axis=1)               # lanes [3D,4D): o*tanh(c)
    h_fin = h128[:, 3 * D:G]                                                 # (B, D)
    text_h = (jnp.dot(h_fin, slab_ref[R_FCW:R_FCW + D, :D], preferred_element_type=f32)
              + slab_ref[R_FCB:R_FCB + 1, :D])                               # (B, D)

    # ---- tensor fusion + post-fusion MLP, all on the MXU ----
    ones = jnp.ones((Bn, 1), f32)
    text1 = jnp.concatenate([ones, text_h], axis=1)                          # (B, D1)
    tab1 = jnp.concatenate([ones, tab_h], axis=1)                            # (B, D1)
    p_big = jnp.dot(text1, w1p_ref[...], preferred_element_type=f32)         # (B, D1*D_FC)
    t_big = jnp.dot(tab1, ee_ref[...], preferred_element_type=f32)           # tab1 replicated per chunk
    acc = jnp.dot(t_big * p_big, rr_ref[...], preferred_element_type=f32)    # (B, D_FC) chunk-sum
    y1 = jnp.maximum(acc + slab_ref[R_B1:R_B1 + 1, :D_FC], 0.0)
    out_ref[...] = (jnp.dot(y1, slab_ref[R_W2:R_W2 + D_FC, :], preferred_element_type=f32)
                    + slab_ref[R_B2:R_B2 + 1, :]).astype(out_ref.dtype)      # lane-dense (B, 128)


# ---------------- wrapper: one gridless pallas_call ---------------------------
def tfn_forward(packed, texts, padding_mask, categoricals, numericals):
    del padding_mask  # unused in the PyTorch forward as well
    Bn, seq = texts.shape
    # Row (t*B + b) of ids holds texts[b, t] so x_proj rows group by timestep.
    ids = jnp.transpose(texts).reshape(seq * Bn, 1).astype(jnp.int32)
    vmem = pl.BlockSpec(memory_space=pltpu.MemorySpace.VMEM)
    out = pl.pallas_call(
        tfn_fused_kernel,
        out_shape=jax.ShapeDtypeStruct((Bn, G), jnp.float32),
        in_specs=[vmem] * 7,
        out_specs=vmem,
        # TODO(synk): if batch grows on v7x, add a batch grid axis with
        # dimension_semantics=("parallel",) to use both TensorCores.
    )(ids, categoricals, numericals,
      packed["slab"], packed["w1p"], packed["e_expand"], packed["r_reduce"])
    return out[:, :N_CLASSES]


# ---------------- deterministic parameter init --------------------------------
def kaiming_uniform(key, fan_in, shape):
    bound = math.sqrt(6.0 / fan_in)
    return jax.random.uniform(key, shape, jnp.float32, -bound, bound)


def init_params(key):
    ks = jax.random.split(key, 12)
    k_lstm = 1.0 / math.sqrt(D_MODEL)
    p = {
        # Tabular subnet (weights stored as (in, out), biases zero per init_weights)
        "tab_w1": kaiming_uniform(ks[0], F_TAB, (F_TAB, D_MODEL)),
        "tab_b1": jnp.zeros((1, D_MODEL), jnp.float32),
        "tab_w2": kaiming_uniform(ks[1], D_MODEL, (D_MODEL, D_MODEL)),
        "tab_b2": jnp.zeros((1, D_MODEL), jnp.float32),
        "tab_w3": kaiming_uniform(ks[2], D_MODEL, (D_MODEL, D_MODEL)),
        "tab_b3": jnp.zeros((1, D_MODEL), jnp.float32),
        # Text subnet (PyTorch gate order i, f, g, o)
        "emb": kaiming_uniform(ks[3], D_MODEL, (VOCAB, D_MODEL)),
        "lstm_wih": jax.random.uniform(ks[4], (4, D_MODEL, D_MODEL), jnp.float32, -k_lstm, k_lstm),
        "lstm_whh": jax.random.uniform(ks[5], (4, D_MODEL, D_MODEL), jnp.float32, -k_lstm, k_lstm),
        "lstm_b": (jax.random.uniform(ks[6], (4, 1, D_MODEL), jnp.float32, -k_lstm, k_lstm)
                   + jax.random.uniform(ks[7], (4, 1, D_MODEL), jnp.float32, -k_lstm, k_lstm)),
        "txt_fcw": kaiming_uniform(ks[8], D_MODEL, (D_MODEL, D_MODEL)),
        "txt_fcb": jnp.zeros((1, D_MODEL), jnp.float32),
        # Post-fusion head
        "pf_w1_flat": kaiming_uniform(ks[9], D1 * D1, (D1 * D1, D_FC)),
        "pf_b1": jnp.zeros((1, D_FC), jnp.float32),
        "pf_w2": kaiming_uniform(ks[10], D_FC, (D_FC, N_CLASSES)),
        "pf_b2": jnp.zeros((1, N_CLASSES), jnp.float32),
    }
    return p


def pack_params(p):
    """Host-side one-time derivation of the fused-kernel layouts."""
    f32 = jnp.float32
    D = D_MODEL
    # Stacked LSTM gates: columns [i | f | g | o], each D wide -> lane-dense 4D=128.
    wih_stk = jnp.transpose(p["lstm_wih"], (1, 0, 2)).reshape(D, G)
    whh_stk = jnp.transpose(p["lstm_whh"], (1, 0, 2)).reshape(D, G)
    bg = jnp.transpose(p["lstm_b"], (1, 0, 2)).reshape(1, G)

    slab = jnp.zeros((R_TOTAL, G), f32)
    slab = slab.at[R_EMB:R_EMB + VOCAB, :].set(p["emb"] @ wih_stk)      # emb pre-projected through W_ih
    slab = slab.at[R_WHH + 3 * D:R_WHH + G, :].set(whh_stk)             # W_hh rows aligned with h's lane chunk
    slab = slab.at[R_BG, :].set(bg[0])
    slab = slab.at[R_B1, :D_FC].set(p["pf_b1"][0])
    slab = slab.at[R_B2, :N_CLASSES].set(p["pf_b2"][0])
    slab = slab.at[R_TB1, :D].set(p["tab_b1"][0])
    slab = slab.at[R_TB2, :D].set(p["tab_b2"][0])
    slab = slab.at[R_TB3, :D].set(p["tab_b3"][0])
    slab = slab.at[R_FCB, :D].set(p["txt_fcb"][0])
    slab = slab.at[R_W2:R_W2 + D_FC, :N_CLASSES].set(p["pf_w2"])
    slab = slab.at[R_TW1:R_TW1 + F_TAB, :D].set(p["tab_w1"])
    slab = slab.at[R_TW2:R_TW2 + D, :D].set(p["tab_w2"])
    slab = slab.at[R_TW3:R_TW3 + D, :D].set(p["tab_w3"])
    slab = slab.at[R_FCW:R_FCW + D, :D].set(p["txt_fcw"])

    # Permuted post-fusion W1: w1p[j, i*D_FC + k] = W1r[i, j, k], W1r = W1_flat.reshape(D1,D1,D_FC)
    w1p = p["pf_w1_flat"].reshape(D1, D1, D_FC).transpose(1, 0, 2).reshape(D1, D1 * D_FC)
    # Constant 0/1 matrices turning the 33-term fused contraction into MXU work.
    e_expand = jnp.repeat(jnp.eye(D1, dtype=f32), D_FC, axis=1)         # (D1, D1*D_FC)
    r_reduce = jnp.tile(jnp.eye(D_FC, dtype=f32), (D1, 1))              # (D1*D_FC, D_FC)
    return {"slab": slab, "w1p": w1p, "e_expand": e_expand, "r_reduce": r_reduce}


# ---------------- pure-JAX reference (for silent correctness check) ----------
def tfn_reference(p, texts, padding_mask, categoricals, numericals):
    tab_x = jnp.concatenate(
        [categoricals.astype(jnp.float32), numericals.astype(jnp.float32)], axis=1)
    h1 = jax.nn.relu(tab_x @ p["tab_w1"] + p["tab_b1"])
    h2 = jax.nn.relu(h1 @ p["tab_w2"] + p["tab_b2"])
    tab_h = h2 @ p["tab_w3"] + p["tab_b3"]

    emb = jnp.take(p["emb"], texts, axis=0)
    x_tm = jnp.transpose(emb, (1, 0, 2))  # (S, B, D)

    def step(carry, x_t):
        h, c = carry
        gate = lambda k: x_t @ p["lstm_wih"][k] + h @ p["lstm_whh"][k] + p["lstm_b"][k]
        i_g, f_g = jax.nn.sigmoid(gate(0)), jax.nn.sigmoid(gate(1))
        g_g, o_g = jnp.tanh(gate(2)), jax.nn.sigmoid(gate(3))
        c_n = f_g * c + i_g * g_g
        h_n = o_g * jnp.tanh(c_n)
        return (h_n, c_n), None

    z0 = (jnp.zeros((texts.shape[0], D_MODEL)), jnp.zeros((texts.shape[0], D_MODEL)))
    (h_fin, _), _ = lax.scan(step, z0, x_tm)
    text_h = h_fin @ p["txt_fcw"] + p["txt_fcb"]

    ones = jnp.ones((texts.shape[0], 1), jnp.float32)
    tab1 = jnp.concatenate([ones, tab_h], axis=1)
    text1 = jnp.concatenate([ones, text_h], axis=1)
    fusion = jnp.einsum("bi,bj->bij", tab1, text1).reshape(texts.shape[0], -1)
    y1 = jax.nn.relu(fusion @ p["pf_w1_flat"] + p["pf_b1"])
    return y1 @ p["pf_w2"] + p["pf_b2"]


if __name__ == "__main__":
    key = jax.random.PRNGKey(0)
    k_param, k_txt, k_cat, k_num = jax.random.split(key, 4)

    params = init_params(k_param)
    packed = pack_params(params)

    texts = jax.random.randint(k_txt, (B, SEQ), 0, VOCAB, dtype=jnp.int32)
    padding_mask = (texts != 0)
    categoricals = jax.random.randint(k_cat, (B, NUM_CAT), 0, 4, dtype=jnp.int32)
    numericals = jax.random.normal(k_num, (B, NUM_NUM), jnp.float32)

    out = tfn_forward(packed, texts, padding_mask, categoricals, numericals)
    out = jax.block_until_ready(out)

    ref = tfn_reference(params, texts, padding_mask, categoricals, numericals)
    assert out.shape == (B, N_CLASSES)
    assert jnp.allclose(out, ref, atol=1e-4, rtol=1e-4)

    print("KERNEL_OK")
</pallas_src>

<mosaic_0001>
module attributes {stable_mosaic.version = 11 : i64} {
  func.func @tfn_fused_kernel(%arg0: memref<16x1xi32, #tpu.memory_space<vmem>>, %arg1: memref<2x3xi32, #tpu.memory_space<vmem>>, %arg2: memref<2x5xf32, #tpu.memory_space<vmem>>, %arg3: memref<360x128xf32, #tpu.memory_space<vmem>>, %arg4: memref<33x2112xf32, #tpu.memory_space<vmem>>, %arg5: memref<33x2112xf32, #tpu.memory_space<vmem>>, %arg6: memref<2112x64xf32, #tpu.memory_space<vmem>>, %arg7: memref<2x128xf32, #tpu.memory_space<vmem>>) attributes {dimension_semantics = [], scalar_prefetch = 0 : i64, scratch_operands = 0 : i64, tpu.core_type = #tpu.core_type<tc>} {
    %c0 = arith.constant 0 : index
    %c0_0 = arith.constant 0 : index
    %0 = vector.load %arg1[%c0, %c0_0] : memref<2x3xi32, #tpu.memory_space<vmem>>, vector<2x3xi32>
    %1 = arith.sitofp %0 : vector<2x3xi32> to vector<2x3xf32>
    %c0_1 = arith.constant 0 : index
    %c0_2 = arith.constant 0 : index
    %2 = vector.load %arg2[%c0_1, %c0_2] : memref<2x5xf32, #tpu.memory_space<vmem>>, vector<2x5xf32>
    %3 = tpu.concatenate %1, %2 in 1 : vector<2x3xf32>, vector<2x5xf32> -> vector<2x8xf32>
    %c256 = arith.constant 256 : index
    %c0_3 = arith.constant 0 : index
    %4 = vector.load %arg3[%c256, %c0_3] : memref<360x128xf32, #tpu.memory_space<vmem>>, vector<8x32xf32>
    %cst = arith.constant dense<0.000000e+00> : vector<2x32xf32>
    %5 = tpu.matmul %3, %4, %cst {dimension_numbers = #tpu.dot_dimension_numbers<[1], [0], [0], [1], [0, 0, 1, 1], [], []>} : vector<2x8xf32>, vector<8x32xf32>, vector<2x32xf32> -> vector<2x32xf32>
    %c187 = arith.constant 187 : index
    %c0_4 = arith.constant 0 : index
    %6 = vector.load %arg3[%c187, %c0_4] : memref<360x128xf32, #tpu.memory_space<vmem>>, vector<1x32xf32>
    %7 = vector.broadcast %6 : vector<1x32xf32> to vector<2x32xf32>
    %8 = arith.addf %5, %7 : vector<2x32xf32>
    %cst_5 = arith.constant 0.000000e+00 : f32
    %9 = vector.broadcast %cst_5 : f32 to vector<2x32xf32>
    %10 = arith.maximumf %8, %9 : vector<2x32xf32>
    %c264 = arith.constant 264 : index
    %c0_6 = arith.constant 0 : index
    %11 = vector.load %arg3[%c264, %c0_6] : memref<360x128xf32, #tpu.memory_space<vmem>>, vector<32x32xf32>
    %cst_7 = arith.constant dense<0.000000e+00> : vector<2x32xf32>
    %12 = tpu.matmul %10, %11, %cst_7 {dimension_numbers = #tpu.dot_dimension_numbers<[1], [0], [0], [1], [0, 0, 1, 1], [], []>} : vector<2x32xf32>, vector<32x32xf32>, vector<2x32xf32> -> vector<2x32xf32>
    %c188 = arith.constant 188 : index
    %c0_8 = arith.constant 0 : index
    %13 = vector.load %arg3[%c188, %c0_8] : memref<360x128xf32, #tpu.memory_space<vmem>>, vector<1x32xf32>
    %14 = vector.broadcast %13 : vector<1x32xf32> to vector<2x32xf32>
    %15 = arith.addf %12, %14 : vector<2x32xf32>
    %cst_9 = arith.constant 0.000000e+00 : f32
    %16 = vector.broadcast %cst_9 : f32 to vector<2x32xf32>
    %17 = arith.maximumf %15, %16 : vector<2x32xf32>
    %c296 = arith.constant 296 : index
    %c0_10 = arith.constant 0 : index
    %18 = vector.load %arg3[%c296, %c0_10] : memref<360x128xf32, #tpu.memory_space<vmem>>, vector<32x32xf32>
    %cst_11 = arith.constant dense<0.000000e+00> : vector<2x32xf32>
    %19 = tpu.matmul %17, %18, %cst_11 {dimension_numbers = #tpu.dot_dimension_numbers<[1], [0], [0], [1], [0, 0, 1, 1], [], []>} : vector<2x32xf32>, vector<32x32xf32>, vector<2x32xf32> -> vector<2x32xf32>
    %c189 = arith.constant 189 : index
    %c0_12 = arith.constant 0 : index
    %20 = vector.load %arg3[%c189, %c0_12] : memref<360x128xf32, #tpu.memory_space<vmem>>, vector<1x32xf32>
    %21 = vector.broadcast %20 : vector<1x32xf32> to vector<2x32xf32>
    %22 = arith.addf %19, %21 : vector<2x32xf32>
    %c0_13 = arith.constant 0 : index
    %c0_14 = arith.constant 0 : index
    %23 = vector.load %arg0[%c0_13, %c0_14] : memref<16x1xi32, #tpu.memory_space<vmem>>, vector<16x1xi32>
    %24 = tpu.iota {dimensions = array<i32: 1>} : vector<16x56xi32>
    %25 = vector.broadcast %23 : vector<16x1xi32> to vector<16x56xi32>
    %26 = arith.cmpi eq, %24, %25 : vector<16x56xi32>
    %27 = arith.extui %26 : vector<16x56xi1> to vector<16x56xi32>
    %28 = arith.sitofp %27 : vector<16x56xi32> to vector<16x56xf32>
    %c0_15 = arith.constant 0 : index
    %c0_16 = arith.constant 0 : index
    %29 = vector.load %arg3[%c0_15, %c0_16] : memref<360x128xf32, #tpu.memory_space<vmem>>, vector<56x128xf32>
    %cst_17 = arith.constant dense<0.000000e+00> : vector<16x128xf32>
    %30 = tpu.matmul %28, %29, %cst_17 {dimension_numbers = #tpu.dot_dimension_numbers<[1], [0], [0], [1], [0, 0, 1, 1], [], []>} : vector<16x56xf32>, vector<56x128xf32>, vector<16x128xf32> -> vector<16x128xf32>
    %c184 = arith.constant 184 : index
    %c0_18 = arith.constant 0 : index
    %31 = vector.load %arg3[%c184, %c0_18] : memref<360x128xf32, #tpu.memory_space<vmem>>, vector<1x128xf32>
    %32 = vector.broadcast %31 : vector<1x128xf32> to vector<16x128xf32>
    %33 = arith.addf %30, %32 : vector<16x128xf32>
    %c56 = arith.constant 56 : index
    %c0_19 = arith.constant 0 : index
    %34 = vector.load %arg3[%c56, %c0_19] : memref<360x128xf32, #tpu.memory_space<vmem>>, vector<128x128xf32>
    %35 = tpu.iota {dimensions = array<i32: 1>} : vector<2x128xi32>
    %c64_i32 = arith.constant 64 : i32
    %36 = vector.broadcast %c64_i32 : i32 to vector<2x128xi32>
    %37 = arith.cmpi sge, %35, %36 : vector<2x128xi32>
    %c96_i32 = arith.constant 96 : i32
    %38 = vector.broadcast %c96_i32 : i32 to vector<2x128xi32>
    %39 = arith.cmpi slt, %35, %38 : vector<2x128xi32>
    %40 = arith.andi %37, %39 : vector<2x128xi1>
    %cst_20 = arith.constant 0.000000e+00 : f32
    %41 = vector.broadcast %cst_20 : f32 to vector<2x128xf32>
    %cst_21 = arith.constant 0.000000e+00 : f32
    %42 = vector.broadcast %cst_21 : f32 to vector<2x128xf32>
    %43 = vector.extract_strided_slice %33 {offsets = [0, 0], sizes = [2, 128], strides = [1, 1]} : vector<16x128xf32> to vector<2x128xf32>
    %cst_22 = arith.constant dense<0.000000e+00> : vector<2x128xf32>
    %44 = tpu.matmul %41, %34, %cst_22 {dimension_numbers = #tpu.dot_dimension_numbers<[1], [0], [0], [1], [0, 0, 1, 1], [], []>} : vector<2x128xf32>, vector<128x128xf32>, vector<2x128xf32> -> vector<2x128xf32>
    %45 = arith.addf %43, %44 : vector<2x128xf32>
    %46 = math.tanh %45 : vector<2x128xf32>
    %47 = arith.negf %45 : vector<2x128xf32>
    %48 = math.exp %47 : vector<2x128xf32>
    %cst_23 = arith.constant 1.000000e+00 : f32
    %49 = vector.broadcast %cst_23 : f32 to vector<2x128xf32>
    %50 = arith.addf %49, %48 : vector<2x128xf32>
    %51 = arith.divf %49, %50 : vector<2x128xf32>
    %52 = arith.select %40, %46, %51 : vector<2x128xi1>, vector<2x128xf32>
    %c64_i32_24 = arith.constant 64 : i32
    %53 = tpu.dynamic_rotate %52 by %c64_i32_24 dim 1 : vector<2x128xf32>, i32 -> vector<2x128xf32>
    %54 = arith.mulf %52, %53 : vector<2x128xf32>
    %55 = arith.mulf %52, %42 : vector<2x128xf32>
    %c32_i32 = arith.constant 32 : i32
    %56 = tpu.dynamic_rotate %54 by %c32_i32 dim 1 : vector<2x128xf32>, i32 -> vector<2x128xf32>
    %57 = arith.addf %55, %56 : vector<2x128xf32>
    %58 = math.tanh %57 : vector<2x128xf32>
    %c64_i32_25 = arith.constant 64 : i32
    %59 = tpu.dynamic_rotate %58 by %c64_i32_25 dim 1 : vector<2x128xf32>, i32 -> vector<2x128xf32>
    %60 = arith.mulf %52, %59 : vector<2x128xf32>
    %61 = vector.extract_strided_slice %33 {offsets = [2, 0], sizes = [2, 128], strides = [1, 1]} : vector<16x128xf32> to vector<2x128xf32>
    %cst_26 = arith.constant dense<0.000000e+00> : vector<2x128xf32>
    %62 = tpu.matmul %60, %34, %cst_26 {dimension_numbers = #tpu.dot_dimension_numbers<[1], [0], [0], [1], [0, 0, 1, 1], [], []>} : vector<2x128xf32>, vector<128x128xf32>, vector<2x128xf32> -> vector<2x128xf32>
    %63 = arith.addf %61, %62 : vector<2x128xf32>
    %64 = math.tanh %63 : vector<2x128xf32>
    %65 = arith.negf %63 : vector<2x128xf32>
    %66 = math.exp %65 : vector<2x128xf32>
    %cst_27 = arith.constant 1.000000e+00 : f32
    %67 = vector.broadcast %cst_27 : f32 to vector<2x128xf32>
    %68 = arith.addf %67, %66 : vector<2x128xf32>
    %69 = arith.divf %67, %68 : vector<2x128xf32>
    %70 = arith.select %40, %64, %69 : vector<2x128xi1>, vector<2x128xf32>
    %c64_i32_28 = arith.constant 64 : i32
    %71 = tpu.dynamic_rotate %70 by %c64_i32_28 dim 1 : vector<2x128xf32>, i32 -> vector<2x128xf32>
    %72 = arith.mulf %70, %71 : vector<2x128xf32>
    %73 = arith.mulf %70, %57 : vector<2x128xf32>
    %c32_i32_29 = arith.constant 32 : i32
    %74 = tpu.dynamic_rotate %72 by %c32_i32_29 dim 1 : vector<2x128xf32>, i32 -> vector<2x128xf32>
    %75 = arith.addf %73, %74 : vector<2x128xf32>
    %76 = math.tanh %75 : vector<2x128xf32>
    %c64_i32_30 = arith.constant 64 : i32
    %77 = tpu.dynamic_rotate %76 by %c64_i32_30 dim 1 : vector<2x128xf32>, i32 -> vector<2x128xf32>
    %78 = arith.mulf %70, %77 : vector<2x128xf32>
    %79 = vector.extract_strided_slice %33 {offsets = [4, 0], sizes = [2, 128], strides = [1, 1]} : vector<16x128xf32> to vector<2x128xf32>
    %cst_31 = arith.constant dense<0.000000e+00> : vector<2x128xf32>
    %80 = tpu.matmul %78, %34, %cst_31 {dimension_numbers = #tpu.dot_dimension_numbers<[1], [0], [0], [1], [0, 0, 1, 1], [], []>} : vector<2x128xf32>, vector<128x128xf32>, vector<2x128xf32> -> vector<2x128xf32>
    %81 = arith.addf %79, %80 : vector<2x128xf32>
    %82 = math.tanh %81 : vector<2x128xf32>
    %83 = arith.negf %81 : vector<2x128xf32>
    %84 = math.exp %83 : vector<2x128xf32>
    %cst_32 = arith.constant 1.000000e+00 : f32
    %85 = vector.broadcast %cst_32 : f32 to vector<2x128xf32>
    %86 = arith.addf %85, %84 : vector<2x128xf32>
    %87 = arith.divf %85, %86 : vector<2x128xf32>
    %88 = arith.select %40, %82, %87 : vector<2x128xi1>, vector<2x128xf32>
    %c64_i32_33 = arith.constant 64 : i32
    %89 = tpu.dynamic_rotate %88 by %c64_i32_33 dim 1 : vector<2x128xf32>, i32 -> vector<2x128xf32>
    %90 = arith.mulf %88, %89 : vector<2x128xf32>
    %91 = arith.mulf %88, %75 : vector<2x128xf32>
    %c32_i32_34 = arith.constant 32 : i32
    %92 = tpu.dynamic_rotate %90 by %c32_i32_34 dim 1 : vector<2x128xf32>, i32 -> vector<2x128xf32>
    %93 = arith.addf %91, %92 : vector<2x128xf32>
    %94 = math.tanh %93 : vector<2x128xf32>
    %c64_i32_35 = arith.constant 64 : i32
    %95 = tpu.dynamic_rotate %94 by %c64_i32_35 dim 1 : vector<2x128xf32>, i32 -> vector<2x128xf32>
    %96 = arith.mulf %88, %95 : vector<2x128xf32>
    %97 = vector.extract_strided_slice %33 {offsets = [6, 0], sizes = [2, 128], strides = [1, 1]} : vector<16x128xf32> to vector<2x128xf32>
    %cst_36 = arith.constant dense<0.000000e+00> : vector<2x128xf32>
    %98 = tpu.matmul %96, %34, %cst_36 {dimension_numbers = #tpu.dot_dimension_numbers<[1], [0], [0], [1], [0, 0, 1, 1], [], []>} : vector<2x128xf32>, vector<128x128xf32>, vector<2x128xf32> -> vector<2x128xf32>
    %99 = arith.addf %97, %98 : vector<2x128xf32>
    %100 = math.tanh %99 : vector<2x128xf32>
    %101 = arith.negf %99 : vector<2x128xf32>
    %102 = math.exp %101 : vector<2x128xf32>
    %cst_37 = arith.constant 1.000000e+00 : f32
    %103 = vector.broadcast %cst_37 : f32 to vector<2x128xf32>
    %104 = arith.addf %103, %102 : vector<2x128xf32>
    %105 = arith.divf %103, %104 : vector<2x128xf32>
    %106 = arith.select %40, %100, %105 : vector<2x128xi1>, vector<2x128xf32>
    %c64_i32_38 = arith.constant 64 : i32
    %107 = tpu.dynamic_rotate %106 by %c64_i32_38 dim 1 : vector<2x128xf32>, i32 -> vector<2x128xf32>
    %108 = arith.mulf %106, %107 : vector<2x128xf32>
    %109 = arith.mulf %106, %93 : vector<2x128xf32>
    %c32_i32_39 = arith.constant 32 : i32
    %110 = tpu.dynamic_rotate %108 by %c32_i32_39 dim 1 : vector<2x128xf32>, i32 -> vector<2x128xf32>
    %111 = arith.addf %109, %110 : vector<2x128xf32>
    %112 = math.tanh %111 : vector<2x128xf32>
    %c64_i32_40 = arith.constant 64 : i32
    %113 = tpu.dynamic_rotate %112 by %c64_i32_40 dim 1 : vector<2x128xf32>, i32 -> vector<2x128xf32>
    %114 = arith.mulf %106, %113 : vector<2x128xf32>
    %115 = vector.extract_strided_slice %33 {offsets = [8, 0], sizes = [2, 128], strides = [1, 1]} : vector<16x128xf32> to vector<2x128xf32>
    %cst_41 = arith.constant dense<0.000000e+00> : vector<2x128xf32>
    %116 = tpu.matmul %114, %34, %cst_41 {dimension_numbers = #tpu.dot_dimension_numbers<[1], [0], [0], [1], [0, 0, 1, 1], [], []>} : vector<2x128xf32>, vector<128x128xf32>, vector<2x128xf32> -> vector<2x128xf32>
    %117 = arith.addf %115, %116 : vector<2x128xf32>
    %118 = math.tanh %117 : vector<2x128xf32>
    %119 = arith.negf %117 : vector<2x128xf32>
    %120 = math.exp %119 : vector<2x128xf32>
    %cst_42 = arith.constant 1.000000e+00 : f32
    %121 = vector.broadcast %cst_42 : f32 to vector<2x128xf32>
    %122 = arith.addf %121, %120 : vector<2x128xf32>
    %123 = arith.divf %121, %122 : vector<2x128xf32>
    %124 = arith.select %40, %118, %123 : vector<2x128xi1>, vector<2x128xf32>
    %c64_i32_43 = arith.constant 64 : i32
    %125 = tpu.dynamic_rotate %124 by %c64_i32_43 dim 1 : vector<2x128xf32>, i32 -> vector<2x128xf32>
    %126 = arith.mulf %124, %125 : vector<2x128xf32>
    %127 = arith.mulf %124, %111 : vector<2x128xf32>
    %c32_i32_44 = arith.constant 32 : i32
    %128 = tpu.dynamic_rotate %126 by %c32_i32_44 dim 1 : vector<2x128xf32>, i32 -> vector<2x128xf32>
    %129 = arith.addf %127, %128 : vector<2x128xf32>
    %130 = math.tanh %129 : vector<2x128xf32>
    %c64_i32_45 = arith.constant 64 : i32
    %131 = tpu.dynamic_rotate %130 by %c64_i32_45 dim 1 : vector<2x128xf32>, i32 -> vector<2x128xf32>
    %132 = arith.mulf %124, %131 : vector<2x128xf32>
    %133 = vector.extract_strided_slice %33 {offsets = [10, 0], sizes = [2, 128], strides = [1, 1]} : vector<16x128xf32> to vector<2x128xf32>
    %cst_46 = arith.constant dense<0.000000e+00> : vector<2x128xf32>
    %134 = tpu.matmul %132, %34, %cst_46 {dimension_numbers = #tpu.dot_dimension_numbers<[1], [0], [0], [1], [0, 0, 1, 1], [], []>} : vector<2x128xf32>, vector<128x128xf32>, vector<2x128xf32> -> vector<2x128xf32>
    %135 = arith.addf %133, %134 : vector<2x128xf32>
    %136 = math.tanh %135 : vector<2x128xf32>
    %137 = arith.negf %135 : vector<2x128xf32>
    %138 = math.exp %137 : vector<2x128xf32>
    %cst_47 = arith.constant 1.000000e+00 : f32
    %139 = vector.broadcast %cst_47 : f32 to vector<2x128xf32>
    %140 = arith.addf %139, %138 : vector<2x128xf32>
    %141 = arith.divf %139, %140 : vector<2x128xf32>
    %142 = arith.select %40, %136, %141 : vector<2x128xi1>, vector<2x128xf32>
    %c64_i32_48 = arith.constant 64 : i32
    %143 = tpu.dynamic_rotate %142 by %c64_i32_48 dim 1 : vector<2x128xf32>, i32 -> vector<2x128xf32>
    %144 = arith.mulf %142, %143 : vector<2x128xf32>
    %145 = arith.mulf %142, %129 : vector<2x128xf32>
    %c32_i32_49 = arith.constant 32 : i32
    %146 = tpu.dynamic_rotate %144 by %c32_i32_49 dim 1 : vector<2x128xf32>, i32 -> vector<2x128xf32>
    %147 = arith.addf %145, %146 : vector<2x128xf32>
    %148 = math.tanh %147 : vector<2x128xf32>
    %c64_i32_50 = arith.constant 64 : i32
    %149 = tpu.dynamic_rotate %148 by %c64_i32_50 dim 1 : vector<2x128xf32>, i32 -> vector<2x128xf32>
    %150 = arith.mulf %142, %149 : vector<2x128xf32>
    %151 = vector.extract_strided_slice %33 {offsets = [12, 0], sizes = [2, 128], strides = [1, 1]} : vector<16x128xf32> to vector<2x128xf32>
    %cst_51 = arith.constant dense<0.000000e+00> : vector<2x128xf32>
    %152 = tpu.matmul %150, %34, %cst_51 {dimension_numbers = #tpu.dot_dimension_numbers<[1], [0], [0], [1], [0, 0, 1, 1], [], []>} : vector<2x128xf32>, vector<128x128xf32>, vector<2x128xf32> -> vector<2x128xf32>
    %153 = arith.addf %151, %152 : vector<2x128xf32>
    %154 = math.tanh %153 : vector<2x128xf32>
    %155 = arith.negf %153 : vector<2x128xf32>
    %156 = math.exp %155 : vector<2x128xf32>
    %cst_52 = arith.constant 1.000000e+00 : f32
    %157 = vector.broadcast %cst_52 : f32 to vector<2x128xf32>
    %158 = arith.addf %157, %156 : vector<2x128xf32>
    %159 = arith.divf %157, %158 : vector<2x128xf32>
    %160 = arith.select %40, %154, %159 : vector<2x128xi1>, vector<2x128xf32>
    %c64_i32_53 = arith.constant 64 : i32
    %161 = tpu.dynamic_rotate %160 by %c64_i32_53 dim 1 : vector<2x128xf32>, i32 -> vector<2x128xf32>
    %162 = arith.mulf %160, %161 : vector<2x128xf32>
    %163 = arith.mulf %160, %147 : vector<2x128xf32>
    %c32_i32_54 = arith.constant 32 : i32
    %164 = tpu.dynamic_rotate %162 by %c32_i32_54 dim 1 : vector<2x128xf32>, i32 -> vector<2x128xf32>
    %165 = arith.addf %163, %164 : vector<2x128xf32>
    %166 = math.tanh %165 : vector<2x128xf32>
    %c64_i32_55 = arith.constant 64 : i32
    %167 = tpu.dynamic_rotate %166 by %c64_i32_55 dim 1 : vector<2x128xf32>, i32 -> vector<2x128xf32>
    %168 = arith.mulf %160, %167 : vector<2x128xf32>
    %169 = vector.extract_strided_slice %33 {offsets = [14, 0], sizes = [2, 128], strides = [1, 1]} : vector<16x128xf32> to vector<2x128xf32>
    %cst_56 = arith.constant dense<0.000000e+00> : vector<2x128xf32>
    %170 = tpu.matmul %168, %34, %cst_56 {dimension_numbers = #tpu.dot_dimension_numbers<[1], [0], [0], [1], [0, 0, 1, 1], [], []>} : vector<2x128xf32>, vector<128x128xf32>, vector<2x128xf32> -> vector<2x128xf32>
    %171 = arith.addf %169, %170 : vector<2x128xf32>
    %172 = math.tanh %171 : vector<2x128xf32>
    %173 = arith.negf %171 : vector<2x128xf32>
    %174 = math.exp %173 : vector<2x128xf32>
    %cst_57 = arith.constant 1.000000e+00 : f32
    %175 = vector.broadcast %cst_57 : f32 to vector<2x128xf32>
    %176 = arith.addf %175, %174 : vector<2x128xf32>
    %177 = arith.divf %175, %176 : vector<2x128xf32>
    %178 = arith.select %40, %172, %177 : vector<2x128xi1>, vector<2x128xf32>
    %c64_i32_58 = arith.constant 64 : i32
    %179 = tpu.dynamic_rotate %178 by %c64_i32_58 dim 1 : vector<2x128xf32>, i32 -> vector<2x128xf32>
    %180 = arith.mulf %178, %179 : vector<2x128xf32>
    %181 = arith.mulf %178, %165 : vector<2x128xf32>
    %c32_i32_59 = arith.constant 32 : i32
    %182 = tpu.dynamic_rotate %180 by %c32_i32_59 dim 1 : vector<2x128xf32>, i32 -> vector<2x128xf32>
    %183 = arith.addf %181, %182 : vector<2x128xf32>
    %184 = math.tanh %183 : vector<2x128xf32>
    %c64_i32_60 = arith.constant 64 : i32
    %185 = tpu.dynamic_rotate %184 by %c64_i32_60 dim 1 : vector<2x128xf32>, i32 -> vector<2x128xf32>
    %186 = arith.mulf %178, %185 : vector<2x128xf32>
    %187 = vector.extract_strided_slice %186 {offsets = [0, 96], sizes = [2, 32], strides = [1, 1]} : vector<2x128xf32> to vector<2x32xf32>
    %c328 = arith.constant 328 : index
    %c0_61 = arith.constant 0 : index
    %188 = vector.load %arg3[%c328, %c0_61] : memref<360x128xf32, #tpu.memory_space<vmem>>, vector<32x32xf32>
    %cst_62 = arith.constant dense<0.000000e+00> : vector<2x32xf32>
    %189 = tpu.matmul %187, %188, %cst_62 {dimension_numbers = #tpu.dot_dimension_numbers<[1], [0], [0], [1], [0, 0, 1, 1], [], []>} : vector<2x32xf32>, vector<32x32xf32>, vector<2x32xf32> -> vector<2x32xf32>
    %c190 = arith.constant 190 : index
    %c0_63 = arith.constant 0 : index
    %190 = vector.load %arg3[%c190, %c0_63] : memref<360x128xf32, #tpu.memory_space<vmem>>, vector<1x32xf32>
    %191 = vector.broadcast %190 : vector<1x32xf32> to vector<2x32xf32>
    %192 = arith.addf %189, %191 : vector<2x32xf32>
    %cst_64 = arith.constant 1.000000e+00 : f32
    %193 = vector.broadcast %cst_64 : f32 to vector<2x1xf32>
    %194 = tpu.concatenate %193, %192 in 1 : vector<2x1xf32>, vector<2x32xf32> -> vector<2x33xf32>
    %195 = tpu.concatenate %193, %22 in 1 : vector<2x1xf32>, vector<2x32xf32> -> vector<2x33xf32>
    %c0_65 = arith.constant 0 : index
    %c0_66 = arith.constant 0 : index
    %196 = vector.load %arg4[%c0_65, %c0_66] : memref<33x2112xf32, #tpu.memory_space<vmem>>, vector<33x2112xf32>
    %cst_67 = arith.constant dense<0.000000e+00> : vector<2x2112xf32>
    %197 = tpu.matmul %194, %196, %cst_67 {dimension_numbers = #tpu.dot_dimension_numbers<[1], [0], [0], [1], [0, 0, 1, 1], [], []>} : vector<2x33xf32>, vector<33x2112xf32>, vector<2x2112xf32> -> vector<2x2112xf32>
    %c0_68 = arith.constant 0 : index
    %c0_69 = arith.constant 0 : index
    %198 = vector.load %arg5[%c0_68, %c0_69] : memref<33x2112xf32, #tpu.memory_space<vmem>>, vector<33x2112xf32>
    %cst_70 = arith.constant dense<0.000000e+00> : vector<2x2112xf32>
    %199 = tpu.matmul %195, %198, %cst_70 {dimension_numbers = #tpu.dot_dimension_numbers<[1], [0], [0], [1], [0, 0, 1, 1], [], []>} : vector<2x33xf32>, vector<33x2112xf32>, vector<2x2112xf32> -> vector<2x2112xf32>
    %200 = arith.mulf %199, %197 : vector<2x2112xf32>
    %c0_71 = arith.constant 0 : index
    %c0_72 = arith.constant 0 : index
    %201 = vector.load %arg6[%c0_71, %c0_72] : memref<2112x64xf32, #tpu.memory_space<vmem>>, vector<2112x64xf32>
    %cst_73 = arith.constant dense<0.000000e+00> : vector<2x64xf32>
    %202 = tpu.matmul %200, %201, %cst_73 {dimension_numbers = #tpu.dot_dimension_numbers<[1], [0], [0], [1], [0, 0, 1, 1], [], []>} : vector<2x2112xf32>, vector<2112x64xf32>, vector<2x64xf32> -> vector<2x64xf32>
    %c185 = arith.constant 185 : index
    %c0_74 = arith.constant 0 : index
    %203 = vector.load %arg3[%c185, %c0_74] : memref<360x128xf32, #tpu.memory_space<vmem>>, vector<1x64xf32>
    %204 = vector.broadcast %203 : vector<1x64xf32> to vector<2x64xf32>
    %205 = arith.addf %202, %204 : vector<2x64xf32>
    %cst_75 = arith.constant 0.000000e+00 : f32
    %206 = vector.broadcast %cst_75 : f32 to vector<2x64xf32>
    %207 = arith.maximumf %205, %206 : vector<2x64xf32>
    %c192 = arith.constant 192 : index
    %c0_76 = arith.constant 0 : index
    %208 = vector.load %arg3[%c192, %c0_76] : memref<360x128xf32, #tpu.memory_space<vmem>>, vector<64x128xf32>
    %cst_77 = arith.constant dense<0.000000e+00> : vector<2x128xf32>
    %209 = tpu.matmul %207, %208, %cst_77 {dimension_numbers = #tpu.dot_dimension_numbers<[1], [0], [0], [1], [0, 0, 1, 1], [], []>} : vector<2x64xf32>, vector<64x128xf32>, vector<2x128xf32> -> vector<2x128xf32>
    %c186 = arith.constant 186 : index
    %c0_78 = arith.constant 0 : index
    %210 = vector.load %arg3[%c186, %c0_78] : memref<360x128xf32, #tpu.memory_space<vmem>>, vector<1x128xf32>
    %211 = vector.broadcast %210 : vector<1x128xf32> to vector<2x128xf32>
    %212 = arith.addf %209, %211 : vector<2x128xf32>
    %c0_79 = arith.constant 0 : index
    %c0_80 = arith.constant 0 : index
    %213 = vector.load %arg7[%c0_79, %c0_80] : memref<2x128xf32, #tpu.memory_space<vmem>>, vector<2x128xf32>
    tpu.vector_store %arg7[%c0_79, %c0_80], %212 {strides = array<i32>} : memref<2x128xf32, #tpu.memory_space<vmem>>, vector<2x128xf32>,
    return
  }
}

</mosaic_0001>

<bundles_post_ra>
// kernel: tpu_custom_call.1
= control target key start
LH: loop header
LB: loop body
LE: loop exit
PB: predicated region body
PF: predicated region fallthrough
CT: control target
= control target key end

     0   :  { %s5657_s28 = smov 3   ;;  %v5658_v2 = vmov 0.0   ;;  %vm5659_vm0 = vmmov 0   ;;  %s7616_s0 = inlined_call_operand.vmem [shape: s32[16,1], index: 0, kind: input, shape index: {}]   ;;  %s7617_s1 = inlined_call_operand.vmem [shape: s32[2,3], index: 1, kind: input, shape index: {}]   ;;  %s7618_s2 = inlined_call_operand.vmem [shape: f32[2,5], index: 2, kind: input, shape index: {}]   ;;  %s7619_s3 = inlined_call_operand.vmem [shape: f32[360,128], index: 3, kind: input, shape index: {}]   ;;  %s7620_s4 = inlined_call_operand.vmem [shape: f32[33,2112], index: 4, kind: input, shape index: {}]   ;;  %s7621_s5 = inlined_call_operand.vmem [shape: f32[33,2112], index: 5, kind: input, shape index: {}]   ;;  %s7622_s6 = inlined_call_operand.vmem [shape: f32[2112,64], index: 6, kind: input, shape index: {}]   ;;  %s7623_s7 = inlined_call_operand.hbm [shape: f32[2,128], index: 7, kind: output, shape index: {}]  }
   0x1   :  { %v29_v0 = vld [vmem:[%s7618_s2] sm:$0x3]  ;;  %4517 = vmatprep.subr.mxu0 %v5658_v2  ;;  %v117_v3 = vld [vmem:[%s7619_s3 + $0x108] sm:$0xff]  ;;  %4519 = vmatprep.mubr.msk.f32.mxu0 %vm5659_vm0, %v5658_v2  ;;  %v118_v4 = vld [vmem:[%s7619_s3 + $0x110] sm:$0xff] }
   0x2   :  { %v36_v1 = vld [vmem:[%s7619_s3 + $0x100] sm:$0xff]  ;;  %31 = vrot.lane.b32.xlu0 %v29_v0, %s5657_s28 }
   0x3   :  { %4518 = vmatpush3.msra.mxu0 %v36_v1 }
   0x4   :  { %12 = vsyncpa [#allocation3], 0  ;;  %v5660_v5 = vmov 0.0|0.0   ;;  %v4917_v6 = vpack.c.bf16 %v118_v4, %v117_v3  ;;  %4530 = vmatprep.mubr.msk.f32.mxu1 %vm5659_vm0, %v5658_v2  ;;  %v27_v7 = vld [vmem:[%s7617_s1] sm:$0x3]  ;;  %vm34_vm1 = vcmask 23552   ;;  %v285_v37 = vlaneseq }
   0x5   :  { %4916 = vmatprep.subr.bf16.mxu1 %v5660_v5  ;;  %4922 = vmatprep.subr.bf16.mxu0 %v5660_v5  ;;  %v28_v8 = vcvt.s32.f32 %v27_v7  ;;  %vm42_vm2 = vcmask 64512   ;;  %v119_v11 = vld [vmem:[%s7619_s3 + $0x118] sm:$0xff]  ;;  %v120_v12 = vld [vmem:[%s7619_s3 + $0x120] sm:$0xff]  ;;  %v284_v15 = vld [vmem:[%s7616_s0 + $0x8] sm:$0xff]  ;;  %v5661_v17 = vmov 0   ;;  %vm126_vm3 = vcmask 261120  }
   0x6   :  { %4918 = vmatpush3.bf16.msra.mxu1 %v4917_v6  ;;  %v4920_v13 = vpack.c.bf16 %v120_v12, %v119_v11  ;;  %v283_v14 = vld [vmem:[%s7616_s0] sm:$0xff]  ;;  %v201_v16 = vld [vmem:[%s7619_s3 + $0x128] sm:$0xff]  ;;  %5567 = vset.pattern.permute.xlu0 %v5661_v17  ;;  %v202_v18 = vld [vmem:[%s7619_s3 + $0x130] sm:$0xff]  ;;  %v5779_v40 = vand.u32 127, %v285_v37  ;;  %vm311_vm6 = vcmask 457728   ;;  %s5662_s25 = smov 64  }
   0x7   :  { %4919 = vmatprep.subr.bf16.mxu1 %v5660_v5  ;;  %5568 = vset.pattern.permute.xlu1 %v5661_v17  ;;  %v4923_v19 = vpack.c.bf16 %v202_v18, %v201_v16  ;;  %v3968_v20 = vld [vmem:[%s7619_s3 + $0xbb] ss:$0 sm:$0xff]  ;;  %v204_v26 = vld [vmem:[%s7619_s3 + $0x140] sm:$0xff]  ;;  %v300_v29 = vld [vmem:[%s7619_s3 + $0x8] sm:$0xff]  ;;  %s5663_s26 = smov 32   ;;  %s5664_s13 = smov 1  }
   0x8   :  { %288 = vperm.xlu0 %5567, %v283_v14   ;;  %291 = vperm.xlu1 %5568, %v284_v15   ;;  %v203_v25 = vld [vmem:[%s7619_s3 + $0x138] sm:$0xff]  ;;  %v299_v28 = vld [vmem:[%s7619_s3] sm:$0xff]  ;;  %v301_v31 = vld [vmem:[%s7619_s3 + $0x10] sm:$0xff]  ;;  %vm409_vm7 = vcmp.ge.s32.totalorder %v5779_v40, 64  ;;  %vm410_vm8 = vcmp.lt.s32.totalorder %v5779_v40, 96  ;;  %vm1479_vm10 = vcmask 1040384  }
   0x9   :  { %v4926_v27 = vpack.c.bf16 %v204_v26, %v203_v25  ;;  %v4928_v30 = vpack.c.bf16 %v300_v29, %v299_v28  ;;  %v302_v32 = vld [vmem:[%s7619_s3 + $0x18] sm:$0xff]  ;;  %v303_v34 = vld [vmem:[%s7619_s3 + $0x20] sm:$0xff]  ;;  %v304_v35 = vld [vmem:[%s7619_s3 + $0x28] sm:$0xff]  ;;  %vm1475_vm11 = vcmask 269312   ;;  %vm1383_vm12 = vcmask 7168  }
   0xa   :  { %4921 = vmatpush3.bf16.msra.mxu1 %v4920_v13  ;;  %v4932_v33 = vpack.c.bf16 %v302_v32, %v301_v31  ;;  %v4936_v36 = vpack.c.bf16 %v304_v35, %v303_v34  ;;  %v393_v41 = vld [vmem:[%s7619_s3 + $0x38] sm:$0xff]  ;;  %v394_v42 = vld [vmem:[%s7619_s3 + $0x40] sm:$0xff]  ;;  %v305_v43 = vld [vmem:[%s7619_s3 + $0x30] sm:$0xff]  ;;  %vm3232_vm13 = vcmask 523264  }
   0xb   :  { %4929 = vmatprep.subr.bf16.mxu1 %v4928_v30  ;;  %v5794_v46 = vpack.c.bf16 %v394_v42, %v393_v41  ;;  %v395_v47 = vld [vmem:[%s7619_s3 + $0x48] sm:$0xff]  ;;  %v396_v48 = vld [vmem:[%s7619_s3 + $0x50] sm:$0xff]  ;;  %v397_v50 = vld [vmem:[%s7619_s3 + $0x58] sm:$0xff] }
   0xc   :  { %v5807_v49 = vpack.c.bf16 %v396_v48, %v395_v47  ;;  %v398_v51 = vld [vmem:[%s7619_s3 + $0x60] sm:$0xff]  ;;  %v399_v53 = vld [vmem:[%s7619_s3 + $0x68] sm:$0xff]  ;;  %v400_v54 = vld [vmem:[%s7619_s3 + $0x70] sm:$0xff] }
   0xd   :  { %v5817_v52 = vpack.c.bf16 %v398_v51, %v397_v50  ;;  %v5827_v55 = vpack.c.bf16 %v400_v54, %v399_v53  ;;  %v401_v56 = vld [vmem:[%s7619_s3 + $0x78] sm:$0xff]  ;;  %v402_v57 = vld [vmem:[%s7619_s3 + $0x80] sm:$0xff]  ;;  %v403_v59 = vld [vmem:[%s7619_s3 + $0x88] sm:$0xff] }
   0xe   :  { %v5837_v58 = vpack.c.bf16 %v402_v57, %v401_v56  ;;  %v404_v60 = vld [vmem:[%s7619_s3 + $0x90] sm:$0xff]  ;;  %v405_v62 = vld [vmem:[%s7619_s3 + $0x98] sm:$0xff]  ;;  %v406_v63 = vld [vmem:[%s7619_s3 + $0xa0] sm:$0xff] }
   0xf   :  { %v5847_v61 = vpack.c.bf16 %v404_v60, %v403_v59  ;;  %v5857_v0 = vpack.c.bf16 %v406_v63, %v405_v62  ;;  %v407_v1 = vld [vmem:[%s7619_s3 + $0xa8] sm:$0xff]  ;;  %v408_v3 = vld [vmem:[%s7619_s3 + $0xb0] sm:$0xff]  ;;  %v3970_v6 = vld [vmem:[%s7619_s3 + $0xbc] ss:$0 sm:$0xff] }
  0x10   :  { %v5867_v4 = vpack.c.bf16 %v408_v3, %v407_v1  ;;  %v3976_v11 = vld [vmem:[%s7619_s3 + $0xb8] ss:$0 sm:$0xff]  ;;  %vm5924_vm9 = vmand %vm409_vm7, %vm410_vm8 }
  0x74   :  { %v32_v9 = vpop.permute.xlu0 %31 }
  0x75   :  { %v35_v10 = vsel %vm34_vm1, %v28_v8, %v32_v9 }
  0x76   :  { %4520 = vmatmul.mubr.msk.f32.vlgmr.msra.gmra.mrb[0].mxu0 %vm42_vm2, %v35_v10 }
  0x77   :  { %4541 = vmatprep.mubr.msk.f32.mxu0 %vm5659_vm0, %v5658_v2  ;;  %4924 = vmatpush3.bf16.msra.mxu0 %v4923_v19 }
  0x78   :  { %4925 = vmatprep.subr.bf16.mxu0 %v5660_v5 }
  0x7b   :  { %4927 = vmatpush3.bf16.msra.mxu0 %v4926_v27 }
  0x7c   :  { %4940 = vmatprep.subr.bf16.mxu0 %v5660_v5 }
  0x87   :  { %v289_v38 = vpop.permute.xlu0 %288  ;;  %v292_v39 = vpop.permute.xlu1 %291 }
  0x88   :  { %vm293_vm4 = vcmp.eq.s32.totalorder %v5779_v40, %v289_v38  ;;  %vm294_vm5 = vcmp.eq.s32.totalorder %v5779_v40, %v292_v39 }
  0x89   :  { %v3974_v44 = vsel %vm293_vm4, 1.0, %v5658_v2  ;;  %v3975_v45 = vsel %vm294_vm5, 1.0, %v5658_v2 }
 0x149   :  { %v112_v21 = vpop.f32.mrb[0].mxu0 }
 0x14a   :  { %v113_v22 = vadd.f32 %v3968_v20, %v112_v21  ;;  %v4521_v23 = vpop.f32.mrb[1].mxu0 }
 0x14c   :  { %v116_v24 = vmax.f32 %v113_v22, 0.0 }
 0x14e   :  { %4531 = vmatmul.mubr.msk.f32.vlgmr.msra.gmra.mrb[0].mxu1 %vm126_vm3, %v116_v24  ;;  %v1294_v24 = vld [vmem:[%s7619_s3 + $0x148] sm:$0xff] }
 0x14f   :  { %4931 = vmatpush3.bf16.msra.mxu1 %v4928_v30  ;;  %4558 = vmatprep.mubr.msk.f32.mxu1 %vm311_vm6, %v3974_v44 }
 0x150   :  { %4933 = vmatprep.subr.bf16.mxu1 %v4932_v33 }
 0x153   :  { %4935 = vmatpush3.bf16.msra.mxu1 %v4932_v33 }
 0x154   :  { %4937 = vmatprep.subr.bf16.mxu1 %v4936_v36 }
 0x157   :  { %4939 = vmatpush3.bf16.msra.mxu1 %v4936_v36 }
 0x158   :  { %4556 = vmatprep.subr.mxu1 %v305_v43 }
 0x15b   :  { %4557 = vmatpush3.msra.mxu1 %v305_v43 }
 0x15c   :  { %4559 = vmatmul.mubr.msk.f32.vlgmr.msra.gmra.mrb[2].mxu1 %vm311_vm6, %v3975_v45  ;;  %4964 = vmatprep.subr.bf16.mxu1 %v5660_v5 }
 0x15d   :  { %4966 = vmatpush3.bf16.msra.mxu1 %v5794_v46  ;;  %4628 = vmatprep.mubr.msk.f32.mxu1 %vm5659_vm0, %v5658_v2 }
 0x15e   :  { %4967 = vmatprep.subr.bf16.mxu1 %v5660_v5 }
 0x161   :  { %4969 = vmatpush3.bf16.msra.mxu1 %v5807_v49 }
 0x162   :  { %4970 = vmatprep.subr.bf16.mxu1 %v5660_v5 }
 0x165   :  { %4972 = vmatpush3.bf16.msra.mxu1 %v5817_v52 }
 0x166   :  { %4973 = vmatprep.subr.bf16.mxu1 %v5660_v5 }
 0x169   :  { %4975 = vmatpush3.bf16.msra.mxu1 %v5827_v55 }
 0x16a   :  { %4976 = vmatprep.subr.bf16.mxu1 %v5660_v5 }
 0x16d   :  { %4978 = vmatpush3.bf16.msra.mxu1 %v5837_v58 }
 0x16e   :  { %4979 = vmatprep.subr.bf16.mxu1 %v5660_v5 }
 0x171   :  { %4981 = vmatpush3.bf16.msra.mxu1 %v5847_v61 }
 0x172   :  { %4982 = vmatprep.subr.bf16.mxu1 %v5660_v5 }
 0x175   :  { %4984 = vmatpush3.bf16.msra.mxu1 %v5857_v0 }
 0x176   :  { %4985 = vmatprep.subr.bf16.mxu1 %v5660_v5 }
 0x179   :  { %4987 = vmatpush3.bf16.msra.mxu1 %v5867_v4 }
 0x17a   :  { %5012 = vmatprep.subr.bf16.mxu1 %v5660_v5 }
 0x221   :  { %v196_v7 = vpop.f32.mrb[0].mxu1 }
 0x222   :  { %v197_v8 = vadd.f32 %v3970_v6, %v196_v7  ;;  %v4532_v9 = vpop.f32.mrb[1].mxu1 }
 0x224   :  { %v200_v10 = vmax.f32 %v197_v8, 0.0 }
 0x226   :  { %4542 = vmatmul.mubr.msk.f32.vlgmr.msra.gmra.mrb[2].mxu0 %vm126_vm3, %v200_v10 }
 0x227   :  { %4942 = vmatpush3.bf16.msra.mxu0 %v5794_v46  ;;  %4593 = vmatprep.mubr.msk.f32.mxu0 %vm5659_vm0, %v5658_v2 }
 0x228   :  { %4943 = vmatprep.subr.bf16.mxu0 %v5660_v5 }
 0x22b   :  { %4945 = vmatpush3.bf16.msra.mxu0 %v5807_v49 }
 0x22c   :  { %4946 = vmatprep.subr.bf16.mxu0 %v5660_v5 }
 0x22f   :  { %4948 = vmatpush3.bf16.msra.mxu0 %v5817_v52  ;;  %v4560_v12 = vpop.f32.mrb[2].mxu1 }
 0x230   :  { %4949 = vmatprep.subr.bf16.mxu0 %v5660_v5  ;;  %v5915_v13 = vadd.f32 %v4560_v12, %v3976_v11  ;;  %v384_v14 = vpop.f32.mrb[3].mxu1 }
 0x231   :  { %v5919_v17 = vadd.f32 %v3976_v11, %v384_v14 }
 0x233   :  { %4951 = vmatpush3.bf16.msra.mxu0 %v5827_v55 }
 0x234   :  { %4952 = vmatprep.subr.bf16.mxu0 %v5660_v5 }
 0x237   :  { %4954 = vmatpush3.bf16.msra.mxu0 %v5837_v58 }
 0x238   :  { %4955 = vmatprep.subr.bf16.mxu0 %v5660_v5 }
 0x23b   :  { %4957 = vmatpush3.bf16.msra.mxu0 %v5847_v61 }
 0x23c   :  { %4958 = vmatprep.subr.bf16.mxu0 %v5660_v5 }
 0x23f   :  { %4960 = vmatpush3.bf16.msra.mxu0 %v5857_v0 }
 0x240   :  { %4961 = vmatprep.subr.bf16.mxu0 %v5660_v5 }
 0x243   :  { %4963 = vmatpush3.bf16.msra.mxu0 %v5867_v4 }
 0x244   :  { %4988 = vmatprep.subr.bf16.mxu0 %v5660_v5 }
 0x246   :  { %4594 = vmatmul.mubr.f32.vlgmr.msra.gmra.mrb[4].mxu0 %v5658_v2 }
 0x247   :  { %4990 = vmatpush3.bf16.msra.mxu0 %v5794_v46  ;;  %4663 = vmatprep.mubr.msk.f32.mxu0 %vm5659_vm0, %v5658_v2 }
 0x248   :  { %4991 = vmatprep.subr.bf16.mxu0 %v5660_v5 }
 0x24b   :  { %4993 = vmatpush3.bf16.msra.mxu0 %v5807_v49 }
 0x24c   :  { %4994 = vmatprep.subr.bf16.mxu0 %v5660_v5 }
 0x24f   :  { %4996 = vmatpush3.bf16.msra.mxu0 %v5817_v52 }
 0x250   :  { %4997 = vmatprep.subr.bf16.mxu0 %v5660_v5 }
 0x253   :  { %4999 = vmatpush3.bf16.msra.mxu0 %v5827_v55 }
 0x254   :  { %5000 = vmatprep.subr.bf16.mxu0 %v5660_v5 }
 0x257   :  { %5002 = vmatpush3.bf16.msra.mxu0 %v5837_v58 }
 0x258   :  { %5003 = vmatprep.subr.bf16.mxu0 %v5660_v5 }
 0x25b   :  { %5005 = vmatpush3.bf16.msra.mxu0 %v5847_v61 }
 0x25c   :  { %5006 = vmatprep.subr.bf16.mxu0 %v5660_v5 }
 0x25f   :  { %5008 = vmatpush3.bf16.msra.mxu0 %v5857_v0 }
 0x260   :  { %5009 = vmatprep.subr.bf16.mxu0 %v5660_v5 }
 0x263   :  { %5011 = vmatpush3.bf16.msra.mxu0 %v5867_v4 }
 0x264   :  { %5036 = vmatprep.subr.bf16.mxu0 %v5660_v5 }
 0x2f9   :  { %v5917_v15 = vpop.f32.mrb[2].mxu0 }
 0x2fa   :  { %v4543_v16 = vpop.f32.mrb[3].mxu0 }
 0x319   :  { %v478_v18 = vpop.f32.mrb[4].mxu0 }
 0x31a   :  { %v482_v19 = vadd.f32 %v478_v18, %v5919_v17  ;;  %v4595_v20 = vpop.f32.mrb[5].mxu0 }
 0x31c   :  { %v3979_v21 = vmul.f32 -1.442695, %v482_v19 }
 0x31e   :  { %5569 = vpow2.f32 %v3979_v21 }
 0x31f   :  { %5571 = vtanh.f32 %v482_v19 }
 0x328   :  { %v5570_v22 = vpop.eup %5569 }
 0x329   :  { %v487_v23 = vadd.f32 1.0, %v5570_v22  ;;  %v5572_v25 = vpop.eup %5571 }
 0x32b   :  { %5573 = vrcp.f32 %v487_v23 }
 0x335   :  { %v5574_v26 = vpop.eup %5573 }
 0x336   :  { %v490_v27 = vsel %vm5924_vm9, %v5572_v25, %v5574_v26 }
 0x337   :  { %491 = vrot.lane.b32.xlu1 %v490_v27, %s5662_s25  ;;  %v494_v30 = vmul.f32 0.0, %v490_v27 }
 0x3a9   :  { %v492_v28 = vpop.permute.xlu1 %491 }
 0x3aa   :  { %v493_v29 = vmul.f32 %v492_v28, %v490_v27 }
 0x3ac   :  { %495 = vrot.lane.b32.xlu1 %v493_v29, %s5663_s26 }
 0x41e   :  { %v496_v31 = vpop.permute.xlu1 %495 }
 0x41f   :  { %v497_v32 = vadd.f32 %v496_v31, %v494_v30 }
 0x421   :  { %5575 = vtanh.f32 %v497_v32  ;;  %v594_v54 = vrot.slane %v497_v32, 6 }
 0x42b   :  { %v5576_v33 = vpop.eup %5575 }
 0x42c   :  { %499 = vrot.lane.b32.xlu0 %v5576_v33, %s5662_s25 }
 0x49e   :  { %v500_v34 = vpop.permute.xlu0 %499 }
 0x49f   :  { %v501_v35 = vmul.f32 %v500_v34, %v490_v27 }
 0x4a1   :  { %4629 = vmatmul.mubr.f32.vlgmr.msra.gmra.mrb[4].mxu1 %v501_v35 }
 0x4a2   :  { %5014 = vmatpush3.bf16.msra.mxu1 %v5794_v46  ;;  %4698 = vmatprep.mubr.msk.f32.mxu1 %vm5659_vm0, %v5658_v2 }
 0x4a3   :  { %5015 = vmatprep.subr.bf16.mxu1 %v5660_v5 }
 0x4a6   :  { %5017 = vmatpush3.bf16.msra.mxu1 %v5807_v49 }
 0x4a7   :  { %5018 = vmatprep.subr.bf16.mxu1 %v5660_v5 }
 0x4aa   :  { %5020 = vmatpush3.bf16.msra.mxu1 %v5817_v52 }
 0x4ab   :  { %5021 = vmatprep.subr.bf16.mxu1 %v5660_v5 }
 0x4ae   :  { %5023 = vmatpush3.bf16.msra.mxu1 %v5827_v55 }
 0x4af   :  { %5024 = vmatprep.subr.bf16.mxu1 %v5660_v5 }
 0x4b2   :  { %5026 = vmatpush3.bf16.msra.mxu1 %v5837_v58 }
 0x4b3   :  { %5027 = vmatprep.subr.bf16.mxu1 %v5660_v5 }
 0x4b6   :  { %5029 = vmatpush3.bf16.msra.mxu1 %v5847_v61 }
 0x4b7   :  { %5030 = vmatprep.subr.bf16.mxu1 %v5660_v5 }
 0x4ba   :  { %5032 = vmatpush3.bf16.msra.mxu1 %v5857_v0 }
 0x4bb   :  { %5033 = vmatprep.subr.bf16.mxu1 %v5660_v5 }
 0x4be   :  { %5035 = vmatpush3.bf16.msra.mxu1 %v5867_v4 }
 0x4bf   :  { %5060 = vmatprep.subr.bf16.mxu1 %v5660_v5 }
 0x574   :  { %v568_v36 = vpop.f32.mrb[4].mxu1 }
 0x575   :  { %v573_v37 = vrot.slane %v568_v36, 6  ;;  %v4630_v38 = vpop.f32.mrb[5].mxu1 }
 0x577   :  { %v575_v39 = vadd.f32 %v573_v37, %v5919_v17 }
 0x579   :  { %v3980_v40 = vmul.f32 -1.442695, %v575_v39 }
 0x57b   :  { %5577 = vpow2.f32 %v3980_v40 }
 0x57c   :  { %5579 = vtanh.f32 %v575_v39 }
 0x585   :  { %v5578_v41 = vpop.eup %5577 }
 0x586   :  { %v580_v42 = vadd.f32 1.0, %v5578_v41  ;;  %v5580_v43 = vpop.eup %5579 }
 0x588   :  { %5581 = vrcp.f32 %v580_v42 }
 0x592   :  { %v5582_v44 = vpop.eup %5581 }
 0x593   :  { %v583_v45 = vsel %vm5924_vm9, %v5580_v43, %v5582_v44 }
 0x594   :  { %v585_v47 = vrot.slane %v583_v45, 2  ;;  %v596_v57 = vmul.f32 %v594_v54, %v583_v45 }
 0x596   :  { %587 = vrot.lane.b32.xlu1 %v585_v47, %s5662_s25 }
 0x608   :  { %v588_v48 = vpop.permute.xlu1 %587 }
 0x609   :  { %v590_v50 = vrot.slane %v588_v48, 6 }
 0x60b   :  { %v592_v51 = vmul.f32 %v590_v50, %v583_v45 }
 0x60d   :  { %v598_v53 = vrot.slane %v592_v51, 2 }
 0x60f   :  { %600 = vrot.lane.b32.xlu0 %v598_v53, %s5663_s26 }
 0x681   :  { %v601_v56 = vpop.permute.xlu0 %600 }
 0x682   :  { %v603_v59 = vrot.slane %v601_v56, 6 }
 0x684   :  { %v605_v60 = vadd.f32 %v603_v59, %v596_v57 }
 0x686   :  { %5583 = vtanh.f32 %v605_v60  ;;  %v711_v27 = vrot.slane %v605_v60, 6 }
 0x690   :  { %v5584_v62 = vpop.eup %5583 }
 0x691   :  { %v608_v63 = vrot.slane %v5584_v62, 2 }
 0x693   :  { %610 = vrot.lane.b32.xlu1 %v608_v63, %s5662_s25 }
 0x705   :  { %v611_v1 = vpop.permute.xlu1 %610 }
 0x706   :  { %v613_v3 = vrot.slane %v611_v1, 6 }
 0x708   :  { %v615_v6 = vmul.f32 %v613_v3, %v583_v45 }
 0x70a   :  { %v617_v7 = vrot.slane %v615_v6, 2 }
 0x70c   :  { %4664 = vmatmul.mubr.f32.vlgmr.msra.gmra.mrb[6].mxu0 %v617_v7 }
 0x70d   :  { %5038 = vmatpush3.bf16.msra.mxu0 %v5794_v46  ;;  %4733 = vmatprep.mubr.msk.f32.mxu0 %vm5659_vm0, %v5658_v2 }
 0x70e   :  { %5039 = vmatprep.subr.bf16.mxu0 %v5660_v5 }
 0x711   :  { %5041 = vmatpush3.bf16.msra.mxu0 %v5807_v49 }
 0x712   :  { %5042 = vmatprep.subr.bf16.mxu0 %v5660_v5 }
 0x715   :  { %5044 = vmatpush3.bf16.msra.mxu0 %v5817_v52 }
 0x716   :  { %5045 = vmatprep.subr.bf16.mxu0 %v5660_v5 }
 0x719   :  { %5047 = vmatpush3.bf16.msra.mxu0 %v5827_v55 }
 0x71a   :  { %5048 = vmatprep.subr.bf16.mxu0 %v5660_v5 }
 0x71d   :  { %5050 = vmatpush3.bf16.msra.mxu0 %v5837_v58 }
 0x71e   :  { %5051 = vmatprep.subr.bf16.mxu0 %v5660_v5 }
 0x721   :  { %5053 = vmatpush3.bf16.msra.mxu0 %v5847_v61 }
 0x722   :  { %5054 = vmatprep.subr.bf16.mxu0 %v5660_v5 }
 0x725   :  { %5056 = vmatpush3.bf16.msra.mxu0 %v5857_v0 }
 0x726   :  { %5057 = vmatprep.subr.bf16.mxu0 %v5660_v5 }
 0x729   :  { %5059 = vmatpush3.bf16.msra.mxu0 %v5867_v4 }
 0x72a   :  { %5084 = vmatprep.subr.bf16.mxu0 %v5660_v5 }
 0x7df   :  { %v685_v8 = vpop.f32.mrb[6].mxu0 }
 0x7e0   :  { %v690_v9 = vrot.slane %v685_v8, 4  ;;  %v4665_v10 = vpop.f32.mrb[7].mxu0 }
 0x7e2   :  { %v692_v11 = vadd.f32 %v690_v9, %v5919_v17 }
 0x7e4   :  { %v3981_v12 = vmul.f32 -1.442695, %v692_v11 }
 0x7e6   :  { %5585 = vpow2.f32 %v3981_v12 }
 0x7e7   :  { %5587 = vtanh.f32 %v692_v11 }
 0x7f0   :  { %v5586_v14 = vpop.eup %5585 }
 0x7f1   :  { %v697_v16 = vadd.f32 1.0, %v5586_v14  ;;  %v5588_v18 = vpop.eup %5587 }
 0x7f3   :  { %5589 = vrcp.f32 %v697_v16 }
 0x7fd   :  { %v5590_v19 = vpop.eup %5589 }
 0x7fe   :  { %v700_v20 = vsel %vm5924_vm9, %v5588_v18, %v5590_v19 }
 0x7ff   :  { %v702_v21 = vrot.slane %v700_v20, 4  ;;  %v713_v29 = vmul.f32 %v711_v27, %v700_v20 }
 0x801   :  { %704 = vrot.lane.b32.xlu0 %v702_v21, %s5662_s25 }
 0x873   :  { %v705_v22 = vpop.permute.xlu0 %704 }
 0x874   :  { %v707_v23 = vrot.slane %v705_v22, 4 }
 0x876   :  { %v709_v25 = vmul.f32 %v707_v23, %v700_v20 }
 0x878   :  { %v715_v26 = vrot.slane %v709_v25, 4 }
 0x87a   :  { %717 = vrot.lane.b32.xlu1 %v715_v26, %s5663_s26 }
 0x8ec   :  { %v718_v28 = vpop.permute.xlu1 %717 }
 0x8ed   :  { %v720_v30 = vrot.slane %v718_v28, 4 }
 0x8ef   :  { %v722_v31 = vadd.f32 %v720_v30, %v713_v29 }
 0x8f1   :  { %5591 = vtanh.f32 %v722_v31 }
 0x8fb   :  { %v5592_v32 = vpop.eup %5591 }
 0x8fc   :  { %v725_v33 = vrot.slane %v5592_v32, 4 }
 0x8fe   :  { %727 = vrot.lane.b32.xlu0 %v725_v33, %s5662_s25 }
 0x970   :  { %v728_v34 = vpop.permute.xlu0 %727 }
 0x971   :  { %v730_v35 = vrot.slane %v728_v34, 4 }
 0x973   :  { %v732_v36 = vmul.f32 %v730_v35, %v700_v20 }
 0x975   :  { %v734_v37 = vrot.slane %v732_v36, 4 }
 0x977   :  { %4699 = vmatmul.mubr.f32.vlgmr.msra.gmra.mrb[6].mxu1 %v734_v37 }
 0x978   :  { %5062 = vmatpush3.bf16.msra.mxu1 %v5794_v46  ;;  %4768 = vmatprep.mubr.msk.f32.mxu1 %vm5659_vm0, %v5658_v2 }
 0x979   :  { %5063 = vmatprep.subr.bf16.mxu1 %v5660_v5 }
 0x97c   :  { %5065 = vmatpush3.bf16.msra.mxu1 %v5807_v49 }
 0x97d   :  { %5066 = vmatprep.subr.bf16.mxu1 %v5660_v5 }
 0x980   :  { %5068 = vmatpush3.bf16.msra.mxu1 %v5817_v52 }
 0x981   :  { %5069 = vmatprep.subr.bf16.mxu1 %v5660_v5 }
 0x984   :  { %5071 = vmatpush3.bf16.msra.mxu1 %v5827_v55 }
 0x985   :  { %5072 = vmatprep.subr.bf16.mxu1 %v5660_v5 }
 0x988   :  { %5074 = vmatpush3.bf16.msra.mxu1 %v5837_v58 }
 0x989   :  { %5075 = vmatprep.subr.bf16.mxu1 %v5660_v5 }
 0x98c   :  { %5077 = vmatpush3.bf16.msra.mxu1 %v5847_v61 }
 0x98d   :  { %5078 = vmatprep.subr.bf16.mxu1 %v5660_v5 }
 0x990   :  { %5080 = vmatpush3.bf16.msra.mxu1 %v5857_v0 }
 0x991   :  { %5081 = vmatprep.subr.bf16.mxu1 %v5660_v5 }
 0x994   :  { %5083 = vmatpush3.bf16.msra.mxu1 %v5867_v4 }
 0x995   :  { %5108 = vmatprep.subr.bf16.mxu1 %v5660_v5 }
 0xa4a   :  { %v802_v38 = vpop.f32.mrb[6].mxu1 }
 0xa4b   :  { %v807_v39 = vrot.slane %v802_v38, 2  ;;  %v4700_v40 = vpop.f32.mrb[7].mxu1 }
 0xa4d   :  { %v809_v41 = vadd.f32 %v807_v39, %v5919_v17  ;;  %v828_v17 = vrot.slane %v722_v31, 6 }
 0xa4f   :  { %v3982_v42 = vmul.f32 -1.442695, %v809_v41 }
 0xa51   :  { %5593 = vpow2.f32 %v3982_v42 }
 0xa52   :  { %5595 = vtanh.f32 %v809_v41 }
 0xa5b   :  { %v5594_v43 = vpop.eup %5593 }
 0xa5c   :  { %v814_v44 = vadd.f32 1.0, %v5594_v43  ;;  %v5596_v45 = vpop.eup %5595 }
 0xa5e   :  { %5597 = vrcp.f32 %v814_v44 }
 0xa68   :  { %v5598_v47 = vpop.eup %5597 }
 0xa69   :  { %v817_v48 = vsel %vm5924_vm9, %v5596_v45, %v5598_v47 }
 0xa6a   :  { %v819_v50 = vrot.slane %v817_v48, 6  ;;  %v830_v59 = vmul.f32 %v828_v17, %v817_v48 }
 0xa6c   :  { %821 = vrot.lane.b32.xlu1 %v819_v50, %s5662_s25 }
 0xade   :  { %v822_v51 = vpop.permute.xlu1 %821 }
 0xadf   :  { %v824_v53 = vrot.slane %v822_v51, 2 }
 0xae1   :  { %v826_v54 = vmul.f32 %v824_v53, %v817_v48 }
 0xae3   :  { %v832_v56 = vrot.slane %v826_v54, 6 }
 0xae5   :  { %834 = vrot.lane.b32.xlu0 %v832_v56, %s5663_s26 }
 0xb57   :  { %v835_v57 = vpop.permute.xlu0 %834 }
 0xb58   :  { %v837_v60 = vrot.slane %v835_v57, 2 }
 0xb5a   :  { %v839_v62 = vadd.f32 %v837_v60, %v830_v59 }
 0xb5c   :  { %5599 = vtanh.f32 %v839_v62  ;;  %v936_v23 = vrot.slane %v839_v62, 6 }
 0xb66   :  { %v5600_v63 = vpop.eup %5599 }
 0xb67   :  { %v842_v1 = vrot.slane %v5600_v63, 6 }
 0xb69   :  { %844 = vrot.lane.b32.xlu1 %v842_v1, %s5662_s25 }
 0xbdb   :  { %v845_v3 = vpop.permute.xlu1 %844 }
 0xbdc   :  { %v847_v6 = vrot.slane %v845_v3, 2 }
 0xbde   :  { %v849_v7 = vmul.f32 %v847_v6, %v817_v48 }
 0xbe0   :  { %v851_v8 = vrot.slane %v849_v7, 6 }
 0xbe2   :  { %4734 = vmatmul.mubr.f32.vlgmr.msra.gmra.mrb[8].mxu0 %v851_v8 }
 0xbe3   :  { %5086 = vmatpush3.bf16.msra.mxu0 %v5794_v46  ;;  %4803 = vmatprep.mubr.msk.f32.mxu0 %vm5659_vm0, %v5658_v2 }
 0xbe4   :  { %5087 = vmatprep.subr.bf16.mxu0 %v5660_v5 }
 0xbe7   :  { %5089 = vmatpush3.bf16.msra.mxu0 %v5807_v49 }
 0xbe8   :  { %5090 = vmatprep.subr.bf16.mxu0 %v5660_v5 }
 0xbeb   :  { %5092 = vmatpush3.bf16.msra.mxu0 %v5817_v52 }
 0xbec   :  { %5093 = vmatprep.subr.bf16.mxu0 %v5660_v5 }
 0xbef   :  { %5095 = vmatpush3.bf16.msra.mxu0 %v5827_v55 }
 0xbf0   :  { %5096 = vmatprep.subr.bf16.mxu0 %v5660_v5 }
 0xbf3   :  { %5098 = vmatpush3.bf16.msra.mxu0 %v5837_v58 }
 0xbf4   :  { %5099 = vmatprep.subr.bf16.mxu0 %v5660_v5 }
 0xbf7   :  { %5101 = vmatpush3.bf16.msra.mxu0 %v5847_v61 }
 0xbf8   :  { %5102 = vmatprep.subr.bf16.mxu0 %v5660_v5 }
 0xbfb   :  { %5104 = vmatpush3.bf16.msra.mxu0 %v5857_v0 }
 0xbfc   :  { %5105 = vmatprep.subr.bf16.mxu0 %v5660_v5 }
 0xbff   :  { %5107 = vmatpush3.bf16.msra.mxu0 %v5867_v4 }
 0xc00   :  { %5132 = vmatprep.subr.bf16.mxu0 %v5660_v5 }
 0xcb5   :  { %v919_v9 = vpop.f32.mrb[8].mxu0 }
 0xcb6   :  { %v923_v10 = vadd.f32 %v919_v9, %v5915_v13  ;;  %v4735_v11 = vpop.f32.mrb[9].mxu0 }
 0xcb8   :  { %v3983_v12 = vmul.f32 -1.442695, %v923_v10 }
 0xcba   :  { %5601 = vpow2.f32 %v3983_v12 }
 0xcbb   :  { %5603 = vtanh.f32 %v923_v10 }
 0xcc4   :  { %v5602_v14 = vpop.eup %5601 }
 0xcc5   :  { %v928_v16 = vadd.f32 1.0, %v5602_v14  ;;  %v5604_v18 = vpop.eup %5603 }
 0xcc7   :  { %5605 = vrcp.f32 %v928_v16 }
 0xcd1   :  { %v5606_v19 = vpop.eup %5605 }
 0xcd2   :  { %v931_v20 = vsel %vm5924_vm9, %v5604_v18, %v5606_v19 }
 0xcd3   :  { %932 = vrot.lane.b32.xlu0 %v931_v20, %s5662_s25  ;;  %v938_v25 = vmul.f32 %v936_v23, %v931_v20 }
 0xd45   :  { %v933_v21 = vpop.permute.xlu0 %932 }
 0xd46   :  { %v934_v22 = vmul.f32 %v933_v21, %v931_v20 }
 0xd48   :  { %939 = vrot.lane.b32.xlu1 %v934_v22, %s5663_s26 }
 0xdba   :  { %v940_v26 = vpop.permute.xlu1 %939 }
 0xdbb   :  { %v941_v27 = vadd.f32 %v940_v26, %v938_v25 }
 0xdbd   :  { %5607 = vtanh.f32 %v941_v27  ;;  %v1038_v38 = vrot.slane %v941_v27, 6 }
 0xdc7   :  { %v5608_v28 = vpop.eup %5607 }
 0xdc8   :  { %943 = vrot.lane.b32.xlu0 %v5608_v28, %s5662_s25 }
 0xe3a   :  { %v944_v29 = vpop.permute.xlu0 %943 }
 0xe3b   :  { %v945_v30 = vmul.f32 %v944_v29, %v931_v20 }
 0xe3d   :  { %4769 = vmatmul.mubr.f32.vlgmr.msra.gmra.mrb[8].mxu1 %v945_v30 }
 0xe3e   :  { %5110 = vmatpush3.bf16.msra.mxu1 %v5794_v46  ;;  %4838 = vmatprep.mubr.msk.f32.mxu1 %vm5659_vm0, %v5658_v2 }
 0xe3f   :  { %5111 = vmatprep.subr.bf16.mxu1 %v5660_v5 }
 0xe42   :  { %5113 = vmatpush3.bf16.msra.mxu1 %v5807_v49 }
 0xe43   :  { %5114 = vmatprep.subr.bf16.mxu1 %v5660_v5 }
 0xe46   :  { %5116 = vmatpush3.bf16.msra.mxu1 %v5817_v52 }
 0xe47   :  { %5117 = vmatprep.subr.bf16.mxu1 %v5660_v5 }
 0xe4a   :  { %5119 = vmatpush3.bf16.msra.mxu1 %v5827_v55 }
 0xe4b   :  { %5120 = vmatprep.subr.bf16.mxu1 %v5660_v5 }
 0xe4e   :  { %5122 = vmatpush3.bf16.msra.mxu1 %v5837_v58 }
 0xe4f   :  { %5123 = vmatprep.subr.bf16.mxu1 %v5660_v5 }
 0xe52   :  { %5125 = vmatpush3.bf16.msra.mxu1 %v5847_v61 }
 0xe53   :  { %5126 = vmatprep.subr.bf16.mxu1 %v5660_v5 }
 0xe56   :  { %5128 = vmatpush3.bf16.msra.mxu1 %v5857_v0 }
 0xe57   :  { %5129 = vmatprep.subr.bf16.mxu1 %v5660_v5 }
 0xe5a   :  { %5131 = vmatpush3.bf16.msra.mxu1 %v5867_v4 }
 0xf10   :  { %v1012_v46 = vpop.f32.mrb[8].mxu1 }
 0xf11   :  { %v1017_v49 = vrot.slane %v1012_v46, 6  ;;  %v4770_v52 = vpop.f32.mrb[9].mxu1 }
 0xf13   :  { %v1019_v55 = vadd.f32 %v1017_v49, %v5915_v13 }
 0xf15   :  { %v3984_v31 = vmul.f32 -1.442695, %v1019_v55 }
 0xf17   :  { %5609 = vpow2.f32 %v3984_v31 }
 0xf18   :  { %5611 = vtanh.f32 %v1019_v55 }
 0xf21   :  { %v5610_v58 = vpop.eup %5609 }
 0xf22   :  { %v1024_v32 = vadd.f32 1.0, %v5610_v58  ;;  %v5612_v61 = vpop.eup %5611 }
 0xf24   :  { %5613 = vrcp.f32 %v1024_v32 }
 0xf2e   :  { %v5614_v33 = vpop.eup %5613 }
 0xf2f   :  { %v1027_v0 = vsel %vm5924_vm9, %v5612_v61, %v5614_v33 }
 0xf30   :  { %v1029_v34 = vrot.slane %v1027_v0, 2  ;;  %v1040_v40 = vmul.f32 %v1038_v38, %v1027_v0 }
 0xf32   :  { %1031 = vrot.lane.b32.xlu1 %v1029_v34, %s5662_s25 }
 0xfa4   :  { %v1032_v4 = vpop.permute.xlu1 %1031 }
 0xfa5   :  { %v1034_v35 = vrot.slane %v1032_v4, 6 }
 0xfa7   :  { %v1036_v36 = vmul.f32 %v1034_v35, %v1027_v0 }
 0xfa9   :  { %v1042_v37 = vrot.slane %v1036_v36, 2  ;;  %v1295_v36 = vld [vmem:[%s7619_s3 + $0x150] sm:$0xff] }
 0xfab   :  { %1044 = vrot.lane.b32.xlu0 %v1042_v37, %s5663_s26  ;;  %v1296_v37 = vld [vmem:[%s7619_s3 + $0x158] sm:$0xff] }
0x101d   :  { %v1045_v39 = vpop.permute.xlu0 %1044 }
0x101e   :  { %v1047_v41 = vrot.slane %v1045_v39, 6  ;;  %v5133_v39 = vpack.c.bf16 %v1295_v36, %v1294_v24  ;;  %v1428_v24 = vld [vmem:[%s7620_s4 + $0x130] sm:$0xff] }
0x1020   :  { %v1049_v42 = vadd.f32 %v1047_v41, %v1040_v40  ;;  %v1297_v40 = vld [vmem:[%s7619_s3 + $0x160] sm:$0xff] }
0x1021   :  { %v5136_v41 = vpack.c.bf16 %v1297_v40, %v1296_v37  ;;  %v1430_v40 = vld [vmem:[%s7620_s4 + $0x140] sm:$0xff] }
0x1022   :  { %5615 = vtanh.f32 %v1049_v42  ;;  %v1155_v9 = vrot.slane %v1049_v42, 6 }
0x102c   :  { %v5616_v43 = vpop.eup %5615 }
0x102d   :  { %v1052_v44 = vrot.slane %v5616_v43, 2 }
0x102f   :  { %1054 = vrot.lane.b32.xlu1 %v1052_v44, %s5662_s25 }
0x10a1   :  { %v1055_v45 = vpop.permute.xlu1 %1054 }
0x10a2   :  { %v1057_v47 = vrot.slane %v1055_v45, 6 }
0x10a4   :  { %v1059_v48 = vmul.f32 %v1057_v47, %v1027_v0  ;;  %v3972_v47 = vld [vmem:[%s7619_s3 + $0xbd] ss:$0 sm:$0xff] }
0x10a6   :  { %v1061_v50 = vrot.slane %v1059_v48, 2  ;;  %v280_v48 = vadd.f32 %v3972_v47, %v5917_v15  ;;  %v1393_v15 = vld [vmem:[%s7620_s4 + $0x18] sm:$0xff] }
0x10a7   :  { %v1465_v47 = vld [vmem:[%s7620_s4 + $0x258] sm:$0x1] }
0x10a8   :  { %4804 = vmatmul.mubr.f32.vlgmr.msra.gmra.mrb[10].mxu0 %v1061_v50 }
0x10a9   :  { %4849 = vmatprep.mubr.msk.f32.mxu0 %vm5659_vm0, %v5658_v2  ;;  %5134 = vmatpush3.bf16.msra.mxu0 %v5133_v39  ;;  %v1445_v39 = vld [vmem:[%s7620_s4 + $0x1b8] sm:$0xff] }
0x10aa   :  { %5135 = vmatprep.subr.bf16.mxu0 %v5660_v5 }
0x10ad   :  { %5137 = vmatpush3.bf16.msra.mxu0 %v5136_v41  ;;  %v1447_v41 = vld [vmem:[%s7620_s4 + $0x1c8] sm:$0xff] }
0x117b   :  { %v1129_v51 = vpop.f32.mrb[10].mxu0 }
0x117c   :  { %v1134_v53 = vrot.slane %v1129_v51, 4  ;;  %v4805_v54 = vpop.f32.mrb[11].mxu0  ;;  %v1391_v51 = vld [vmem:[%s7620_s4 + $0x8] sm:$0xff] }
0x117e   :  { %v1136_v56 = vadd.f32 %v1134_v53, %v5915_v13  ;;  %v1408_v53 = vld [vmem:[%s7620_s4 + $0x90] sm:$0xff] }
0x117f   :  { %v5138_v54 = vpack.c.bf16 %v1408_v53, %v1391_v51  ;;  %v1401_v51 = vld [vmem:[%s7620_s4 + $0x58] sm:$0xff]  ;;  %v1462_v53 = vld [vmem:[%s7620_s4 + $0x240] sm:$0x1] }
0x1180   :  { %v3985_v17 = vmul.f32 -1.442695, %v1136_v56 }
0x1181   :  { %5139 = vmatprep.subr.bf16.mxu0 %v5138_v54  ;;  %v1418_v54 = vld [vmem:[%s7620_s4 + $0xe0] sm:$0xff] }
0x1182   :  { %5617 = vpow2.f32 %v3985_v17  ;;  %v1390_v17 = vld [vmem:[%s7620_s4] sm:$0xff] }
0x1183   :  { %5619 = vtanh.f32 %v1136_v56  ;;  %v1410_v56 = vld [vmem:[%s7620_s4 + $0xa0] sm:$0xff] }
0x118c   :  { %v5618_v57 = vpop.eup %5617 }
0x118d   :  { %v1141_v59 = vadd.f32 1.0, %v5618_v57  ;;  %v5620_v60 = vpop.eup %5619  ;;  %v1407_v57 = vld [vmem:[%s7620_s4 + $0x88] sm:$0xff] }
0x118f   :  { %5621 = vrcp.f32 %v1141_v59  ;;  %v5146_v59 = vpack.c.bf16 %v1410_v56, %v1393_v15  ;;  %v1464_v15 = vld [vmem:[%s7620_s4 + $0x250] sm:$0x1]  ;;  %v1398_v56 = vld [vmem:[%s7620_s4 + $0x40] sm:$0xff] }
0x1191   :  { %5147 = vmatprep.subr.bf16.mxu1 %v5146_v59  ;;  %v1417_v59 = vld [vmem:[%s7620_s4 + $0xd8] sm:$0xff] }
0x1199   :  { %v5622_v62 = vpop.eup %5621 }
0x119a   :  { %v1144_v63 = vsel %vm5924_vm9, %v5620_v60, %v5622_v62  ;;  %v5140_v60 = vpack.c.bf16 %v1407_v57, %v1390_v17  ;;  %v1392_v62 = vld [vmem:[%s7620_s4 + $0x10] sm:$0xff]  ;;  %v1415_v17 = vld [vmem:[%s7620_s4 + $0xc8] sm:$0xff] }
0x119b   :  { %v1146_v1 = vrot.slane %v1144_v63, 4  ;;  %v1157_v11 = vmul.f32 %v1155_v9, %v1144_v63  ;;  %v1400_v57 = vld [vmem:[%s7620_s4 + $0x50] sm:$0xff] }
0x119d   :  { %1148 = vrot.lane.b32.xlu0 %v1146_v1, %s5662_s25  ;;  %v1425_v1 = vld [vmem:[%s7620_s4 + $0x118] sm:$0xff] }
0x120f   :  { %v1149_v3 = vpop.permute.xlu0 %1148 }
0x1210   :  { %v1151_v6 = vrot.slane %v1149_v3, 4 }
0x1212   :  { %v1153_v7 = vmul.f32 %v1151_v6, %v1144_v63  ;;  %v1442_v6 = vld [vmem:[%s7620_s4 + $0x1a0] sm:$0xff] }
0x1213   :  { %v5142_v9 = vpack.c.bf16 %v1442_v6, %v1425_v1  ;;  %v1452_v1 = vld [vmem:[%s7620_s4 + $0x1f0] sm:$0xff]  ;;  %v5178_v6 = vpack.c.bf16 %v1418_v54, %v1401_v51 }
0x1214   :  { %v1159_v8 = vrot.slane %v1153_v7, 4  ;;  %v1427_v7 = vld [vmem:[%s7620_s4 + $0x128] sm:$0xff]  ;;  %v1472_v51 = vld [vmem:[%s7620_s4 + $0x290] sm:$0x1] }
0x1216   :  { %1161 = vrot.lane.b32.xlu1 %v1159_v8, %s5663_s26  ;;  %v1444_v8 = vld [vmem:[%s7620_s4 + $0x1b0] sm:$0xff] }
0x1288   :  { %v1162_v10 = vpop.permute.xlu1 %1161 }
0x1289   :  { %v1164_v12 = vrot.slane %v1162_v10, 4  ;;  %v5150_v10 = vpack.c.bf16 %v1444_v8, %v1427_v7  ;;  %v5172_v7 = vpack.c.bf16 %v1415_v17, %v1398_v56  ;;  %v5180_v8 = vpack.c.bf16 %v1417_v59, %v1400_v57  ;;  %v1440_v57 = vld [vmem:[%s7620_s4 + $0x190] sm:$0xff] }
0x128b   :  { %v1166_v14 = vadd.f32 %v1164_v12, %v1157_v11  ;;  %v1424_v11 = vld [vmem:[%s7620_s4 + $0x110] sm:$0xff]  ;;  %v1441_v12 = vld [vmem:[%s7620_s4 + $0x198] sm:$0xff] }
0x128d   :  { %5623 = vtanh.f32 %v1166_v14 }
0x1297   :  { %v5624_v16 = vpop.eup %5623 }
0x1298   :  { %v1169_v18 = vrot.slane %v5624_v16, 4  ;;  %v5144_v16 = vpack.c.bf16 %v1441_v12, %v1424_v11  ;;  %v1449_v12 = vld [vmem:[%s7620_s4 + $0x1d8] sm:$0xff] }
0x129a   :  { %1171 = vrot.lane.b32.xlu0 %v1169_v18, %s5662_s25  ;;  %v1443_v18 = vld [vmem:[%s7620_s4 + $0x1a8] sm:$0xff] }
0x130c   :  { %v1172_v19 = vpop.permute.xlu0 %1171 }
0x130d   :  { %v1174_v20 = vrot.slane %v1172_v19, 4 }
0x130f   :  { %v1176_v21 = vmul.f32 %v1174_v20, %v1144_v63  ;;  %v1409_v63 = vld [vmem:[%s7620_s4 + $0x98] sm:$0xff]  ;;  %v1459_v20 = vld [vmem:[%s7620_s4 + $0x228] sm:$0x1] }
0x1310   :  { %v5148_v3 = vpack.c.bf16 %v1409_v63, %v1392_v62  ;;  %v1450_v62 = vld [vmem:[%s7620_s4 + $0x1e0] sm:$0xff]  ;;  %v1435_v63 = vld [vmem:[%s7620_s4 + $0x168] sm:$0xff] }
0x1311   :  { %v1178_v22 = vrot.slane %v1176_v21, 4  ;;  %v1461_v21 = vld [vmem:[%s7620_s4 + $0x238] sm:$0x1]  ;;  %v5182_v11 = vpack.c.bf16 %v1452_v1, %v1435_v63 }
0x1312   :  { %v2220_v63 = vld [vmem:[%s7621_s5 + $0x198] sm:$0xff] }
0x1313   :  { %4839 = vmatmul.mubr.f32.vlgmr.msra.gmra.mrb[10].mxu1 %v1178_v22  ;;  %v1458_v22 = vld [vmem:[%s7620_s4 + $0x220] sm:$0x1] }
0x1314   :  { %1666 = vmatprep.mubr.f32.mxu1 %v5658_v2  ;;  %5149 = vmatpush1.bf16.msra.mxu1 %v5148_v3 }
0x1315   :  { %5151 = vmatprep.subr.bf16.mxu1 %v5150_v10 }
0x13e6   :  { %v1246_v23 = vpop.f32.mrb[10].mxu1 }
0x13e7   :  { %v1251_v25 = vrot.slane %v1246_v23, 2  ;;  %v4840_v26 = vpop.f32.mrb[11].mxu1  ;;  %v1460_v23 = vld [vmem:[%s7620_s4 + $0x230] sm:$0x1] }
0x13e8   :  { %v1412_v26 = vld [vmem:[%s7620_s4 + $0xb0] sm:$0xff] }
0x13e9   :  { %v1253_v27 = vadd.f32 %v1251_v25, %v5915_v13  ;;  %v1272_v13 = vrot.slane %v1166_v14, 6  ;;  %v1426_v14 = vld [vmem:[%s7620_s4 + $0x120] sm:$0xff]  ;;  %v1395_v25 = vld [vmem:[%s7620_s4 + $0x28] sm:$0xff] }
0x13ea   :  { %v5152_v19 = vpack.c.bf16 %v1443_v18, %v1426_v14  ;;  %v1434_v14 = vld [vmem:[%s7620_s4 + $0x160] sm:$0xff] }
0x13eb   :  { %v3986_v28 = vmul.f32 -1.442695, %v1253_v27 }
0x13ec   :  { %5153 = vmatpush1.bf16.msra.mxu1 %v5152_v19 }
0x13ed   :  { %5625 = vpow2.f32 %v3986_v28  ;;  %3992 = vmatprep.subr.msk.mxu1 %vm1479_vm10, %v1461_v21  ;;  %v5154_v28 = vpack.c.bf16 %v1412_v26, %v1395_v25  ;;  %v1469_v21 = vld [vmem:[%s7620_s4 + $0x278] sm:$0x1]  ;;  %v1466_v26 = vld [vmem:[%s7620_s4 + $0x260] sm:$0x1] }
0x13ee   :  { %5627 = vtanh.f32 %v1253_v27  ;;  %v1397_v27 = vld [vmem:[%s7620_s4 + $0x38] sm:$0xff] }
0x13ef   :  { %v1405_v25 = vld [vmem:[%s7620_s4 + $0x78] sm:$0xff] }
0x13f0   :  { %3993 = vmatpush1.msk.msra.mxu1 %vm1479_vm10, %v1460_v23  ;;  %v1420_v23 = vld [vmem:[%s7620_s4 + $0xf0] sm:$0xff] }
0x13f7   :  { %v5626_v29 = vpop.eup %5625 }
0x13f8   :  { %v1258_v30 = vadd.f32 1.0, %v5626_v29  ;;  %v5628_v46 = vpop.eup %5627  ;;  %v1414_v29 = vld [vmem:[%s7620_s4 + $0xc0] sm:$0xff] }
0x13fa   :  { %5629 = vrcp.f32 %v1258_v30  ;;  %v5162_v30 = vpack.c.bf16 %v1414_v29, %v1397_v27  ;;  %v1468_v27 = vld [vmem:[%s7620_s4 + $0x270] sm:$0x1]  ;;  %v1402_v29 = vld [vmem:[%s7620_s4 + $0x60] sm:$0xff] }
0x13fc   :  { %5163 = vmatprep.subr.bf16.mxu1 %v5162_v30  ;;  %v1419_v30 = vld [vmem:[%s7620_s4 + $0xe8] sm:$0xff] }
0x1404   :  { %v5630_v49 = vpop.eup %5629 }
0x1405   :  { %v1261_v52 = vsel %vm5924_vm9, %v5628_v46, %v5630_v49  ;;  %v3987_v46 = vld [vmem:[%s7619_s3 + $0xbe] ss:$0 sm:$0xff] }
0x1406   :  { %v1263_v55 = vrot.slane %v1261_v52, 6  ;;  %v1274_v0 = vmul.f32 %v1272_v13, %v1261_v52  ;;  %v1429_v13 = vld [vmem:[%s7620_s4 + $0x138] sm:$0xff] }
0x1408   :  { %1265 = vrot.lane.b32.xlu1 %v1263_v55, %s5662_s25 }
0x147a   :  { %v1266_v31 = vpop.permute.xlu1 %1265 }
0x147b   :  { %v1268_v58 = vrot.slane %v1266_v31, 2  ;;  %v1394_v31 = vld [vmem:[%s7620_s4 + $0x20] sm:$0xff] }
0x147d   :  { %v1270_v32 = vmul.f32 %v1268_v58, %v1261_v52  ;;  %v1411_v58 = vld [vmem:[%s7620_s4 + $0xa8] sm:$0xff] }
0x147f   :  { %v1276_v61 = vrot.slane %v1270_v32, 6  ;;  %v1396_v32 = vld [vmem:[%s7620_s4 + $0x30] sm:$0xff] }
0x1481   :  { %1278 = vrot.lane.b32.xlu0 %v1276_v61, %s5663_s26  ;;  %v1413_v61 = vld [vmem:[%s7620_s4 + $0xb8] sm:$0xff] }
0x14f3   :  { %v1279_v33 = vpop.permute.xlu0 %1278 }
0x14f4   :  { %v1281_v34 = vrot.slane %v1279_v33, 2  ;;  %v1446_v33 = vld [vmem:[%s7620_s4 + $0x1c0] sm:$0xff] }
0x14f5   :  { %v5158_v37 = vpack.c.bf16 %v1446_v33, %v1429_v13  ;;  %v5188_v13 = vpack.c.bf16 %v1419_v30, %v1402_v29  ;;  %v2205_v30 = vld [vmem:[%s7621_s5 + $0x120] sm:$0xff] }
0x14f6   :  { %v1283_v4 = vadd.f32 %v1281_v34, %v1274_v0  ;;  %v1431_v0 = vld [vmem:[%s7620_s4 + $0x148] sm:$0xff]  ;;  %v1448_v34 = vld [vmem:[%s7620_s4 + $0x1d0] sm:$0xff] }
0x14f8   :  { %5631 = vtanh.f32 %v1283_v4  ;;  %v5156_v4 = vpack.c.bf16 %v1411_v58, %v1394_v31  ;;  %v1439_v31 = vld [vmem:[%s7620_s4 + $0x188] sm:$0xff]  ;;  %v1456_v58 = vld [vmem:[%s7620_s4 + $0x210] sm:$0xff] }
0x1502   :  { %v5632_v35 = vpop.eup %5631 }
0x1503   :  { %v1286_v38 = vrot.slane %v5632_v35, 6  ;;  %v5164_v35 = vpack.c.bf16 %v1413_v61, %v1396_v32 }
0x1505   :  { %1288 = vrot.lane.b32.xlu1 %v1286_v38, %s5662_s25  ;;  %v5166_v38 = vpack.c.bf16 %v1448_v34, %v1431_v0  ;;  %v1436_v0 = vld [vmem:[%s7620_s4 + $0x170] sm:$0xff]  ;;  %s5665_s25 = smov [#allocation2]  }
0x1577   :  { %v1289_v42 = vpop.permute.xlu1 %1288 }
0x1578   :  { %v1291_v43 = vrot.slane %v1289_v42, 2 }
0x157a   :  { %v1293_v44 = vmul.f32 %v1291_v43, %v1261_v52  ;;  %v5160_v43 = vpack.c.bf16 %v1445_v39, %v1428_v24  ;;  %v1438_v24 = vld [vmem:[%s7620_s4 + $0x180] sm:$0xff]  ;;  %v1471_v39 = vld [vmem:[%s7620_s4 + $0x288] sm:$0x1] }
0x157c   :  { %v1304_v45 = vrot.slane %v1293_v44, 6  ;;  %v5168_v44 = vpack.c.bf16 %v1447_v41, %v1430_v40  ;;  %v1473_v40 = vld [vmem:[%s7620_s4 + $0x298] sm:$0x1]  ;;  %v1470_v41 = vld [vmem:[%s7620_s4 + $0x280] sm:$0x1] }
0x157e   :  { %1305 = vrot.lane.b32.xlu0 %v1304_v45, %s5663_s26  ;;  %v1463_v45 = vld [vmem:[%s7620_s4 + $0x248] sm:$0x1]  ;;  %s3960_s26 = sshll.u32 %s5665_s25, 4  ;;  %s3961_s26 = int_to_ptr.vmem [resolvable:$true] %s3960_s26 }
0x157f   :  { %s5633_s27 = scalar_lea.vmem %s3961_s26, 32  ;;  %p5638_p1 = scmp.lt.s32.totalorder %s3961_s26, %s3961_s26 }
0x1580   :  { %p5634_p0 = scmp.ne.s32.totalorder %s3961_s26, %s5633_s27  ;;  %p5639_p2 = scmp.lt.s32.totalorder %s5633_s27, %s5633_s27 }
0x1582   :  { %1386 = vrot.lane.b32.xlu0 %v280_v48, %s5664_s13  ;;  %v1399_v48 = vld [vmem:[%s7620_s4 + $0x48] sm:$0xff]  ;;  %p5640_p3 = por %p5639_p2, %p5638_p1 }
0x1584   :  { %p5641_p4 = pnand %p5640_p3, %p5634_p0 }
0x15f0   :  { %v1306_v50 = vpop.permute.xlu0 %1305 }
0x15f1   :  { %4850 = vmatmul.mubr.msk.f32.vlgmr.msra.gmra.mrb[12].mxu0 %vm126_vm3, %v1306_v50  ;;  %v1416_v50 = vld [vmem:[%s7620_s4 + $0xd0] sm:$0xff] }
0x15f2   :  { %1595 = vmatprep.mubr.f32.mxu0 %v5658_v2  ;;  %5141 = vmatpush1.bf16.msra.mxu0 %v5140_v60  ;;  %v1433_v60 = vld [vmem:[%s7620_s4 + $0x158] sm:$0xff]  ;;  %v5170_v3 = vpack.c.bf16 %v1416_v50, %v1399_v48  ;;  %v2169_v48 = vld [vmem:[%s7621_s5] sm:$0xff]  ;;  %v2186_v50 = vld [vmem:[%s7621_s5 + $0x88] sm:$0xff] }
0x15f3   :  { %5143 = vmatprep.subr.bf16.mxu0 %v5142_v9  ;;  %v1432_v9 = vld [vmem:[%s7620_s4 + $0x150] sm:$0xff]  ;;  %v5174_v10 = vpack.c.bf16 %v1450_v62, %v1433_v60  ;;  %v5210_v17 = vpack.c.bf16 %v2186_v50, %v2169_v48  ;;  %v1457_v60 = vld [vmem:[%s7620_s4 + $0x218] sm:$0xff] }
0x15f4   :  { %v5176_v18 = vpack.c.bf16 %v1449_v12, %v1432_v9  ;;  %v2203_v62 = vld [vmem:[%s7621_s5 + $0x110] sm:$0xff]  ;;  %v5206_v1 = vpack.c.bf16 %v1457_v60, %v1440_v57  ;;  %v2174_v9 = vld [vmem:[%s7621_s5 + $0x28] sm:$0xff]  ;;  %v2244_v60 = vld [vmem:[%s7621_s5 + $0x258] sm:$0x1] }
0x15f5   :  { %v2191_v12 = vld [vmem:[%s7621_s5 + $0xb0] sm:$0xff] }
0x15f6   :  { %5145 = vmatpush1.bf16.msra.mxu0 %v5144_v16  ;;  %v1451_v16 = vld [vmem:[%s7620_s4 + $0x1e8] sm:$0xff] }
0x15f7   :  { %3989 = vmatprep.subr.msk.mxu0 %vm1479_vm10, %v1459_v20  ;;  %v5184_v19 = vpack.c.bf16 %v1451_v16, %v1434_v14  ;;  %v1467_v20 = vld [vmem:[%s7620_s4 + $0x268] sm:$0x1]  ;;  %v2171_v14 = vld [vmem:[%s7621_s5 + $0x10] sm:$0xff]  ;;  %v2188_v16 = vld [vmem:[%s7621_s5 + $0x98] sm:$0xff] }
0x15fa   :  { %3990 = vmatpush1.msk.msra.mxu0 %vm1479_vm10, %v1458_v22  ;;  %v1403_v22 = vld [vmem:[%s7620_s4 + $0x68] sm:$0xff] }
0x15fb   :  { %5155 = vmatprep.subr.bf16.mxu0 %v5154_v28  ;;  %v1422_v28 = vld [vmem:[%s7620_s4 + $0x100] sm:$0xff]  ;;  %v5186_v32 = vpack.c.bf16 %v1420_v23, %v1403_v22  ;;  %v2223_v22 = vld [vmem:[%s7621_s5 + $0x1b0] sm:$0xff]  ;;  %v2208_v23 = vld [vmem:[%s7621_s5 + $0x138] sm:$0xff] }
0x15fc   :  { %v5194_v61 = vpack.c.bf16 %v1422_v28, %v1405_v25  ;;  %v2225_v25 = vld [vmem:[%s7621_s5 + $0x1c0] sm:$0xff]  ;;  %v5218_v28 = vpack.c.bf16 %v2188_v16, %v2171_v14  ;;  %v2214_v14 = vld [vmem:[%s7621_s5 + $0x168] sm:$0xff]  ;;  %v2231_v16 = vld [vmem:[%s7621_s5 + $0x1f0] sm:$0xff] }
0x16c4   :  { %v1375_v49 = vpop.f32.mrb[12].mxu0 }
0x16c5   :  { %v1376_v52 = vadd.f32 %v3987_v46, %v1375_v49  ;;  %v4851_v55 = vpop.f32.mrb[13].mxu0  ;;  %v1404_v46 = vld [vmem:[%s7620_s4 + $0x70] sm:$0xff]  ;;  %v1421_v49 = vld [vmem:[%s7620_s4 + $0xf8] sm:$0xff] }
0x16c6   :  { %v1454_v55 = vld [vmem:[%s7620_s4 + $0x200] sm:$0xff]  ;;  %v5196_v33 = vpack.c.bf16 %v1421_v49, %v1404_v46 }
0x16c7   :  { %1380 = vrot.lane.b32.xlu1 %v1376_v52, %s5664_s13  ;;  %v1437_v52 = vld [vmem:[%s7620_s4 + $0x178] sm:$0xff] }
0x16c8   :  { %v5190_v34 = vpack.c.bf16 %v1454_v55, %v1437_v52  ;;  %v5228_v52 = vpack.c.bf16 %v2225_v25, %v2208_v23  ;;  %v2222_v55 = vld [vmem:[%s7621_s5 + $0x1a8] sm:$0xff]  ;;  %v2213_v25 = vld [vmem:[%s7621_s5 + $0x160] sm:$0xff] }
0x1739   :  { %v1381_v36 = vpop.permute.xlu1 %1380 }
0x173a   :  { %v6205_v42 = vsel %vm1383_vm12, 1.0, %v1381_v36  ;;  %v1455_v36 = vld [vmem:[%s7620_s4 + $0x208] sm:$0xff] }
0x173b   :  { %3991 = vmatmul.mubr.msk.f32.vlgmr.msra.gmra.mrb[14].mxu0 %vm1475_vm11, %v6205_v42  ;;  %3994 = vmatmul.mubr.msk.f32.vlgmr.msra.gmra.mrb[12].mxu1 %vm1475_vm11, %v6205_v42 }
0x173c   :  { %5157 = vmatpush1.bf16.msra.mxu0 %v5156_v4  ;;  %5165 = vmatpush1.bf16.msra.mxu1 %v5164_v35  ;;  %v5198_v4 = vpack.c.bf16 %v1456_v58, %v1439_v31  ;;  %v1453_v35 = vld [vmem:[%s7620_s4 + $0x1f8] sm:$0xff]  ;;  %v2207_v31 = vld [vmem:[%s7621_s5 + $0x130] sm:$0xff] }
0x173d   :  { %5159 = vmatprep.subr.bf16.mxu0 %v5158_v37  ;;  %5167 = vmatprep.subr.bf16.mxu1 %v5166_v38  ;;  %v5192_v37 = vpack.c.bf16 %v1453_v35, %v1436_v0  ;;  %v5200_v38 = vpack.c.bf16 %v1455_v36, %v1438_v24  ;;  %v2224_v58 = vld [vmem:[%s7621_s5 + $0x1b8] sm:$0xff]  ;;  %v2193_v0 = vld [vmem:[%s7621_s5 + $0xc0] sm:$0xff]  ;;  %v2195_v24 = vld [vmem:[%s7621_s5 + $0xd0] sm:$0xff] }
0x173e   :  { %1737 = vmatprep.mubr.f32.mxu0 %v5658_v2  ;;  %1808 = vmatprep.mubr.f32.mxu1 %v5658_v2  ;;  %v2241_v35 = vld [vmem:[%s7621_s5 + $0x240] sm:$0x1]  ;;  %v2175_v36 = vld [vmem:[%s7621_s5 + $0x30] sm:$0xff] }
0x1740   :  { %5161 = vmatpush1.bf16.msra.mxu0 %v5160_v43  ;;  %5169 = vmatpush1.bf16.msra.mxu1 %v5168_v44  ;;  %v2170_v43 = vld [vmem:[%s7621_s5 + $0x8] sm:$0xff]  ;;  %v2187_v44 = vld [vmem:[%s7621_s5 + $0x90] sm:$0xff] }
0x1741   :  { %3995 = vmatprep.subr.msk.mxu0 %vm1479_vm10, %v1463_v45  ;;  %3998 = vmatprep.subr.msk.mxu1 %vm1479_vm10, %v1465_v47  ;;  %v1406_v45 = vld [vmem:[%s7620_s4 + $0x80] sm:$0xff]  ;;  %v1423_v47 = vld [vmem:[%s7620_s4 + $0x108] sm:$0xff]  ;;  %v5208_v54 = vpack.c.bf16 %v2187_v44, %v2170_v43  ;;  %v2212_v43 = vld [vmem:[%s7621_s5 + $0x158] sm:$0xff] }
0x1742   :  { %v5203_v56 = vpack.c.bf16 %v1423_v47, %v1406_v45  ;;  %v2229_v44 = vld [vmem:[%s7621_s5 + $0x1e0] sm:$0xff] }
0x1744   :  { %3996 = vmatpush1.msk.msra.mxu0 %vm1479_vm10, %v1462_v53  ;;  %3999 = vmatpush1.msk.msra.mxu1 %vm1479_vm10, %v1464_v15  ;;  %v2204_v53 = vld [vmem:[%s7621_s5 + $0x118] sm:$0xff]  ;;  %v2221_v15 = vld [vmem:[%s7621_s5 + $0x1a0] sm:$0xff] }
0x1745   :  { %3997 = vmatmul.mubr.msk.f32.vlgmr.msra.gmra.mrb[16].mxu0 %vm1475_vm11, %v6205_v42  ;;  %4000 = vmatmul.mubr.msk.f32.vlgmr.msra.gmra.mrb[14].mxu1 %vm1475_vm11, %v6205_v42  ;;  %v5212_v59 = vpack.c.bf16 %v2221_v15, %v2204_v53  ;;  %v5244_v15 = vpack.c.bf16 %v2229_v44, %v2212_v43  ;;  %v2236_v43 = vld [vmem:[%s7621_s5 + $0x218] sm:$0xff] }
0x1746   :  { %5171 = vmatprep.subr.bf16.mxu0 %v5170_v3  ;;  %5179 = vmatprep.subr.bf16.mxu1 %v5178_v6  ;;  %v5214_v3 = vpack.c.bf16 %v2220_v63, %v2203_v62  ;;  %v2238_v6 = vld [vmem:[%s7621_s5 + $0x228] sm:$0x1]  ;;  %v2180_v63 = vld [vmem:[%s7621_s5 + $0x58] sm:$0xff] }
0x1747   :  { %5173 = vmatpush1.bf16.msra.mxu0 %v5172_v7  ;;  %5181 = vmatpush1.bf16.msra.mxu1 %v5180_v8  ;;  %v2172_v7 = vld [vmem:[%s7621_s5 + $0x18] sm:$0xff]  ;;  %v2189_v8 = vld [vmem:[%s7621_s5 + $0xa0] sm:$0xff]  ;;  %v2246_v62 = vld [vmem:[%s7621_s5 + $0x268] sm:$0x1] }
0x1748   :  { %5175 = vmatprep.subr.bf16.mxu0 %v5174_v10  ;;  %5183 = vmatprep.subr.bf16.mxu1 %v5182_v11  ;;  %v1474_v10 = vld [vmem:[%s7620_s4 + $0x2a0] sm:$0x1] }
0x1749   :  { %1879 = vmatprep.mubr.f32.mxu0 %v5658_v2  ;;  %1950 = vmatprep.mubr.f32.mxu1 %v5658_v2  ;;  %v2237_v11 = vld [vmem:[%s7621_s5 + $0x220] sm:$0x1] }
0x174b   :  { %5177 = vmatpush1.bf16.msra.mxu0 %v5176_v18  ;;  %5185 = vmatpush1.bf16.msra.mxu1 %v5184_v19  ;;  %v2173_v18 = vld [vmem:[%s7621_s5 + $0x20] sm:$0xff]  ;;  %v2190_v19 = vld [vmem:[%s7621_s5 + $0xa8] sm:$0xff] }
0x174c   :  { %4001 = vmatprep.subr.msk.mxu0 %vm1479_vm10, %v1467_v20  ;;  %4004 = vmatprep.subr.msk.mxu1 %vm1479_vm10, %v1469_v21  ;;  %v2206_v20 = vld [vmem:[%s7621_s5 + $0x128] sm:$0xff]  ;;  %v1387_v21 = vpop.permute.xlu0 %1386  ;;  %v5226_v29 = vpack.c.bf16 %v2190_v19, %v2173_v18  ;;  %v2216_v18 = vld [vmem:[%s7621_s5 + $0x178] sm:$0xff]  ;;  %v2233_v19 = vld [vmem:[%s7621_s5 + $0x200] sm:$0xff] }
0x174d   :  { %v6465_v46 = vsel %vm1383_vm12, 1.0, %v1387_v21  ;;  %v5220_v49 = vpack.c.bf16 %v2223_v22, %v2206_v20 }
0x174f   :  { %4002 = vmatpush1.msk.msra.mxu0 %vm1479_vm10, %v1466_v26  ;;  %4005 = vmatpush1.msk.msra.mxu1 %vm1479_vm10, %v1468_v27  ;;  %v5216_v26 = vpack.c.bf16 %v2189_v8, %v2172_v7  ;;  %v5224_v27 = vpack.c.bf16 %v2191_v12, %v2174_v9  ;;  %v2245_v7 = vld [vmem:[%s7621_s5 + $0x260] sm:$0x1]  ;;  %v2199_v8 = vld [vmem:[%s7621_s5 + $0xf0] sm:$0xff]  ;;  %v2198_v12 = vld [vmem:[%s7621_s5 + $0xe8] sm:$0xff] }
0x1750   :  { %4003 = vmatmul.mubr.msk.f32.vlgmr.msra.gmra.mrb[18].mxu0 %vm1475_vm11, %v6205_v42  ;;  %4006 = vmatmul.mubr.msk.f32.vlgmr.msra.gmra.mrb[16].mxu1 %vm1475_vm11, %v6205_v42  ;;  %v2179_v9 = vld [vmem:[%s7621_s5 + $0x50] sm:$0xff] }
0x1751   :  { %5187 = vmatprep.subr.bf16.mxu0 %v5186_v32  ;;  %5195 = vmatprep.subr.bf16.mxu1 %v5194_v61  ;;  %v5222_v32 = vpack.c.bf16 %v2222_v55, %v2205_v30  ;;  %v5230_v61 = vpack.c.bf16 %v2224_v58, %v2207_v31  ;;  %v2232_v30 = vld [vmem:[%s7621_s5 + $0x1f8] sm:$0xff]  ;;  %v2250_v31 = vld [vmem:[%s7621_s5 + $0x288] sm:$0x1]  ;;  %v2247_v58 = vld [vmem:[%s7621_s5 + $0x270] sm:$0x1] }
0x1752   :  { %5189 = vmatpush1.bf16.msra.mxu0 %v5188_v13  ;;  %5197 = vmatpush1.bf16.msra.mxu1 %v5196_v33  ;;  %v2240_v13 = vld [vmem:[%s7621_s5 + $0x238] sm:$0x1]  ;;  %v2242_v33 = vld [vmem:[%s7621_s5 + $0x248] sm:$0x1] }
0x1753   :  { %5191 = vmatprep.subr.bf16.mxu0 %v5190_v34  ;;  %5199 = vmatprep.subr.bf16.mxu1 %v5198_v4  ;;  %v2178_v34 = vld [vmem:[%s7621_s5 + $0x48] sm:$0xff]  ;;  %v2239_v4 = vld [vmem:[%s7621_s5 + $0x230] sm:$0x1]  ;;  %v2248_v55 = vld [vmem:[%s7621_s5 + $0x278] sm:$0x1] }
0x1754   :  { %2021 = vmatprep.mubr.f32.mxu0 %v5658_v2  ;;  %2092 = vmatprep.mubr.f32.mxu1 %v5658_v2  ;;  %v5240_v47 = vpack.c.bf16 %v2195_v24, %v2178_v34  ;;  %v2249_v34 = vld [vmem:[%s7621_s5 + $0x280] sm:$0x1] }
0x1756   :  { %5193 = vmatpush1.bf16.msra.mxu0 %v5192_v37  ;;  %5201 = vmatpush1.bf16.msra.mxu1 %v5200_v38  ;;  %v2192_v37 = vld [vmem:[%s7621_s5 + $0xb8] sm:$0xff]  ;;  %v2177_v38 = vld [vmem:[%s7621_s5 + $0x40] sm:$0xff] }
0x1757   :  { %4007 = vmatprep.subr.msk.mxu0 %vm1479_vm10, %v1471_v39  ;;  %4010 = vmatprep.subr.msk.mxu1 %vm1479_vm10, %v1473_v40  ;;  %v2194_v39 = vld [vmem:[%s7621_s5 + $0xc8] sm:$0xff]  ;;  %v5234_v48 = vpack.c.bf16 %v2192_v37, %v2175_v36 }
0x1758   :  { %v2210_v40 = vld [vmem:[%s7621_s5 + $0x148] sm:$0xff]  ;;  %v5242_v50 = vpack.c.bf16 %v2194_v39, %v2177_v38  ;;  %v2217_v38 = vld [vmem:[%s7621_s5 + $0x180] sm:$0xff] }
0x175a   :  { %4008 = vmatpush1.msk.msra.mxu0 %vm1479_vm10, %v1470_v41  ;;  %4011 = vmatpush1.msk.msra.mxu1 %vm1479_vm10, %v1472_v51  ;;  %v2227_v41 = vld [vmem:[%s7621_s5 + $0x1d0] sm:$0xff]  ;;  %v2209_v51 = vld [vmem:[%s7621_s5 + $0x140] sm:$0xff] }
0x175b   :  { %4009 = vmatmul.mubr.msk.f32.vlgmr.msra.gmra.mrb[20].mxu0 %vm1475_vm11, %v6205_v42  ;;  %4012 = vmatmul.mubr.msk.f32.vlgmr.msra.gmra.mrb[18].mxu1 %vm1475_vm11, %v6205_v42  ;;  %v5236_v53 = vpack.c.bf16 %v2227_v41, %v2210_v40  ;;  %v2234_v40 = vld [vmem:[%s7621_s5 + $0x208] sm:$0xff]  ;;  %v2219_v41 = vld [vmem:[%s7621_s5 + $0x190] sm:$0xff] }
0x175c   :  { %5202 = vmatprep.subr.bf16.mxu0 %v5660_v5  ;;  %5209 = vmatprep.subr.bf16.mxu1 %v5208_v54  ;;  %v2226_v54 = vld [vmem:[%s7621_s5 + $0x1c8] sm:$0xff]  ;;  %v5270_v44 = vpack.c.bf16 %v2234_v40, %v2217_v38  ;;  %v3017_v40 = vld [vmem:[%s7622_s6 + $0x1b0] sm:$0xff] }
0x175d   :  { %5204 = vmatpush3.bf16.msra.mxu0 %v5203_v56  ;;  %5211 = vmatpush1.bf16.msra.mxu1 %v5210_v17  ;;  %v2211_v56 = vld [vmem:[%s7621_s5 + $0x150] sm:$0xff]  ;;  %v2228_v17 = vld [vmem:[%s7621_s5 + $0x1d8] sm:$0xff]  ;;  %v5238_v57 = vpack.c.bf16 %v2226_v54, %v2209_v51  ;;  %v2979_v51 = vld [vmem:[%s7622_s6 + $0x80] sm:$0xff] }
0x175e   :  { %5205 = vmatprep.subr.bf16.mxu0 %v5660_v5  ;;  %5213 = vmatprep.subr.bf16.mxu1 %v5212_v59  ;;  %v5246_v59 = vpack.c.bf16 %v2228_v17, %v2211_v56  ;;  %v2964_v56 = vld [vmem:[%s7622_s6 + $0x8] sm:$0xff]  ;;  %v2982_v17 = vld [vmem:[%s7622_s6 + $0x98] sm:$0xff] }
0x175f   :  { %4862 = vmatprep.mubr.msk.f32.mxu0 %vm5659_vm0, %v5658_v2  ;;  %2372 = vmatprep.mubr.f32.mxu1 %v5658_v2 }
0x1761   :  { %5207 = vmatpush3.bf16.msra.mxu0 %v5206_v1  ;;  %5215 = vmatpush1.bf16.msra.mxu1 %v5214_v3  ;;  %v2197_v1 = vld [vmem:[%s7621_s5 + $0xe0] sm:$0xff]  ;;  %v2182_v3 = vld [vmem:[%s7621_s5 + $0x68] sm:$0xff] }
0x1762   :  { %4860 = vmatprep.subr.mxu0 %v5658_v2  ;;  %4015 = vmatprep.subr.msk.mxu1 %vm1479_vm10, %v2238_v6  ;;  %v2243_v6 = vld [vmem:[%s7621_s5 + $0x250] sm:$0x1]  ;;  %v5248_v20 = vpack.c.bf16 %v2197_v1, %v2180_v63  ;;  %v5256_v21 = vpack.c.bf16 %v2199_v8, %v2182_v3  ;;  %v2983_v1 = vld [vmem:[%s7622_s6 + $0xa0] sm:$0xff]  ;;  %v2984_v3 = vld [vmem:[%s7622_s6 + $0xa8] sm:$0xff] }
0x1763   :  { %v2968_v8 = vld [vmem:[%s7622_s6 + $0x28] sm:$0xff] }
0x1765   :  { %4861 = vmatpush3.msk.msra.mxu0 %vm1479_vm10, %v1474_v10  ;;  %4016 = vmatpush1.msk.msra.mxu1 %vm1479_vm10, %v2237_v11  ;;  %v2196_v10 = vld [vmem:[%s7621_s5 + $0xd8] sm:$0xff]  ;;  %v2181_v11 = vld [vmem:[%s7621_s5 + $0x60] sm:$0xff] }
0x1766   :  { %4863 = vmatmul.mubr.msk.f32.vlgmr.msra.gmra.mrb[22].mxu0 %vm1475_vm11, %v6205_v42  ;;  %4017 = vmatmul.mubr.msk.f32.vlgmr.msra.gmra.mrb[20].mxu1 %vm1475_vm11, %v6465_v46  ;;  %v2176_v42 = vld [vmem:[%s7621_s5 + $0x38] sm:$0xff]  ;;  %v5250_v22 = vpack.c.bf16 %v2196_v10, %v2179_v9  ;;  %v5258_v23 = vpack.c.bf16 %v2198_v12, %v2181_v11  ;;  %v3011_v9 = vld [vmem:[%s7622_s6 + $0x180] sm:$0xff]  ;;  %v3012_v11 = vld [vmem:[%s7622_s6 + $0x188] sm:$0xff] }
0x1767   :  { %5217 = vmatprep.subr.bf16.mxu0 %v5216_v26  ;;  %5225 = vmatprep.subr.bf16.mxu1 %v5224_v27  ;;  %v5232_v45 = vpack.c.bf16 %v2193_v0, %v2176_v42  ;;  %v5252_v26 = vpack.c.bf16 %v2231_v16, %v2214_v14  ;;  %v5260_v27 = vpack.c.bf16 %v2233_v19, %v2216_v18  ;;  %v2185_v42 = vld [vmem:[%s7621_s5 + $0x80] sm:$0xff]  ;;  %v2202_v0 = vld [vmem:[%s7621_s5 + $0x108] sm:$0xff]  ;;  %v2985_v19 = vld [vmem:[%s7622_s6 + $0xb0] sm:$0xff] }
0x1768   :  { %5219 = vmatpush1.bf16.msra.mxu0 %v5218_v28  ;;  %5227 = vmatpush1.bf16.msra.mxu1 %v5226_v29  ;;  %v2230_v28 = vld [vmem:[%s7621_s5 + $0x1e8] sm:$0xff]  ;;  %v2215_v29 = vld [vmem:[%s7621_s5 + $0x170] sm:$0xff]  ;;  %v5273_v37 = vpack.c.bf16 %v2202_v0, %v2185_v42  ;;  %v2995_v12 = vld [vmem:[%s7622_s6 + $0x100] sm:$0xff]  ;;  %v5310_v16 = vpack.c.bf16 %v3012_v11, %v3011_v9 }
0x1769   :  { %5221 = vmatprep.subr.bf16.mxu0 %v5220_v49  ;;  %5229 = vmatprep.subr.bf16.mxu1 %v5228_v52  ;;  %v5254_v49 = vpack.c.bf16 %v2230_v28, %v2213_v25  ;;  %v5262_v52 = vpack.c.bf16 %v2232_v30, %v2215_v29  ;;  %v2996_v14 = vld [vmem:[%s7622_s6 + $0x108] sm:$0xff]  ;;  %v3013_v25 = vld [vmem:[%s7622_s6 + $0x190] sm:$0xff]  ;;  %v2998_v30 = vld [vmem:[%s7622_s6 + $0x118] sm:$0xff] }
0x176a   :  { %2443 = vmatprep.mubr.f32.mxu0 %v5658_v2  ;;  %2514 = vmatprep.mubr.f32.mxu1 %v5658_v2  ;;  %v5312_v18 = vpack.c.bf16 %v2996_v14, %v2995_v12  ;;  %v2997_v29 = vld [vmem:[%s7622_s6 + $0x110] sm:$0xff]  ;;  %v2999_v0 = vld [vmem:[%s7622_s6 + $0x120] sm:$0xff]  ;;  %v3022_v9 = vld [vmem:[%s7622_s6 + $0x1d8] sm:$0xff] }
0x176b   :  { %v3006_v11 = vld [vmem:[%s7622_s6 + $0x158] sm:$0xff] }
0x176c   :  { %5223 = vmatpush1.bf16.msra.mxu0 %v5222_v32  ;;  %5231 = vmatpush1.bf16.msra.mxu1 %v5230_v61  ;;  %v2184_v32 = vld [vmem:[%s7621_s5 + $0x78] sm:$0xff]  ;;  %v2201_v61 = vld [vmem:[%s7621_s5 + $0x100] sm:$0xff] }
0x176d   :  { %4018 = vmatprep.subr.msk.mxu0 %vm1479_vm10, %v2240_v13  ;;  %4021 = vmatprep.subr.msk.mxu1 %vm1479_vm10, %v2242_v33  ;;  %v2183_v13 = vld [vmem:[%s7621_s5 + $0x70] sm:$0xff]  ;;  %v2200_v33 = vld [vmem:[%s7621_s5 + $0xf8] sm:$0xff]  ;;  %v5264_v24 = vpack.c.bf16 %v2201_v61, %v2184_v32 }
0x176e   :  { %v5266_v36 = vpack.c.bf16 %v2200_v33, %v2183_v13  ;;  %v3015_v13 = vld [vmem:[%s7622_s6 + $0x1a0] sm:$0xff]  ;;  %v3016_v33 = vld [vmem:[%s7622_s6 + $0x1a8] sm:$0xff] }
0x176f   :  { %v5318_v42 = vpack.c.bf16 %v3016_v33, %v3015_v13 }
0x1770   :  { %4019 = vmatpush1.msk.msra.mxu0 %vm1479_vm10, %v2239_v4  ;;  %4022 = vmatpush1.msk.msra.mxu1 %vm1479_vm10, %v2241_v35  ;;  %v2218_v4 = vld [vmem:[%s7621_s5 + $0x188] sm:$0xff]  ;;  %v2235_v35 = vld [vmem:[%s7621_s5 + $0x210] sm:$0xff] }
0x1771   :  { %4020 = vmatmul.mubr.msk.f32.vlgmr.msra.gmra.mrb[24].mxu0 %vm1475_vm11, %v6465_v46  ;;  %4023 = vmatmul.mubr.msk.f32.vlgmr.msra.gmra.mrb[22].mxu1 %vm1475_vm11, %v6465_v46  ;;  %v5268_v39 = vpack.c.bf16 %v2235_v35, %v2218_v4  ;;  %v2989_v4 = vld [vmem:[%s7622_s6 + $0xd0] sm:$0xff] }
0x1772   :  { %5233 = vmatprep.subr.bf16.mxu0 %v5232_v45  ;;  %5241 = vmatprep.subr.bf16.mxu1 %v5240_v47  ;;  %v5276_v45 = vpack.c.bf16 %v2236_v43, %v2219_v41  ;;  %v2252_v47 = vld [vmem:[%s7621_s5 + $0x298] sm:$0x1]  ;;  %v3001_v43 = vld [vmem:[%s7622_s6 + $0x130] sm:$0xff] }
0x1773   :  { %5235 = vmatpush1.bf16.msra.mxu0 %v5234_v48  ;;  %5243 = vmatpush1.bf16.msra.mxu1 %v5242_v50  ;;  %v2251_v48 = vld [vmem:[%s7621_s5 + $0x290] sm:$0x1]  ;;  %v2253_v50 = vld [vmem:[%s7621_s5 + $0x2a0] sm:$0x1]  ;;  %v3018_v41 = vld [vmem:[%s7622_s6 + $0x1b8] sm:$0xff] }
0x1774   :  { %5237 = vmatprep.subr.bf16.mxu0 %v5236_v53  ;;  %5245 = vmatprep.subr.bf16.mxu1 %v5244_v15  ;;  %v2980_v53 = vld [vmem:[%s7622_s6 + $0x88] sm:$0xff]  ;;  %v2963_v15 = vld [vmem:[%s7622_s6] sm:$0xff] }
0x1775   :  { %2585 = vmatprep.mubr.f32.mxu0 %v5658_v2  ;;  %2656 = vmatprep.mubr.f32.mxu1 %v5658_v2  ;;  %v5278_v54 = vpack.c.bf16 %v2980_v53, %v2979_v51  ;;  %v2975_v53 = vld [vmem:[%s7622_s6 + $0x60] sm:$0xff] }
0x1777   :  { %5239 = vmatpush1.bf16.msra.mxu0 %v5238_v57  ;;  %5247 = vmatpush1.bf16.msra.mxu1 %v5246_v59  ;;  %v5280_v57 = vpack.c.bf16 %v2964_v56, %v2963_v15  ;;  %v2976_v15 = vld [vmem:[%s7622_s6 + $0x68] sm:$0xff] }
0x1778   :  { %4024 = vmatprep.subr.msk.mxu0 %vm1479_vm10, %v2244_v60  ;;  %4027 = vmatprep.subr.msk.mxu1 %vm1479_vm10, %v2246_v62  ;;  %v2965_v60 = vld [vmem:[%s7622_s6 + $0x10] sm:$0xff]  ;;  %v2966_v62 = vld [vmem:[%s7622_s6 + $0x18] sm:$0xff]  ;;  %v5304_v56 = vpack.c.bf16 %v2976_v15, %v2975_v53 }
0x1779   :  { %v5284_v63 = vpack.c.bf16 %v2966_v62, %v2965_v60  ;;  %v2993_v62 = vld [vmem:[%s7622_s6 + $0xf0] sm:$0xff] }
0x177b   :  { %4025 = vmatpush1.msk.msra.mxu0 %vm1479_vm10, %v2243_v6  ;;  %4028 = vmatpush1.msk.msra.mxu1 %vm1479_vm10, %v2245_v7  ;;  %v5286_v6 = vpack.c.bf16 %v2984_v3, %v2983_v1  ;;  %v2967_v7 = vld [vmem:[%s7622_s6 + $0x20] sm:$0xff]  ;;  %v2977_v3 = vld [vmem:[%s7622_s6 + $0x70] sm:$0xff] }
0x177c   :  { %4026 = vmatmul.mubr.msk.f32.vlgmr.msra.gmra.mrb[26].mxu0 %vm1475_vm11, %v6465_v46  ;;  %4029 = vmatmul.mubr.msk.f32.vlgmr.msra.gmra.mrb[24].mxu1 %vm1475_vm11, %v6465_v46  ;;  %v5288_v10 = vpack.c.bf16 %v2968_v8, %v2967_v7  ;;  %v3021_v7 = vld [vmem:[%s7622_s6 + $0x1d0] sm:$0xff] }
0x177d   :  { %5249 = vmatprep.subr.bf16.mxu0 %v5248_v20  ;;  %5257 = vmatprep.subr.bf16.mxu1 %v5256_v21  ;;  %v2986_v20 = vld [vmem:[%s7622_s6 + $0xb8] sm:$0xff]  ;;  %v2969_v21 = vld [vmem:[%s7622_s6 + $0x30] sm:$0xff]  ;;  %v5330_v12 = vpack.c.bf16 %v3022_v9, %v3021_v7  ;;  %v3059_v9 = vld [vmem:[%s7622_s6 + $0x300] sm:$0xff] }
0x177e   :  { %5251 = vmatpush1.bf16.msra.mxu0 %v5250_v22  ;;  %5259 = vmatpush1.bf16.msra.mxu1 %v5258_v23  ;;  %v5290_v22 = vpack.c.bf16 %v2986_v20, %v2985_v19  ;;  %v2970_v23 = vld [vmem:[%s7622_s6 + $0x38] sm:$0xff]  ;;  %v3023_v20 = vld [vmem:[%s7622_s6 + $0x1e0] sm:$0xff] }
0x177f   :  { %5253 = vmatprep.subr.bf16.mxu0 %v5252_v26  ;;  %5261 = vmatprep.subr.bf16.mxu1 %v5260_v27  ;;  %v3014_v26 = vld [vmem:[%s7622_s6 + $0x198] sm:$0xff]  ;;  %v5292_v27 = vpack.c.bf16 %v2970_v23, %v2969_v21  ;;  %v3024_v21 = vld [vmem:[%s7622_s6 + $0x1e8] sm:$0xff] }
0x1780   :  { %2727 = vmatprep.mubr.f32.mxu0 %v5658_v2  ;;  %2798 = vmatprep.mubr.f32.mxu1 %v5658_v2  ;;  %v5314_v28 = vpack.c.bf16 %v3014_v26, %v3013_v25  ;;  %v5334_v23 = vpack.c.bf16 %v3024_v21, %v3023_v20  ;;  %v3008_v25 = vld [vmem:[%s7622_s6 + $0x168] sm:$0xff]  ;;  %v3050_v7 = vld [vmem:[%s7622_s6 + $0x2b8] sm:$0xff] }
0x1782   :  { %5255 = vmatpush1.bf16.msra.mxu0 %v5254_v49  ;;  %5263 = vmatpush1.bf16.msra.mxu1 %v5262_v52  ;;  %v2987_v49 = vld [vmem:[%s7622_s6 + $0xc0] sm:$0xff]  ;;  %v5316_v52 = vpack.c.bf16 %v2998_v30, %v2997_v29  ;;  %v3009_v30 = vld [vmem:[%s7622_s6 + $0x170] sm:$0xff] }
0x1783   :  { %4030 = vmatprep.subr.msk.mxu0 %vm1479_vm10, %v2248_v55  ;;  %4033 = vmatprep.subr.msk.mxu1 %vm1479_vm10, %v2250_v31  ;;  %v2988_v55 = vld [vmem:[%s7622_s6 + $0xc8] sm:$0xff]  ;;  %v2971_v31 = vld [vmem:[%s7622_s6 + $0x40] sm:$0xff] }
0x1784   :  { %v5294_v32 = vpack.c.bf16 %v2988_v55, %v2987_v49  ;;  %v3010_v49 = vld [vmem:[%s7622_s6 + $0x178] sm:$0xff]  ;;  %v3075_v55 = vld [vmem:[%s7622_s6 + $0x380] sm:$0xff] }
0x1786   :  { %4031 = vmatpush1.msk.msra.mxu0 %vm1479_vm10, %v2247_v58  ;;  %4034 = vmatpush1.msk.msra.mxu1 %vm1479_vm10, %v2249_v34  ;;  %v2972_v58 = vld [vmem:[%s7622_s6 + $0x48] sm:$0xff] }
0x1787   :  { %4032 = vmatmul.mubr.msk.f32.vlgmr.msra.gmra.mrb[28].mxu0 %vm1475_vm11, %v6465_v46  ;;  %4035 = vmatmul.mubr.msk.f32.vlgmr.msra.gmra.mrb[26].mxu1 %vm1475_vm11, %v6465_v46  ;;  %v5296_v61 = vpack.c.bf16 %v2972_v58, %v2971_v31  ;;  %v3000_v34 = vld [vmem:[%s7622_s6 + $0x128] sm:$0xff] }
0x1788   :  { %5265 = vmatprep.subr.bf16.mxu0 %v5264_v24  ;;  %5272 = vmatprep.subr.bf16.mxu1 %v5660_v5  ;;  %v5320_v35 = vpack.c.bf16 %v3000_v34, %v2999_v0  ;;  %v2990_v24 = vld [vmem:[%s7622_s6 + $0xd8] sm:$0xff]  ;;  %v3076_v31 = vld [vmem:[%s7622_s6 + $0x388] sm:$0xff] }
0x1789   :  { %5267 = vmatpush1.bf16.msra.mxu0 %v5266_v36  ;;  %5274 = vmatpush3.bf16.msra.mxu1 %v5273_v37  ;;  %v2973_v36 = vld [vmem:[%s7622_s6 + $0x50] sm:$0xff]  ;;  %v2974_v37 = vld [vmem:[%s7622_s6 + $0x58] sm:$0xff]  ;;  %v5298_v38 = vpack.c.bf16 %v2990_v24, %v2989_v4  ;;  %v5374_v58 = vpack.c.bf16 %v3076_v31, %v3075_v55 }
0x178a   :  { %5269 = vmatprep.subr.bf16.mxu0 %v5268_v39  ;;  %5275 = vmatprep.subr.bf16.mxu1 %v5660_v5  ;;  %v5300_v39 = vpack.c.bf16 %v2974_v37, %v2973_v36  ;;  %v3061_v55 = vld [vmem:[%s7622_s6 + $0x310] sm:$0xff]  ;;  %v3062_v31 = vld [vmem:[%s7622_s6 + $0x318] sm:$0xff] }
0x178b   :  { %2869 = vmatprep.mubr.f32.mxu0 %v5658_v2  ;;  %4875 = vmatprep.mubr.msk.f32.mxu1 %vm5659_vm0, %v5658_v2 }
0x178d   :  { %5271 = vmatpush1.bf16.msra.mxu0 %v5270_v44  ;;  %5277 = vmatpush3.bf16.msra.mxu1 %v5276_v45  ;;  %v5322_v44 = vpack.c.bf16 %v3018_v41, %v3017_v40  ;;  %v3002_v45 = vld [vmem:[%s7622_s6 + $0x138] sm:$0xff] }
0x178e   :  { %4036 = vmatprep.subr.msk.mxu0 %vm1479_vm10, %v2252_v47  ;;  %4873 = vmatprep.subr.mxu1 %v5658_v2  ;;  %v2991_v47 = vld [vmem:[%s7622_s6 + $0xe0] sm:$0xff] }
0x1791   :  { %4037 = vmatpush1.msk.msra.mxu0 %vm1479_vm10, %v2251_v48  ;;  %4874 = vmatpush3.msk.msra.mxu1 %vm1479_vm10, %v2253_v50  ;;  %v2992_v48 = vld [vmem:[%s7622_s6 + $0xe8] sm:$0xff]  ;;  %v5324_v50 = vpack.c.bf16 %v3002_v45, %v3001_v43  ;;  %v3027_v43 = vld [vmem:[%s7622_s6 + $0x200] sm:$0xff] }
0x1792   :  { %4038 = vmatmul.mubr.msk.f32.vlgmr.msra.gmra.mrb[30].mxu0 %vm1475_vm11, %v6465_v46  ;;  %4876 = vmatmul.mubr.msk.f32.vlgmr.msra.gmra.mrb[28].mxu1 %vm1475_vm11, %v6465_v46  ;;  %v2981_v46 = vld [vmem:[%s7622_s6 + $0x90] sm:$0xff]  ;;  %v5302_v51 = vpack.c.bf16 %v2992_v48, %v2991_v47 }
0x1793   :  { %v5282_v59 = vpack.c.bf16 %v2982_v17, %v2981_v46  ;;  %5279 = vmatprep.subr.bf16.mxu0 %v5278_v54  ;;  %5311 = vmatprep.subr.bf16.mxu1 %v5310_v16  ;;  %v3019_v54 = vld [vmem:[%s7622_s6 + $0x1c0] sm:$0xff]  ;;  %v3020_v46 = vld [vmem:[%s7622_s6 + $0x1c8] sm:$0xff]  ;;  %v3045_v48 = vld [vmem:[%s7622_s6 + $0x290] sm:$0xff] }
0x1794   :  { %5281 = vmatpush3.bf16.msra.mxu0 %v5280_v57  ;;  %5313 = vmatpush3.bf16.msra.mxu1 %v5312_v18  ;;  %v3003_v17 = vld [vmem:[%s7622_s6 + $0x140] sm:$0xff]  ;;  %v3004_v57 = vld [vmem:[%s7622_s6 + $0x148] sm:$0xff] }
0x1795   :  { %5283 = vmatprep.subr.bf16.mxu0 %v5282_v59  ;;  %5315 = vmatprep.subr.bf16.mxu1 %v5314_v28  ;;  %v5326_v59 = vpack.c.bf16 %v3020_v46, %v3019_v54  ;;  %v5328_v60 = vpack.c.bf16 %v3004_v57, %v3003_v17  ;;  %v3043_v16 = vld [vmem:[%s7622_s6 + $0x280] sm:$0xff]  ;;  %v3044_v18 = vld [vmem:[%s7622_s6 + $0x288] sm:$0xff]  ;;  %v3026_v28 = vld [vmem:[%s7622_s6 + $0x1f8] sm:$0xff] }
0x1796   :  { %v5342_v19 = vpack.c.bf16 %v3044_v18, %v3043_v16  ;;  %v3029_v17 = vld [vmem:[%s7622_s6 + $0x210] sm:$0xff]  ;;  %v3030_v57 = vld [vmem:[%s7622_s6 + $0x218] sm:$0xff] }
0x1797   :  { %v3034_v16 = vld [vmem:[%s7622_s6 + $0x238] sm:$0xff]  ;;  %v3077_v18 = vld [vmem:[%s7622_s6 + $0x390] sm:$0xff] }
0x1798   :  { %5285 = vmatpush3.bf16.msra.mxu0 %v5284_v63  ;;  %5317 = vmatpush3.bf16.msra.mxu1 %v5316_v52  ;;  %v2994_v63 = vld [vmem:[%s7622_s6 + $0xf8] sm:$0xff]  ;;  %v5340_v52 = vpack.c.bf16 %v3010_v49, %v3009_v30 }
0x1799   :  { %5287 = vmatprep.subr.bf16.mxu0 %v5286_v6  ;;  %5319 = vmatprep.subr.bf16.mxu1 %v5318_v42  ;;  %v5306_v1 = vpack.c.bf16 %v2994_v63, %v2993_v62  ;;  %v2978_v6 = vld [vmem:[%s7622_s6 + $0x78] sm:$0xff]  ;;  %v5348_v62 = vpack.c.bf16 %v3030_v57, %v3029_v17  ;;  %v3056_v17 = vld [vmem:[%s7622_s6 + $0x2e8] sm:$0xff] }
0x179a   :  { %v5308_v8 = vpack.c.bf16 %v2978_v6, %v2977_v3  ;;  %v3032_v3 = vld [vmem:[%s7622_s6 + $0x228] sm:$0xff]  ;;  %v3049_v6 = vld [vmem:[%s7622_s6 + $0x2b0] sm:$0xff] }
0x179c   :  { %5289 = vmatpush3.bf16.msra.mxu0 %v5288_v10  ;;  %5321 = vmatpush3.bf16.msra.mxu1 %v5320_v35  ;;  %v3005_v10 = vld [vmem:[%s7622_s6 + $0x150] sm:$0xff] }
0x179d   :  { %5291 = vmatprep.subr.bf16.mxu0 %v5290_v22  ;;  %5323 = vmatprep.subr.bf16.mxu1 %v5322_v44  ;;  %v5332_v14 = vpack.c.bf16 %v3006_v11, %v3005_v10  ;;  %v3007_v22 = vld [vmem:[%s7622_s6 + $0x160] sm:$0xff]  ;;  %v3028_v44 = vld [vmem:[%s7622_s6 + $0x208] sm:$0xff]  ;;  %v3033_v11 = vld [vmem:[%s7622_s6 + $0x230] sm:$0xff] }
0x179e   :  { %v5336_v26 = vpack.c.bf16 %v3008_v25, %v3007_v22  ;;  %v3060_v10 = vld [vmem:[%s7622_s6 + $0x308] sm:$0xff]  ;;  %v5354_v25 = vpack.c.bf16 %v3050_v7, %v3049_v6  ;;  %v5356_v49 = vpack.c.bf16 %v3034_v16, %v3033_v11 }
0x179f   :  { %v5376_v30 = vpack.c.bf16 %v3060_v10, %v3059_v9 }
0x17a0   :  { %5293 = vmatpush3.bf16.msra.mxu0 %v5292_v27  ;;  %5325 = vmatpush3.bf16.msra.mxu1 %v5324_v50  ;;  %v3025_v27 = vld [vmem:[%s7622_s6 + $0x1f0] sm:$0xff]  ;;  %v3046_v50 = vld [vmem:[%s7622_s6 + $0x298] sm:$0xff] }
0x17a1   :  { %5295 = vmatprep.subr.bf16.mxu0 %v5294_v32  ;;  %5327 = vmatprep.subr.bf16.mxu1 %v5326_v59  ;;  %v5338_v29 = vpack.c.bf16 %v3026_v28, %v3025_v27  ;;  %v5346_v46 = vpack.c.bf16 %v3046_v50, %v3045_v48  ;;  %v3047_v59 = vld [vmem:[%s7622_s6 + $0x2a0] sm:$0xff]  ;;  %v3052_v27 = vld [vmem:[%s7622_s6 + $0x2c8] sm:$0xff] }
0x17a2   :  { %v3063_v48 = vld [vmem:[%s7622_s6 + $0x320] sm:$0xff]  ;;  %v3064_v50 = vld [vmem:[%s7622_s6 + $0x328] sm:$0xff] }
0x17a3   :  { %v5384_v57 = vpack.c.bf16 %v3064_v50, %v3063_v48 }
0x17a4   :  { %5297 = vmatpush3.bf16.msra.mxu0 %v5296_v61  ;;  %5329 = vmatpush3.bf16.msra.mxu1 %v5328_v60  ;;  %v3048_v60 = vld [vmem:[%s7622_s6 + $0x2a8] sm:$0xff] }
0x17a5   :  { %5299 = vmatprep.subr.bf16.mxu0 %v5298_v38  ;;  %5331 = vmatprep.subr.bf16.mxu1 %v5330_v12  ;;  %v5350_v63 = vpack.c.bf16 %v3048_v60, %v3047_v59 }
0x17a8   :  { %5301 = vmatpush3.bf16.msra.mxu0 %v5300_v39  ;;  %5333 = vmatpush3.bf16.msra.mxu1 %v5332_v14 }
0x17a9   :  { %5303 = vmatprep.subr.bf16.mxu0 %v5302_v51  ;;  %5335 = vmatprep.subr.bf16.mxu1 %v5334_v23 }
0x17ac   :  { %5305 = vmatpush3.bf16.msra.mxu0 %v5304_v56  ;;  %5337 = vmatpush3.bf16.msra.mxu1 %v5336_v26  ;;  %v5344_v56 = vpack.c.bf16 %v3028_v44, %v3027_v43  ;;  %v3051_v26 = vld [vmem:[%s7622_s6 + $0x2c0] sm:$0xff]  ;;  %v5380_v43 = vpack.c.bf16 %v3062_v31, %v3061_v55 }
0x17ad   :  { %5307 = vmatprep.subr.bf16.mxu0 %v5306_v1  ;;  %5339 = vmatprep.subr.bf16.mxu1 %v5338_v29  ;;  %v3031_v1 = vld [vmem:[%s7622_s6 + $0x220] sm:$0xff] }
0x17b0   :  { %5309 = vmatpush3.bf16.msra.mxu0 %v5308_v8  ;;  %5341 = vmatpush3.bf16.msra.mxu1 %v5340_v52  ;;  %v5352_v8 = vpack.c.bf16 %v3032_v3, %v3031_v1  ;;  %v3066_v1 = vld [vmem:[%s7622_s6 + $0x338] sm:$0xff]  ;;  %v3039_v3 = vld [vmem:[%s7622_s6 + $0x260] sm:$0xff] }
0x17b1   :  { %5343 = vmatprep.subr.bf16.mxu0 %v5342_v19  ;;  %5375 = vmatprep.subr.bf16.mxu1 %v5374_v58  ;;  %v3078_v19 = vld [vmem:[%s7622_s6 + $0x398] sm:$0xff]  ;;  %v3035_v58 = vld [vmem:[%s7622_s6 + $0x240] sm:$0xff] }
0x17b2   :  { %v5378_v52 = vpack.c.bf16 %v3078_v19, %v3077_v18  ;;  %v3057_v18 = vld [vmem:[%s7622_s6 + $0x2f0] sm:$0xff]  ;;  %v3058_v19 = vld [vmem:[%s7622_s6 + $0x2f8] sm:$0xff] }
0x180e   :  { %v1597_v32 = vpop.f32.mrb[14].mxu0  ;;  %v1668_v61 = vpop.f32.mrb[12].mxu1 }
0x180f   :  { %v1599_v13 = vpop.f32.mrb[15].mxu0  ;;  %v1670_v33 = vpop.f32.mrb[13].mxu1 }
0x1818   :  { %v1739_v42 = vpop.f32.mrb[16].mxu0  ;;  %v6906_v0 = vpop.f32.mrb[14].mxu1 }
0x1819   :  { %v1741_v34 = vpop.f32.mrb[17].mxu0  ;;  %v6908_v4 = vpop.f32.mrb[15].mxu1 }
0x1823   :  { %v6910_v35 = vpop.f32.mrb[18].mxu0  ;;  %v6912_v24 = vpop.f32.mrb[16].mxu1 }
0x1824   :  { %v6914_v36 = vpop.f32.mrb[19].mxu0  ;;  %v6916_v37 = vpop.f32.mrb[17].mxu1 }
0x182e   :  { %v6918_v38 = vpop.f32.mrb[20].mxu0  ;;  %v6920_v39 = vpop.f32.mrb[18].mxu1 }
0x182f   :  { %v6922_v40 = vpop.f32.mrb[21].mxu0  ;;  %v6924_v41 = vpop.f32.mrb[19].mxu1 }
0x1839   :  { %v6932_v45 = vpop.f32.mrb[22].mxu0  ;;  %v2374_v47 = vpop.f32.mrb[20].mxu1 }
0x183a   :  { %v2946_v51 = vmul.f32 %v2374_v47, %v1597_v32  ;;  %v4864_v53 = vpop.f32.mrb[23].mxu0  ;;  %v2376_v15 = vpop.f32.mrb[21].mxu1  ;;  %v5358_v32 = vpack.c.bf16 %v3052_v27, %v3051_v26  ;;  %v5370_v26 = vpack.c.bf16 %v3058_v19, %v3057_v18  ;;  %v3042_v27 = vld [vmem:[%s7622_s6 + $0x278] sm:$0xff] }
0x183b   :  { %v2947_v54 = vmul.f32 %v2376_v15, %v1599_v13  ;;  %v3079_v13 = vld [vmem:[%s7622_s6 + $0x3a0] sm:$0xff]  ;;  %v3037_v53 = vld [vmem:[%s7622_s6 + $0x250] sm:$0xff]  ;;  %v3038_v15 = vld [vmem:[%s7622_s6 + $0x258] sm:$0xff] }
0x183c   :  { %v3114_v18 = vld [vmem:[%s7622_s6 + $0x4b8] sm:$0xff] }
0x183d   :  { %3300 = vmatprep.mubr.f32.mxu0 %v2947_v54  ;;  %v3081_v54 = vld [vmem:[%s7622_s6 + $0x3b0] sm:$0xff] }
0x183e   :  { %3301 = vmatmul.mubr.f32.vlgmr.msra.gmra.mrb[32].mxu0 %v2946_v51 }
0x183f   :  { %5345 = vmatpush3.bf16.msra.mxu0 %v5344_v56  ;;  %v3082_v56 = vld [vmem:[%s7622_s6 + $0x3b8] sm:$0xff] }
0x1840   :  { %5347 = vmatprep.subr.bf16.mxu0 %v5346_v46  ;;  %v3055_v46 = vld [vmem:[%s7622_s6 + $0x2e0] sm:$0xff]  ;;  %v5386_v10 = vpack.c.bf16 %v3082_v56, %v3081_v54 }
0x1841   :  { %v5366_v11 = vpack.c.bf16 %v3056_v17, %v3055_v46  ;;  %v3071_v46 = vld [vmem:[%s7622_s6 + $0x360] sm:$0xff]  ;;  %v3072_v17 = vld [vmem:[%s7622_s6 + $0x368] sm:$0xff] }
0x1843   :  { %5349 = vmatpush3.bf16.msra.mxu0 %v5348_v62  ;;  %v5364_v62 = vpack.c.bf16 %v3038_v15, %v3037_v53 }
0x1844   :  { %v2445_v12 = vpop.f32.mrb[24].mxu0  ;;  %v2516_v14 = vpop.f32.mrb[22].mxu1  ;;  %5351 = vmatprep.subr.bf16.mxu0 %v5350_v63  ;;  %v3065_v63 = vld [vmem:[%s7622_s6 + $0x330] sm:$0xff] }
0x1845   :  { %v2948_v20 = vmul.f32 %v2445_v12, %v1668_v61  ;;  %v6982_v21 = vmul.f32 %v2516_v14, %v1739_v42  ;;  %v2447_v22 = vpop.f32.mrb[25].mxu0  ;;  %v2518_v23 = vpop.f32.mrb[23].mxu1  ;;  %v3036_v61 = vld [vmem:[%s7622_s6 + $0x248] sm:$0xff]  ;;  %v3053_v42 = vld [vmem:[%s7622_s6 + $0x2d0] sm:$0xff]  ;;  %v3083_v14 = vld [vmem:[%s7622_s6 + $0x3c0] sm:$0xff] }
0x1846   :  { %v2949_v28 = vmul.f32 %v2447_v22, %v1670_v33  ;;  %v2951_v29 = vmul.f32 %v2518_v23, %v1741_v34  ;;  %v3080_v33 = vld [vmem:[%s7622_s6 + $0x3a8] sm:$0xff]  ;;  %v3054_v34 = vld [vmem:[%s7622_s6 + $0x2d8] sm:$0xff]  ;;  %v5360_v44 = vpack.c.bf16 %v3036_v61, %v3035_v58  ;;  %v3069_v58 = vld [vmem:[%s7622_s6 + $0x350] sm:$0xff] }
0x1847   :  { %5353 = vmatpush3.bf16.msra.mxu0 %v5352_v8  ;;  %v5382_v47 = vpack.c.bf16 %v3080_v33, %v3079_v13  ;;  %v5362_v51 = vpack.c.bf16 %v3054_v34, %v3053_v42  ;;  %v3040_v12 = vld [vmem:[%s7622_s6 + $0x268] sm:$0xff]  ;;  %v3091_v13 = vld [vmem:[%s7622_s6 + $0x400] sm:$0xff] }
0x1848   :  { %3370 = vmatprep.mubr.f32.mxu1 %v2949_v28  ;;  %3440 = vmatprep.mubr.f32.mxu0 %v2951_v29  ;;  %v5368_v22 = vpack.c.bf16 %v3040_v12, %v3039_v3  ;;  %v3085_v28 = vld [vmem:[%s7622_s6 + $0x3d0] sm:$0xff]  ;;  %v3086_v29 = vld [vmem:[%s7622_s6 + $0x3d8] sm:$0xff]  ;;  %v3092_v33 = vld [vmem:[%s7622_s6 + $0x408] sm:$0xff]  ;;  %v5400_v3 = vpack.c.bf16 %v3072_v17, %v3071_v46 }
0x1849   :  { %3371 = vmatmul.mubr.f32.vlgmr.msra.gmra.mrb[30].mxu1 %v2948_v20  ;;  %5355 = vmatprep.subr.bf16.mxu0 %v5354_v25  ;;  %v5388_v20 = vpack.c.bf16 %v3066_v1, %v3065_v63  ;;  %v3041_v25 = vld [vmem:[%s7622_s6 + $0x270] sm:$0xff]  ;;  %v5394_v31 = vpack.c.bf16 %v3086_v29, %v3085_v28  ;;  %v3087_v42 = vld [vmem:[%s7622_s6 + $0x3e0] sm:$0xff]  ;;  %v3088_v34 = vld [vmem:[%s7622_s6 + $0x3e8] sm:$0xff]  ;;  %v5408_v56 = vpack.c.bf16 %v3092_v33, %v3091_v13 }
0x184a   :  { %5377 = vmatpush3.bf16.msra.mxu1 %v5376_v30  ;;  %v3107_v30 = vld [vmem:[%s7622_s6 + $0x480] sm:$0xff]  ;;  %v5372_v55 = vpack.c.bf16 %v3042_v27, %v3041_v25  ;;  %v3089_v63 = vld [vmem:[%s7622_s6 + $0x3f0] sm:$0xff]  ;;  %v3090_v1 = vld [vmem:[%s7622_s6 + $0x3f8] sm:$0xff] }
0x184b   :  { %5357 = vmatpush3.bf16.msra.mxu0 %v5356_v49  ;;  %5379 = vmatprep.subr.bf16.mxu1 %v5378_v52  ;;  %v3108_v49 = vld [vmem:[%s7622_s6 + $0x488] sm:$0xff]  ;;  %v3095_v12 = vld [vmem:[%s7622_s6 + $0x420] sm:$0xff]  ;;  %v3141_v27 = vld [vmem:[%s7622_s6 + $0x590] sm:$0xff] }
0x184c   :  { %5359 = vmatprep.subr.bf16.mxu0 %v5358_v32  ;;  %v3070_v32 = vld [vmem:[%s7622_s6 + $0x358] sm:$0xff]  ;;  %v5406_v61 = vpack.c.bf16 %v3108_v49, %v3107_v30  ;;  %v3115_v49 = vld [vmem:[%s7622_s6 + $0x4c0] sm:$0xff]  ;;  %v3128_v46 = vld [vmem:[%s7622_s6 + $0x528] sm:$0xff] }
0x184d   :  { %v5396_v50 = vpack.c.bf16 %v3070_v32, %v3069_v58  ;;  %v3142_v28 = vld [vmem:[%s7622_s6 + $0x598] sm:$0xff]  ;;  %v3101_v17 = vld [vmem:[%s7622_s6 + $0x450] sm:$0xff] }
0x184e   :  { %5381 = vmatpush3.bf16.msra.mxu1 %v5380_v43  ;;  %v3109_v43 = vld [vmem:[%s7622_s6 + $0x490] sm:$0xff] }
0x184f   :  { %v2587_v59 = vpop.f32.mrb[26].mxu0  ;;  %v2658_v60 = vpop.f32.mrb[24].mxu1  ;;  %5361 = vmatpush3.bf16.msra.mxu0 %v5360_v44  ;;  %5383 = vmatprep.subr.bf16.mxu1 %v5382_v47  ;;  %v3110_v44 = vld [vmem:[%s7622_s6 + $0x498] sm:$0xff] }
0x1850   :  { %v7048_v6 = vmul.f32 %v2587_v59, %v6906_v0  ;;  %v7051_v7 = vmul.f32 %v2658_v60, %v6910_v35  ;;  %v2589_v8 = vpop.f32.mrb[27].mxu0  ;;  %v2660_v9 = vpop.f32.mrb[25].mxu1  ;;  %5363 = vmatprep.subr.bf16.mxu0 %v5362_v51  ;;  %v3084_v0 = vld [vmem:[%s7622_s6 + $0x3c8] sm:$0xff]  ;;  %v5398_v59 = vpack.c.bf16 %v3088_v34, %v3087_v42  ;;  %v5410_v60 = vpack.c.bf16 %v3110_v44, %v3109_v43  ;;  %v3125_v34 = vld [vmem:[%s7622_s6 + $0x510] sm:$0xff]  ;;  %v3143_v44 = vld [vmem:[%s7622_s6 + $0x5a0] sm:$0xff] }
0x1851   :  { %v2953_v35 = vmul.f32 %v2589_v8, %v6908_v4  ;;  %v7064_v16 = vmul.f32 %v2660_v9, %v6914_v36  ;;  %v5390_v23 = vpack.c.bf16 %v3084_v0, %v3083_v14  ;;  %v3067_v4 = vld [vmem:[%s7622_s6 + $0x340] sm:$0xff]  ;;  %v3068_v36 = vld [vmem:[%s7622_s6 + $0x348] sm:$0xff]  ;;  %v5402_v9 = vpack.c.bf16 %v3090_v1, %v3089_v63 }
0x1852   :  { %5385 = vmatpush3.bf16.msra.mxu1 %v5384_v57  ;;  %v5392_v52 = vpack.c.bf16 %v3068_v36, %v3067_v4  ;;  %v3096_v14 = vld [vmem:[%s7622_s6 + $0x428] sm:$0xff]  ;;  %v3139_v0 = vld [vmem:[%s7622_s6 + $0x580] sm:$0xff]  ;;  %v3097_v36 = vld [vmem:[%s7622_s6 + $0x430] sm:$0xff]  ;;  %v5442_v42 = vpack.c.bf16 %v3142_v28, %v3141_v27 }
0x1853   :  { %3510 = vmatprep.mubr.f32.mxu1 %v2953_v35  ;;  %5365 = vmatpush3.bf16.msra.mxu0 %v5364_v62  ;;  %v3094_v62 = vld [vmem:[%s7622_s6 + $0x418] sm:$0xff]  ;;  %v3140_v35 = vld [vmem:[%s7622_s6 + $0x588] sm:$0xff] }
0x1854   :  { %5387 = vmatprep.subr.bf16.mxu1 %v5386_v10  ;;  %5367 = vmatprep.subr.bf16.mxu0 %v5366_v11  ;;  %v3073_v10 = vld [vmem:[%s7622_s6 + $0x370] sm:$0xff]  ;;  %v3074_v11 = vld [vmem:[%s7622_s6 + $0x378] sm:$0xff]  ;;  %v3124_v4 = vld [vmem:[%s7622_s6 + $0x508] sm:$0xff] }
0x1855   :  { %v5404_v19 = vpack.c.bf16 %v3074_v11, %v3073_v10  ;;  %v3120_v63 = vld [vmem:[%s7622_s6 + $0x4e8] sm:$0xff] }
0x1856   :  { %5389 = vmatpush3.bf16.msra.mxu1 %v5388_v20  ;;  %v5416_v20 = vpack.c.bf16 %v3096_v14, %v3095_v12  ;;  %v3104_v11 = vld [vmem:[%s7622_s6 + $0x468] sm:$0xff]  ;;  %v3147_v12 = vld [vmem:[%s7622_s6 + $0x5c0] sm:$0xff]  ;;  %v3121_v14 = vld [vmem:[%s7622_s6 + $0x4f0] sm:$0xff] }
0x1857   :  { %5369 = vmatpush3.bf16.msra.mxu0 %v5368_v22  ;;  %5391 = vmatprep.subr.bf16.mxu1 %v5390_v23  ;;  %v5438_v22 = vpack.c.bf16 %v3140_v35, %v3139_v0  ;;  %v3123_v23 = vld [vmem:[%s7622_s6 + $0x500] sm:$0xff]  ;;  %v3122_v0 = vld [vmem:[%s7622_s6 + $0x4f8] sm:$0xff]  ;;  %v3172_v27 = vld [vmem:[%s7622_s6 + $0x688] sm:$0xff] }
0x1858   :  { %5371 = vmatprep.subr.bf16.mxu0 %v5370_v26  ;;  %v3098_v26 = vld [vmem:[%s7622_s6 + $0x438] sm:$0xff] }
0x1859   :  { %v5420_v33 = vpack.c.bf16 %v3098_v26, %v3097_v36  ;;  %v3149_v36 = vld [vmem:[%s7622_s6 + $0x5d0] sm:$0xff]  ;;  %v3171_v26 = vld [vmem:[%s7622_s6 + $0x680] sm:$0xff] }
0x185a   :  { %v2729_v47 = vpop.f32.mrb[28].mxu0  ;;  %v2800_v48 = vpop.f32.mrb[26].mxu1  ;;  %5393 = vmatpush3.bf16.msra.mxu1 %v5392_v52  ;;  %v3116_v52 = vld [vmem:[%s7622_s6 + $0x4c8] sm:$0xff] }
0x185b   :  { %v7121_v51 = vmul.f32 %v2729_v47, %v6912_v24  ;;  %v7124_v53 = vmul.f32 %v2800_v48, %v6918_v38  ;;  %v2731_v15 = vpop.f32.mrb[29].mxu0  ;;  %v2802_v54 = vpop.f32.mrb[27].mxu1  ;;  %5373 = vmatpush3.bf16.msra.mxu0 %v5372_v55  ;;  %5395 = vmatprep.subr.bf16.mxu1 %v5394_v31  ;;  %v3093_v24 = vld [vmem:[%s7622_s6 + $0x410] sm:$0xff]  ;;  %v5422_v43 = vpack.c.bf16 %v3116_v52, %v3115_v49  ;;  %v3144_v47 = vld [vmem:[%s7622_s6 + $0x5a8] sm:$0xff]  ;;  %v3134_v52 = vld [vmem:[%s7622_s6 + $0x558] sm:$0xff] }
0x185c   :  { %v7136_v38 = vmul.f32 %v2731_v15, %v6916_v37  ;;  %v7139_v57 = vmul.f32 %v2802_v54, %v6922_v40  ;;  %5407 = vmatprep.subr.bf16.mxu0 %v5406_v61  ;;  %v3111_v37 = vld [vmem:[%s7622_s6 + $0x4a0] sm:$0xff]  ;;  %v3112_v40 = vld [vmem:[%s7622_s6 + $0x4a8] sm:$0xff]  ;;  %v5412_v8 = vpack.c.bf16 %v3094_v62, %v3093_v24  ;;  %v5440_v61 = vpack.c.bf16 %v3124_v4, %v3123_v23  ;;  %v3117_v48 = vld [vmem:[%s7622_s6 + $0x4d0] sm:$0xff] }
0x185d   :  { %v3119_v62 = vld [vmem:[%s7622_s6 + $0x4e0] sm:$0xff]  ;;  %v5434_v23 = vpack.c.bf16 %v3122_v0, %v3121_v14  ;;  %v3106_v4 = vld [vmem:[%s7622_s6 + $0x478] sm:$0xff]  ;;  %v3133_v49 = vld [vmem:[%s7622_s6 + $0x550] sm:$0xff] }
0x185e   :  { %5397 = vmatpush3.bf16.msra.mxu1 %v5396_v50  ;;  %3441 = vmatmul.mubr.f32.vlgmr.msra.gmra.mrb[34].mxu0 %v6982_v21  ;;  %v5414_v21 = vpack.c.bf16 %v3112_v40, %v3111_v37  ;;  %v3118_v50 = vld [vmem:[%s7622_s6 + $0x4d8] sm:$0xff]  ;;  %v5430_v10 = vpack.c.bf16 %v3120_v63, %v3119_v62  ;;  %v3159_v62 = vld [vmem:[%s7622_s6 + $0x620] sm:$0xff]  ;;  %v3205_v0 = vld [vmem:[%s7622_s6 + $0x790] sm:$0xff] }
0x185f   :  { %5409 = vmatpush3.bf16.msra.mxu0 %v5408_v56  ;;  %3580 = vmatprep.mubr.f32.mxu0 %v7064_v16  ;;  %v3113_v16 = vld [vmem:[%s7622_s6 + $0x4b0] sm:$0xff]  ;;  %v5446_v56 = vpack.c.bf16 %v3144_v47, %v3143_v44  ;;  %v5426_v24 = vpack.c.bf16 %v3118_v50, %v3117_v48  ;;  %v3136_v44 = vld [vmem:[%s7622_s6 + $0x568] sm:$0xff]  ;;  %v3203_v63 = vld [vmem:[%s7622_s6 + $0x780] sm:$0xff] }
0x1860   :  { %5399 = vmatprep.subr.bf16.mxu1 %v5398_v59  ;;  %5411 = vmatprep.subr.bf16.mxu0 %v5410_v60  ;;  %v5418_v25 = vpack.c.bf16 %v3114_v18, %v3113_v16  ;;  %v3145_v59 = vld [vmem:[%s7622_s6 + $0x5b0] sm:$0xff]  ;;  %v3146_v60 = vld [vmem:[%s7622_s6 + $0x5b8] sm:$0xff] }
0x1861   :  { %v5450_v40 = vpack.c.bf16 %v3146_v60, %v3145_v59  ;;  %v3157_v47 = vld [vmem:[%s7622_s6 + $0x610] sm:$0xff]  ;;  %v3138_v60 = vld [vmem:[%s7622_s6 + $0x578] sm:$0xff] }
0x1862   :  { %5401 = vmatpush3.bf16.msra.mxu1 %v5400_v3  ;;  %v3129_v3 = vld [vmem:[%s7622_s6 + $0x530] sm:$0xff]  ;;  %v3162_v14 = vld [vmem:[%s7622_s6 + $0x638] sm:$0xff] }
0x1863   :  { %5413 = vmatpush3.bf16.msra.mxu0 %v5412_v8  ;;  %5403 = vmatprep.subr.bf16.mxu1 %v5402_v9  ;;  %v3130_v8 = vld [vmem:[%s7622_s6 + $0x538] sm:$0xff]  ;;  %v3103_v9 = vld [vmem:[%s7622_s6 + $0x460] sm:$0xff]  ;;  %v3137_v59 = vld [vmem:[%s7622_s6 + $0x570] sm:$0xff] }
0x1864   :  { %5415 = vmatprep.subr.bf16.mxu0 %v5414_v21  ;;  %v3148_v21 = vld [vmem:[%s7622_s6 + $0x5c8] sm:$0xff]  ;;  %v5452_v35 = vpack.c.bf16 %v3130_v8, %v3129_v3  ;;  %v5432_v16 = vpack.c.bf16 %v3104_v11, %v3103_v9  ;;  %v5468_v3 = vpack.c.bf16 %v3138_v60, %v3137_v59  ;;  %v3195_v60 = vld [vmem:[%s7622_s6 + $0x740] sm:$0xff] }
0x1865   :  { %v2871_v29 = vpop.f32.mrb[30].mxu0  ;;  %v2942_v30 = vpop.f32.mrb[28].mxu1  ;;  %v5454_v18 = vpack.c.bf16 %v3148_v21, %v3147_v12  ;;  %v3188_v11 = vld [vmem:[%s7622_s6 + $0x708] sm:$0xff]  ;;  %v3161_v12 = vld [vmem:[%s7622_s6 + $0x630] sm:$0xff] }
0x1866   :  { %v7207_v55 = vmul.f32 %v2871_v29, %v6920_v39  ;;  %v7210_v31 = vmul.f32 %v2942_v30, %v6932_v45  ;;  %v2873_v58 = vpop.f32.mrb[31].mxu0  ;;  %v4877_v32 = vpop.f32.mrb[29].mxu1  ;;  %5405 = vmatpush3.bf16.msra.mxu1 %v5404_v19  ;;  %v3126_v39 = vld [vmem:[%s7622_s6 + $0x518] sm:$0xff]  ;;  %v3099_v45 = vld [vmem:[%s7622_s6 + $0x440] sm:$0xff] }
0x1867   :  { %v7213_v13 = vmul.f32 %v2873_v58, %v6924_v41  ;;  %5417 = vmatpush3.bf16.msra.mxu0 %v5416_v20  ;;  %5439 = vmatprep.subr.bf16.mxu1 %v5438_v22  ;;  %v3100_v41 = vld [vmem:[%s7622_s6 + $0x448] sm:$0xff]  ;;  %v5444_v15 = vpack.c.bf16 %v3126_v39, %v3125_v34  ;;  %v3131_v19 = vld [vmem:[%s7622_s6 + $0x540] sm:$0xff]  ;;  %v3105_v22 = vld [vmem:[%s7622_s6 + $0x470] sm:$0xff]  ;;  %v5470_v58 = vpack.c.bf16 %v3172_v27, %v3171_v26 }
0x1868   :  { %5419 = vmatprep.subr.bf16.mxu0 %v5418_v25  ;;  %v5424_v54 = vpack.c.bf16 %v3100_v41, %v3099_v45  ;;  %v3132_v20 = vld [vmem:[%s7622_s6 + $0x548] sm:$0xff]  ;;  %v3150_v25 = vld [vmem:[%s7622_s6 + $0x5d8] sm:$0xff]  ;;  %v5436_v29 = vpack.c.bf16 %v3106_v4, %v3105_v22  ;;  %v3155_v32 = vld [vmem:[%s7622_s6 + $0x600] sm:$0xff]  ;;  %v5460_v45 = vpack.c.bf16 %v3134_v52, %v3133_v49 }
0x1869   :  { %3511 = vmatmul.mubr.f32.vlgmr.msra.gmra.mrb[32].mxu1 %v7048_v6  ;;  %v3127_v6 = vld [vmem:[%s7622_s6 + $0x520] sm:$0xff]  ;;  %v5456_v28 = vpack.c.bf16 %v3132_v20, %v3131_v19  ;;  %v5458_v30 = vpack.c.bf16 %v3150_v25, %v3149_v36  ;;  %v3173_v34 = vld [vmem:[%s7622_s6 + $0x690] sm:$0xff]  ;;  %v3174_v39 = vld [vmem:[%s7622_s6 + $0x698] sm:$0xff]  ;;  %v5484_v20 = vpack.c.bf16 %v3162_v14, %v3161_v12 }
0x186a   :  { %5441 = vmatpush3.bf16.msra.mxu1 %v5440_v61  ;;  %3650 = vmatprep.mubr.f32.mxu1 %v7136_v38  ;;  %v3102_v38 = vld [vmem:[%s7622_s6 + $0x458] sm:$0xff]  ;;  %v5448_v1 = vpack.c.bf16 %v3128_v46, %v3127_v6  ;;  %v3156_v61 = vld [vmem:[%s7622_s6 + $0x608] sm:$0xff]  ;;  %v3135_v41 = vld [vmem:[%s7622_s6 + $0x560] sm:$0xff]  ;;  %v5474_v50 = vpack.c.bf16 %v3174_v39, %v3173_v34 }
0x186b   :  { %5421 = vmatpush3.bf16.msra.mxu0 %v5420_v33  ;;  %5443 = vmatprep.subr.bf16.mxu1 %v5442_v42  ;;  %v5428_v37 = vpack.c.bf16 %v3102_v38, %v3101_v17  ;;  %v3151_v33 = vld [vmem:[%s7622_s6 + $0x5e0] sm:$0xff]  ;;  %v3152_v42 = vld [vmem:[%s7622_s6 + $0x5e8] sm:$0xff]  ;;  %v5464_v17 = vpack.c.bf16 %v3136_v44, %v3135_v41  ;;  %v3190_v4 = vld [vmem:[%s7622_s6 + $0x718] sm:$0xff] }
0x186c   :  { %5423 = vmatprep.subr.bf16.mxu0 %v5422_v43  ;;  %v5472_v43 = vpack.c.bf16 %v3156_v61, %v3155_v32  ;;  %v5462_v48 = vpack.c.bf16 %v3152_v42, %v3151_v33  ;;  %v3175_v6 = vld [vmem:[%s7622_s6 + $0x6a0] sm:$0xff]  ;;  %v3176_v46 = vld [vmem:[%s7622_s6 + $0x6a8] sm:$0xff]  ;;  %v3165_v61 = vld [vmem:[%s7622_s6 + $0x650] sm:$0xff] }
0x186d   :  { %v3163_v36 = vld [vmem:[%s7622_s6 + $0x640] sm:$0xff]  ;;  %v3164_v26 = vld [vmem:[%s7622_s6 + $0x648] sm:$0xff]  ;;  %v3209_v42 = vld [vmem:[%s7622_s6 + $0x7b0] sm:$0xff] }
0x186e   :  { %5445 = vmatpush3.bf16.msra.mxu1 %v5444_v15  ;;  %v3158_v15 = vld [vmem:[%s7622_s6 + $0x618] sm:$0xff]  ;;  %v3207_v27 = vld [vmem:[%s7622_s6 + $0x7a0] sm:$0xff]  ;;  %v5488_v52 = vpack.c.bf16 %v3164_v26, %v3163_v36  ;;  %v3192_v32 = vld [vmem:[%s7622_s6 + $0x728] sm:$0xff] }
0x186f   :  { %5425 = vmatpush3.bf16.msra.mxu0 %v5424_v54  ;;  %5447 = vmatprep.subr.bf16.mxu1 %v5446_v56  ;;  %v3153_v54 = vld [vmem:[%s7622_s6 + $0x5f0] sm:$0xff]  ;;  %v3154_v56 = vld [vmem:[%s7622_s6 + $0x5f8] sm:$0xff]  ;;  %v3183_v39 = vld [vmem:[%s7622_s6 + $0x6e0] sm:$0xff] }
0x1870   :  { %5427 = vmatprep.subr.bf16.mxu0 %v5426_v24  ;;  %v5476_v24 = vpack.c.bf16 %v3158_v15, %v3157_v47  ;;  %v5466_v38 = vpack.c.bf16 %v3154_v56, %v3153_v54  ;;  %v3210_v34 = vld [vmem:[%s7622_s6 + $0x7b8] sm:$0xff]  ;;  %v3193_v47 = vld [vmem:[%s7622_s6 + $0x730] sm:$0xff]  ;;  %v3168_v54 = vld [vmem:[%s7622_s6 + $0x668] sm:$0xff] }
0x1871   :  { %v5514_v44 = vpack.c.bf16 %v3210_v34, %v3209_v42  ;;  %v3211_v56 = vld [vmem:[%s7622_s6 + $0x7c0] sm:$0xff]  ;;  %v3220_v12 = vld [vmem:[%s7622_s6 + $0x808] sm:$0xff] }
0x1872   :  { %5449 = vmatpush3.bf16.msra.mxu1 %v5448_v1  ;;  %v3204_v1 = vld [vmem:[%s7622_s6 + $0x788] sm:$0xff] }
0x1873   :  { %5429 = vmatpush3.bf16.msra.mxu0 %v5428_v37  ;;  %5451 = vmatprep.subr.bf16.mxu1 %v5450_v40  ;;  %v3177_v37 = vld [vmem:[%s7622_s6 + $0x6b0] sm:$0xff]  ;;  %v3178_v40 = vld [vmem:[%s7622_s6 + $0x6b8] sm:$0xff]  ;;  %v5502_v9 = vpack.c.bf16 %v3204_v1, %v3203_v63  ;;  %v3216_v14 = vld [vmem:[%s7622_s6 + $0x7e8] sm:$0xff] }
0x1874   :  { %5431 = vmatprep.subr.bf16.mxu0 %v5430_v10  ;;  %v3187_v10 = vld [vmem:[%s7622_s6 + $0x700] sm:$0xff]  ;;  %v5482_v21 = vpack.c.bf16 %v3178_v40, %v3177_v37  ;;  %v3170_v63 = vld [vmem:[%s7622_s6 + $0x678] sm:$0xff]  ;;  %v3213_v1 = vld [vmem:[%s7622_s6 + $0x7d0] sm:$0xff] }
0x1875   :  { %v5504_v19 = vpack.c.bf16 %v3188_v11, %v3187_v10  ;;  %v3214_v37 = vld [vmem:[%s7622_s6 + $0x7d8] sm:$0xff]  ;;  %v3219_v11 = vld [vmem:[%s7622_s6 + $0x800] sm:$0xff]  ;;  %v3872_v42 = vld [vmem:[%s7619_s3 + $0xe8] sm:$0xff] }
0x1876   :  { %5453 = vmatpush3.bf16.msra.mxu1 %v5452_v35  ;;  %v3206_v35 = vld [vmem:[%s7622_s6 + $0x798] sm:$0xff] }
0x1877   :  { %5433 = vmatpush3.bf16.msra.mxu0 %v5432_v16  ;;  %5455 = vmatprep.subr.bf16.mxu1 %v5454_v18  ;;  %v3179_v16 = vld [vmem:[%s7622_s6 + $0x6c0] sm:$0xff]  ;;  %v3180_v18 = vld [vmem:[%s7622_s6 + $0x6c8] sm:$0xff]  ;;  %v5506_v22 = vpack.c.bf16 %v3206_v35, %v3205_v0  ;;  %v3198_v10 = vld [vmem:[%s7622_s6 + $0x758] sm:$0xff]  ;;  %v5535_v35 = vpack.c.bf16 %v3220_v12, %v3219_v11 }
0x1878   :  { %5435 = vmatprep.subr.bf16.mxu0 %v5434_v23  ;;  %v3189_v23 = vld [vmem:[%s7622_s6 + $0x710] sm:$0xff]  ;;  %v5486_v25 = vpack.c.bf16 %v3180_v18, %v3179_v16  ;;  %v3199_v18 = vld [vmem:[%s7622_s6 + $0x760] sm:$0xff] }
0x1879   :  { %v5508_v49 = vpack.c.bf16 %v3190_v4, %v3189_v23  ;;  %v3217_v23 = vld [vmem:[%s7622_s6 + $0x7f0] sm:$0xff]  ;;  %v3218_v4 = vld [vmem:[%s7622_s6 + $0x7f8] sm:$0xff] }
0x187a   :  { %5457 = vmatpush3.bf16.msra.mxu1 %v5456_v28  ;;  %v3208_v28 = vld [vmem:[%s7622_s6 + $0x7a8] sm:$0xff]  ;;  %v5530_v26 = vpack.c.bf16 %v3218_v4, %v3217_v23 }
0x187b   :  { %5437 = vmatpush3.bf16.msra.mxu0 %v5436_v29  ;;  %5459 = vmatprep.subr.bf16.mxu1 %v5458_v30  ;;  %v3181_v29 = vld [vmem:[%s7622_s6 + $0x6d0] sm:$0xff]  ;;  %v3182_v30 = vld [vmem:[%s7622_s6 + $0x6d8] sm:$0xff] }
0x187c   :  { %5471 = vmatprep.subr.bf16.mxu0 %v5470_v58  ;;  %v5510_v58 = vpack.c.bf16 %v3208_v28, %v3207_v27  ;;  %v5490_v33 = vpack.c.bf16 %v3182_v30, %v3181_v29  ;;  %v3201_v27 = vld [vmem:[%s7622_s6 + $0x770] sm:$0xff]  ;;  %v3202_v28 = vld [vmem:[%s7622_s6 + $0x778] sm:$0xff]  ;;  %v3223_v29 = vld [vmem:[%s7622_s6 + $0x820] sm:$0xff] }
0x187d   :  { %v5532_v30 = vpack.c.bf16 %v3202_v28, %v3201_v27 }
0x187e   :  { %5461 = vmatpush3.bf16.msra.mxu1 %v5460_v45  ;;  %3581 = vmatmul.mubr.f32.vlgmr.msra.gmra.mrb[36].mxu0 %v7051_v7  ;;  %v5478_v7 = vpack.c.bf16 %v3176_v46, %v3175_v6  ;;  %v3184_v45 = vld [vmem:[%s7622_s6 + $0x6e8] sm:$0xff]  ;;  %v3185_v46 = vld [vmem:[%s7622_s6 + $0x6f0] sm:$0xff] }
0x187f   :  { %5473 = vmatpush3.bf16.msra.mxu0 %v5472_v43  ;;  %3720 = vmatprep.mubr.f32.mxu0 %v7139_v57  ;;  %v3160_v57 = vld [vmem:[%s7622_s6 + $0x628] sm:$0xff]  ;;  %v5494_v15 = vpack.c.bf16 %v3184_v45, %v3183_v39  ;;  %v3873_v39 = vld [vmem:[%s7619_s3 + $0xf0] sm:$0xff]  ;;  %v3874_v45 = vld [vmem:[%s7619_s3 + $0xf8] sm:$0xff] }
0x1880   :  { %5463 = vmatprep.subr.bf16.mxu1 %v5462_v48  ;;  %5475 = vmatprep.subr.bf16.mxu0 %v5474_v50  ;;  %v5480_v8 = vpack.c.bf16 %v3160_v57, %v3159_v62  ;;  %v3194_v48 = vld [vmem:[%s7622_s6 + $0x738] sm:$0xff]  ;;  %v3167_v50 = vld [vmem:[%s7622_s6 + $0x660] sm:$0xff]  ;;  %v3212_v6 = vld [vmem:[%s7622_s6 + $0x7c8] sm:$0xff] }
0x1881   :  { %v5518_v59 = vpack.c.bf16 %v3212_v6, %v3211_v56  ;;  %v3196_v62 = vld [vmem:[%s7622_s6 + $0x748] sm:$0xff] }
0x1882   :  { %5465 = vmatpush3.bf16.msra.mxu1 %v5464_v17  ;;  %v3186_v17 = vld [vmem:[%s7622_s6 + $0x6f8] sm:$0xff]  ;;  %v5520_v40 = vpack.c.bf16 %v3196_v62, %v3195_v60 }
0x1883   :  { %5477 = vmatpush3.bf16.msra.mxu0 %v5476_v24  ;;  %5467 = vmatprep.subr.bf16.mxu1 %v5466_v38  ;;  %v5516_v24 = vpack.c.bf16 %v3194_v48, %v3193_v47  ;;  %v5496_v38 = vpack.c.bf16 %v3168_v54, %v3167_v50  ;;  %v5498_v57 = vpack.c.bf16 %v3186_v17, %v3185_v46  ;;  %v4041_v48 = vld [vmem:[%s7619_s3 + $0xb9] ss:$0 sm:$0xff] }
0x1884   :  { %5479 = vmatprep.subr.bf16.mxu0 %v5478_v7  ;;  %v3169_v7 = vld [vmem:[%s7622_s6 + $0x670] sm:$0xff] }
0x1886   :  { %5469 = vmatpush3.bf16.msra.mxu1 %v5468_v3  ;;  %v5500_v3 = vpack.c.bf16 %v3170_v63, %v3169_v7 }
0x1887   :  { %5481 = vmatpush3.bf16.msra.mxu0 %v5480_v8  ;;  %5503 = vmatprep.subr.bf16.mxu1 %v5502_v9  ;;  %v5522_v8 = vpack.c.bf16 %v3214_v37, %v3213_v1  ;;  %v3197_v9 = vld [vmem:[%s7622_s6 + $0x750] sm:$0xff] }
0x1888   :  { %5483 = vmatprep.subr.bf16.mxu0 %v5482_v21  ;;  %v3215_v21 = vld [vmem:[%s7622_s6 + $0x7e0] sm:$0xff]  ;;  %v5524_v0 = vpack.c.bf16 %v3198_v10, %v3197_v9 }
0x1889   :  { %3651 = vmatmul.mubr.f32.vlgmr.msra.gmra.mrb[34].mxu1 %v7121_v51  ;;  %v3191_v51 = vld [vmem:[%s7622_s6 + $0x720] sm:$0xff]  ;;  %v5526_v16 = vpack.c.bf16 %v3216_v14, %v3215_v21 }
0x188a   :  { %5505 = vmatpush3.bf16.msra.mxu1 %v5504_v19  ;;  %3790 = vmatprep.mubr.f32.mxu1 %v7213_v13  ;;  %v3166_v13 = vld [vmem:[%s7622_s6 + $0x658] sm:$0xff]  ;;  %v5512_v43 = vpack.c.bf16 %v3192_v32, %v3191_v51  ;;  %v3200_v19 = vld [vmem:[%s7622_s6 + $0x768] sm:$0xff]  ;;  %v3867_v32 = vld [vmem:[%s7619_s3 + $0xc0] sm:$0xff] }
0x188b   :  { %5485 = vmatpush3.bf16.msra.mxu0 %v5484_v20  ;;  %5507 = vmatprep.subr.bf16.mxu1 %v5506_v22  ;;  %v5492_v41 = vpack.c.bf16 %v3166_v13, %v3165_v61  ;;  %v3221_v20 = vld [vmem:[%s7622_s6 + $0x810] sm:$0xff]  ;;  %v3222_v22 = vld [vmem:[%s7622_s6 + $0x818] sm:$0xff]  ;;  %v5528_v36 = vpack.c.bf16 %v3200_v19, %v3199_v18  ;;  %v3868_v61 = vld [vmem:[%s7619_s3 + $0xc8] sm:$0xff] }
0x188c   :  { %5487 = vmatprep.subr.bf16.mxu0 %v5486_v25  ;;  %v5538_v25 = vpack.c.bf16 %v3222_v22, %v3221_v20  ;;  %v3871_v13 = vld [vmem:[%s7619_s3 + $0xe0] sm:$0xff]  ;;  %v4043_v22 = vld [vmem:[%s7619_s3 + $0xba] ss:$0 sm:$0xff] }
0x188d   :  { %v5553_v34 = vpack.c.bf16 %v3872_v42, %v3871_v13 }
0x188e   :  { %5509 = vmatpush3.bf16.msra.mxu1 %v5508_v49 }
0x188f   :  { %5489 = vmatpush3.bf16.msra.mxu0 %v5488_v52  ;;  %5511 = vmatprep.subr.bf16.mxu1 %v5510_v58  ;;  %v3225_v52 = vld [vmem:[%s7622_s6 + $0x830] sm:$0xff]  ;;  %v3226_v58 = vld [vmem:[%s7622_s6 + $0x838] sm:$0xff] }
0x1890   :  { %5491 = vmatprep.subr.bf16.mxu0 %v5490_v33  ;;  %v5544_v51 = vpack.c.bf16 %v3226_v58, %v3225_v52  ;;  %v5547_v33 = vpack.c.bf16 %v3868_v61, %v3867_v32 }
0x1892   :  { %5513 = vmatpush3.bf16.msra.mxu1 %v5512_v43  ;;  %v5556_v43 = vpack.c.bf16 %v3874_v45, %v3873_v39 }
0x1893   :  { %5493 = vmatpush3.bf16.msra.mxu0 %v5492_v41  ;;  %5515 = vmatprep.subr.bf16.mxu1 %v5514_v44 }
0x1894   :  { %5495 = vmatprep.subr.bf16.mxu0 %v5494_v15 }
0x1896   :  { %5517 = vmatpush3.bf16.msra.mxu1 %v5516_v24 }
0x1897   :  { %5497 = vmatpush3.bf16.msra.mxu0 %v5496_v38  ;;  %5519 = vmatprep.subr.bf16.mxu1 %v5518_v59 }
0x1898   :  { %5499 = vmatprep.subr.bf16.mxu0 %v5498_v57 }
0x189a   :  { %5521 = vmatpush3.bf16.msra.mxu1 %v5520_v40 }
0x189b   :  { %5501 = vmatpush3.bf16.msra.mxu0 %v5500_v3  ;;  %5523 = vmatprep.subr.bf16.mxu1 %v5522_v8 }
0x189c   :  { %5534 = vmatprep.subr.bf16.mxu0 %v5660_v5 }
0x189e   :  { %5525 = vmatpush3.bf16.msra.mxu1 %v5524_v0  ;;  %3721 = vmatmul.mubr.f32.vlgmr.msra.gmra.mrb[38].mxu0 %v7124_v53  ;;  %v3224_v53 = vld [vmem:[%s7622_s6 + $0x828] sm:$0xff] }
0x189f   :  { %5536 = vmatpush3.bf16.msra.mxu0 %v5535_v35  ;;  %5527 = vmatprep.subr.bf16.mxu1 %v5526_v16  ;;  %v5541_v49 = vpack.c.bf16 %v3224_v53, %v3223_v29 }
0x18a0   :  { %5537 = vmatprep.subr.bf16.mxu0 %v5660_v5  ;;  %4894 = vmatprep.mubr.msk.f32.mxu0 %vm5659_vm0, %v5658_v2 }
0x18a2   :  { %5529 = vmatpush3.bf16.msra.mxu1 %v5528_v36 }
0x18a3   :  { %5539 = vmatpush3.bf16.msra.mxu0 %v5538_v25  ;;  %5531 = vmatprep.subr.bf16.mxu1 %v5530_v26 }
0x18a4   :  { %5540 = vmatprep.subr.bf16.mxu0 %v5660_v5 }
0x18a6   :  { %5533 = vmatpush3.bf16.msra.mxu1 %v5532_v30 }
0x18a7   :  { %5542 = vmatpush3.bf16.msra.mxu0 %v5541_v49  ;;  %5546 = vmatprep.subr.bf16.mxu1 %v5660_v5 }
0x18a8   :  { %5543 = vmatprep.subr.bf16.mxu0 %v5660_v5 }
0x18a9   :  { %3791 = vmatmul.mubr.f32.vlgmr.msra.gmra.mrb[36].mxu1 %v7207_v55  ;;  %v3870_v55 = vld [vmem:[%s7619_s3 + $0xd8] sm:$0xff] }
0x18aa   :  { %4913 = vmatprep.mubr.msk.f32.mxu1 %vm5659_vm0, %v5658_v2  ;;  %5548 = vmatpush3.bf16.msra.mxu1 %v5547_v33  ;;  %v3869_v2 = vld [vmem:[%s7619_s3 + $0xd0] sm:$0xff] }
0x18ab   :  { %5545 = vmatpush3.bf16.msra.mxu0 %v5544_v51  ;;  %5549 = vmatprep.subr.bf16.mxu1 %v5660_v5 }
0x18ae   :  { %4895 = vmatmul.mubr.msk.f32.vlgmr.msra.gmra.mrb[40].mxu0 %vm3232_vm13, %v7210_v31  ;;  %v5550_v31 = vpack.c.bf16 %v3870_v55, %v3869_v2 }
0x18b0   :  { %5551 = vmatpush3.bf16.msra.mxu1 %v5550_v31 }
0x18b1   :  { %5552 = vmatprep.subr.bf16.mxu1 %v5660_v5 }
0x18b4   :  { %5554 = vmatpush3.bf16.msra.mxu1 %v5553_v34 }
0x18b5   :  { %5555 = vmatprep.subr.bf16.mxu1 %v5660_v5 }
0x18b8   :  { %5557 = vmatpush3.bf16.msra.mxu1 %v5556_v43 }
0x1911   :  { %v4251_v41 = vpop.f32.mrb[32].mxu0 }
0x1912   :  { %v4252_v44 = vpop.f32.mrb[33].mxu0 }
0x1913   :  { %v4253_v47 = vadd.f32 %v4252_v44, %v4251_v41 }
0x1915   :  { %v3303_v5 = vadd.f32 %v4253_v47, %v4041_v48 }
0x191c   :  { %v4286_v50 = vpop.f32.mrb[30].mxu1 }
0x191d   :  { %v4287_v15 = vpop.f32.mrb[31].mxu1 }
0x191e   :  { %v4288_v54 = vadd.f32 %v4287_v15, %v4286_v50 }
0x1920   :  { %v3373_v56 = vadd.f32 %v4288_v54, %v3303_v5 }
0x1931   :  { %v4321_v6 = vpop.f32.mrb[34].mxu0 }
0x1932   :  { %v4322_v46 = vpop.f32.mrb[35].mxu0 }
0x1933   :  { %v4323_v17 = vadd.f32 %v4322_v46, %v4321_v6 }
0x1935   :  { %v3443_v24 = vadd.f32 %v4323_v17, %v3373_v56 }
0x193c   :  { %v4356_v38 = vpop.f32.mrb[32].mxu1 }
0x193d   :  { %v4357_v59 = vpop.f32.mrb[33].mxu1 }
0x193e   :  { %v4358_v60 = vadd.f32 %v4357_v59, %v4356_v38 }
0x1940   :  { %v3513_v62 = vadd.f32 %v4358_v60, %v3443_v24 }
0x1951   :  { %v4391_v7 = vpop.f32.mrb[36].mxu0 }
0x1952   :  { %v4392_v57 = vpop.f32.mrb[37].mxu0 }
0x1953   :  { %v4393_v63 = vadd.f32 %v4392_v57, %v4391_v7 }
0x1955   :  { %v3583_v1 = vadd.f32 %v4393_v63, %v3513_v62 }
0x195c   :  { %v4426_v37 = vpop.f32.mrb[34].mxu1 }
0x195d   :  { %v4427_v40 = vpop.f32.mrb[35].mxu1 }
0x195e   :  { %v4428_v3 = vadd.f32 %v4427_v40, %v4426_v37 }
0x1960   :  { %v3653_v8 = vadd.f32 %v4428_v3, %v3583_v1 }
0x1971   :  { %v4461_v9 = vpop.f32.mrb[38].mxu0 }
0x1972   :  { %v4462_v10 = vpop.f32.mrb[39].mxu0 }
0x1973   :  { %v4463_v11 = vadd.f32 %v4462_v10, %v4461_v9 }
0x1975   :  { %v3723_v12 = vadd.f32 %v4463_v11, %v3653_v8 }
0x197c   :  { %v4496_v21 = vpop.f32.mrb[36].mxu1 }
0x197d   :  { %v4497_v14 = vpop.f32.mrb[37].mxu1 }
0x197e   :  { %v4498_v0 = vadd.f32 %v4497_v14, %v4496_v21 }
0x1980   :  { %v3793_v35 = vadd.f32 %v4498_v0, %v3723_v12 }
0x1981   :  { %v3862_v16 = vpop.f32.mrb[40].mxu0 }
0x1982   :  { %v3863_v18 = vadd.f32 %v3862_v16, %v3793_v35  ;;  %v4896_v19 = vpop.f32.mrb[41].mxu0 }
0x1984   :  { %v3866_v20 = vmax.f32 %v3863_v18, 0.0 }
0x1986   :  { %4914 = vmatmul.mubr.msk.f32.vlgmr.msra.gmra.mrb[38].mxu1 %vm3232_vm13, %v3866_v20 }
0x1a59   :  { %v3949_v23 = vpop.f32.mrb[38].mxu1 }
0x1a5a   :  { %v3950_v4 = vadd.f32 %v4043_v22, %v3949_v23  ;;  %v4915_v36 = vpop.f32.mrb[39].mxu1 }
0x1a5c   :  { %3953 = vst [vmem:[#allocation2] sm:$0x3] %v3950_v4 }
0x1a5d   :  { %5644 = shalt.err (!%p5641_p4)
}
0x1a5e   :  { %s5645_s30 = scalar_lea.hbm %s7623_s7, 32 }
0x1a5f   :  { %p5646_p5 = scmp.ne.s32.totalorder %s7623_s7, %s5645_s30  ;;  %p5649_p6 = scmp.lt.u32.totalorder %s5645_s30, %s7623_s7 }
0x1a61   :  { %p5651_p7 = pnand %p5649_p6, %p5646_p5 }
0x1a63   :  { %5654 = shalt.err (!%p5651_p7)
}
0x1a64   :  { %3963 = dma.vmem_to_hbm [thread:$0]  %s3961_s26, 32, %s7623_s7, [#allocation3]  }
0x1a65   :  { %5655 = dma.done.wait [#allocation3], 32  }
0x1a66   :  { %5656 = vsyncadd [#allocation3], 4294967264 }
0x1a67   :  { %3967 = vsyncpa [#allocation3], 1 }

</bundles_post_ra>
